<compile_context>
chip_gen: v5e
topology: v5e:2x2
jax: 0.10.0
libtpu: 0.0.40
codegen_flags: <defaults>
</compile_context>

<pallas_src>
import functools

import jax
import jax.numpy as jnp
from jax import lax
from jax.experimental import pallas as pl
from jax.experimental.pallas import tpu as pltpu


_NEG_INF = -1e30


# ----------------------------------------------------------------------------
# In-kernel building blocks (plain functions on values, traced inside kernel)
# ----------------------------------------------------------------------------

def _gat_layer_body(x, neg_mask, w_cat, att_dst_blk, att_src_rows,
                    bn_scale, bn_shift, *, heads, head_dim, concat):
    """GATConv(x) + skip Linear(x) -> folded BatchNorm(eval) -> ELU."""
    hc = heads * head_dim

    # Merged GAT-transform + skip matmul: one wide MXU pass over x.
    y = jnp.dot(x, w_cat, preferred_element_type=jnp.float32)   # [N, hc + out]
    xw = y[:, :hc]                                               # [N, H*C]
    skip = y[:, hc:]                                             # [N, out]

    # Batched attention projections (all heads at once, no transposes):
    #   alpha_dst[:, h] = xw_h . att_dst[h]   (column layout)
    #   alpha_src_t[h, :] = att_src[h] . xw_h (row layout, ready to broadcast)
    alpha_dst = jnp.dot(xw, att_dst_blk,
                        preferred_element_type=jnp.float32)      # [N, H]
    dims = (((1,), (1,)), ((), ()))                              # A @ B^T
    alpha_src_t = lax.dot_general(att_src_rows, xw, dims,
                                  preferred_element_type=jnp.float32)  # [H, N]

    head_outs = []
    for h in range(heads):
        e = alpha_dst[:, h:h + 1] + alpha_src_t[h:h + 1, :]      # [N, N]
        e = jnp.where(e > 0, e, 0.2 * e)                         # LeakyReLU(0.2)
        e = e + neg_mask                                         # mask non-edges
        e = e - jnp.max(e, axis=-1, keepdims=True)
        p = jnp.exp(e)
        inv = pl.reciprocal(jnp.sum(p, axis=-1, keepdims=True), approx=True)
        att = (p * inv).astype(jnp.bfloat16)                     # row softmax
        xw_h = xw[:, h * head_dim:(h + 1) * head_dim].astype(jnp.bfloat16)
        head_outs.append(jnp.dot(att, xw_h,
                                 preferred_element_type=jnp.float32))  # [N, C]

    if concat:
        conv = head_outs[0] if heads == 1 else jnp.concatenate(head_outs, axis=-1)
    else:
        conv = head_outs[0]
        for ho in head_outs[1:]:
            conv = conv + ho
        conv = conv * (1.0 / heads)                              # head mean

    # conv + skip, then folded (bias + BatchNorm eval) scale/shift, then ELU.
    y = (conv + skip) * bn_scale + bn_shift
    # ELU; exp(min(y,0))-1 (expm1 would be marginally more accurate near 0 but
    # plain exp is guaranteed to lower on the TPU EUP).
    return jnp.where(y > 0, y, jnp.exp(jnp.minimum(y, 0.0)) - 1.0)
    # NOTE: F.dropout is a no-op in eval mode.


def _mlp_head_body(x, w1, b1, w2, b2):
    """Linear (BN folded into w1/b1) -> ReLU -> Linear -> log_softmax."""
    h = jnp.dot(x, w1, preferred_element_type=jnp.float32) + b1
    h = jnp.maximum(h, 0.0)
    z = jnp.dot(h, w2, preferred_element_type=jnp.float32) + b2
    m = jnp.max(z, axis=-1, keepdims=True)
    lse = m + jnp.log(jnp.sum(jnp.exp(z - m), axis=-1, keepdims=True))
    return z - lse


# ----------------------------------------------------------------------------
# Fused Pallas kernels
# ----------------------------------------------------------------------------

def fused_gnn_kernel(*refs, layer_cfgs, include_mlp):
    """Whole ComplexGNN forward in a single kernel invocation.

    Ref layout (all whole-array VMEM blocks):
      x, neg_mask, norm_adj,
      per GAT layer: w_cat, att_dst_blk, att_src_rows, bn_scale, bn_shift,
      gcn_w, gcn_b,
      [w1, b1, w2, b2]  (only when include_mlp),
      out_ref
    """
    out_ref = refs[-1]
    it = iter(refs[:-1])

    x = next(it)[...]                 # [N, F_in] f32
    neg_mask = next(it)[...]          # [N, N] additive mask (0 / -1e30), f32
    norm_adj = next(it)[...]          # [N, N] bf16 (GCN normalized adjacency)

    for (heads, head_dim, concat) in layer_cfgs:
        w_cat = next(it)[...]
        att_dst_blk = next(it)[...]
        att_src_rows = next(it)[...]
        bn_scale = next(it)[...]
        bn_shift = next(it)[...]
        x = _gat_layer_body(x, neg_mask, w_cat, att_dst_blk, att_src_rows,
                            bn_scale, bn_shift,
                            heads=heads, head_dim=head_dim, concat=concat)

    # Final GCNConv: norm_adj @ (x W) + b  (bf16 MXU operands, f32 accumulate).
    gcn_w = next(it)[...]
    gcn_b = next(it)[...]
    xw = jnp.dot(x, gcn_w, preferred_element_type=jnp.float32).astype(jnp.bfloat16)
    x = jnp.dot(norm_adj, xw, preferred_element_type=jnp.float32) + gcn_b

    if include_mlp:
        w1 = next(it)[...]
        b1 = next(it)[...]
        w2 = next(it)[...]
        b2 = next(it)[...]
        x = _mlp_head_body(x, w1, b1, w2, b2)

    out_ref[...] = x.astype(out_ref.dtype)


def mlp_head_kernel(x_ref, w1_ref, b1_ref, w2_ref, b2_ref, out_ref):
    """Standalone MLP head (used only when global_mean_pool runs in between)."""
    out_ref[...] = _mlp_head_body(x_ref[...], w1_ref[...], b1_ref[...],
                                  w2_ref[...], b2_ref[...]).astype(out_ref.dtype)


# ----------------------------------------------------------------------------
# pallas_call wrapper (whole-array blocks; demo sizes fit easily in VMEM)
# ----------------------------------------------------------------------------

_VMEM = pl.BlockSpec(memory_space=pltpu.MemorySpace.VMEM)


def _whole_array_call(kernel, args, out_shape):
    return pl.pallas_call(
        kernel,
        out_shape=out_shape,
        in_specs=[_VMEM] * len(args),
        out_specs=_VMEM,
    )(*args)


# ----------------------------------------------------------------------------
# Parameter init (mirrors PyTorch module) + host-side folding for the kernel
# ----------------------------------------------------------------------------

def _bn_eval(dim):
    # gamma=1, beta=0, running_mean=0, running_var=1, eps=1e-5 (PyTorch defaults)
    scale = jnp.full((1, dim), 1.0 / jnp.sqrt(1.0 + 1e-5), jnp.float32)
    shift = jnp.zeros((1, dim), jnp.float32)
    return scale, shift


def init_params(key, num_features, num_classes, num_layers, hidden_dim, heads):
    params = {"layers": []}
    hh = hidden_dim * heads

    def lin(k, fi, fo, scale=0.1):
        return jax.random.normal(k, (fi, fo), jnp.float32) * scale

    keys = jax.random.split(key, 8 * num_layers + 8)
    ki = iter(range(len(keys)))

    layer_cfg = [(num_features, heads, hidden_dim, True)]                # layer 0
    for _ in range(num_layers - 2):
        layer_cfg.append((hh, heads, hidden_dim, True))                  # middle
    layer_cfg.append((hh, 1, hidden_dim, False))                         # last GAT

    for (fi, h, c, concat) in layer_cfg:
        out_dim = h * c if concat else c
        scale, shift = _bn_eval(out_dim)
        params["layers"].append(dict(
            w_gat=lin(keys[next(ki)], fi, h * c),
            att_src=jax.random.normal(keys[next(ki)], (h, c), jnp.float32) * 0.1,
            att_dst=jax.random.normal(keys[next(ki)], (h, c), jnp.float32) * 0.1,
            bias_gat=jnp.zeros((1, out_dim), jnp.float32),
            w_skip=lin(keys[next(ki)], fi, out_dim),
            b_skip=jax.random.normal(keys[next(ki)], (1, out_dim), jnp.float32) * 0.01,
            bn_scale=scale, bn_shift=shift,
            heads=h, head_dim=c, concat=concat,
        ))

    params["gcn_w"] = lin(keys[next(ki)], hidden_dim, num_classes)
    params["gcn_b"] = jnp.zeros((1, num_classes), jnp.float32)

    mscale, mshift = _bn_eval(hidden_dim)
    params["mlp"] = dict(
        w1=lin(keys[next(ki)], num_classes, hidden_dim),
        b1=jax.random.normal(keys[next(ki)], (1, hidden_dim), jnp.float32) * 0.01,
        bn_scale=mscale, bn_shift=mshift,
        w2=lin(keys[next(ki)], hidden_dim, num_classes),
        b2=jnp.zeros((1, num_classes), jnp.float32),
    )
    return params


def fold_params(params):
    """Host-side folding into the fused-kernel argument layout."""
    layer_arrays, cfgs = [], []
    for lp in params["layers"]:
        h, c, concat = lp["heads"], lp["head_dim"], lp["concat"]
        hc = h * c
        # merged GAT + skip weights
        w_cat = jnp.concatenate([lp["w_gat"], lp["w_skip"]], axis=1)
        # block-diagonal attention projections
        att_dst_blk = jnp.zeros((hc, h), jnp.float32)
        att_src_rows = jnp.zeros((h, hc), jnp.float32)
        for hd in range(h):
            att_dst_blk = att_dst_blk.at[hd * c:(hd + 1) * c, hd].set(lp["att_dst"][hd])
            att_src_rows = att_src_rows.at[hd, hd * c:(hd + 1) * c].set(lp["att_src"][hd])
        # fold GAT bias + skip bias into the BatchNorm(eval) shift
        scale = lp["bn_scale"]
        shift = (lp["bias_gat"] + lp["b_skip"]) * scale + lp["bn_shift"]
        layer_arrays += [w_cat, att_dst_blk, att_src_rows, scale, shift]
        cfgs.append((h, c, concat))

    gcn_arrays = [params["gcn_w"], params["gcn_b"]]

    mp = params["mlp"]
    w1f = mp["w1"] * mp["bn_scale"]
    b1f = mp["b1"] * mp["bn_scale"] + mp["bn_shift"]
    mlp_arrays = [w1f, b1f, mp["w2"], mp["b2"]]

    num_classes = params["gcn_w"].shape[1]
    return layer_arrays, tuple(cfgs), gcn_arrays, mlp_arrays, num_classes


def build_adjacency(edge_index, num_nodes):
    """Returns additive attention mask (0 / -1e30) and GCN-normalized (A+I)."""
    src, dst = edge_index[0], edge_index[1]
    adj = jnp.zeros((num_nodes, num_nodes), jnp.float32).at[dst, src].add(1.0)
    adj = jnp.minimum(adj, 1.0)
    adj_hat = jnp.maximum(adj, jnp.eye(num_nodes, dtype=jnp.float32))   # + I
    neg_mask = jnp.where(adj_hat > 0, 0.0, _NEG_INF).astype(jnp.float32)
    deg = jnp.sum(adj_hat, axis=1)
    dinv = 1.0 / jnp.sqrt(jnp.maximum(deg, 1e-12))
    norm_adj = (dinv[:, None] * adj_hat * dinv[None, :]).astype(jnp.bfloat16)
    return neg_mask, norm_adj


# ----------------------------------------------------------------------------
# Forward
# ----------------------------------------------------------------------------

def complex_gnn_forward(params, x, edge_index, batch=None):
    n = x.shape[0]
    neg_mask, norm_adj = build_adjacency(edge_index, n)
    layer_arrays, cfgs, gcn_arrays, mlp_arrays, num_classes = fold_params(params)

    include_mlp = batch is None
    args = [x.astype(jnp.float32), neg_mask, norm_adj] + layer_arrays + gcn_arrays
    if include_mlp:
        args += mlp_arrays

    kern = functools.partial(fused_gnn_kernel, layer_cfgs=cfgs,
                             include_mlp=include_mlp)
    out = _whole_array_call(kern, args,
                            jax.ShapeDtypeStruct((n, num_classes), jnp.float32))
    if batch is None:
        return out

    # global_mean_pool (glue: segment mean over nodes of each graph), then MLP.
    num_graphs = int(jnp.max(batch)) + 1
    sums = jnp.zeros((num_graphs, out.shape[1]), out.dtype).at[batch].add(out)
    cnts = jnp.zeros((num_graphs, 1), out.dtype).at[batch].add(1.0)
    pooled = sums / cnts
    return _whole_array_call(
        mlp_head_kernel, [pooled] + mlp_arrays,
        jax.ShapeDtypeStruct((num_graphs, num_classes), jnp.float32))


# ----------------------------------------------------------------------------
# Example run
# ----------------------------------------------------------------------------

if __name__ == "__main__":
    NUM_NODES = 32
    NUM_FEATURES = 16
    NUM_CLASSES = 8
    NUM_LAYERS = 4
    HIDDEN_DIM = 32
    HEADS = 4

    key = jax.random.PRNGKey(0)
    kx, kp = jax.random.split(key)

    x = jax.random.normal(kx, (NUM_NODES, NUM_FEATURES), jnp.float32)

    # deterministic ring graph, both directions -> edge_index [2, 2N]
    src = jnp.arange(NUM_NODES, dtype=jnp.int32)
    dst = (src + 1) % NUM_NODES
    edge_index = jnp.stack([jnp.concatenate([src, dst]),
                            jnp.concatenate([dst, src])], axis=0)

    params = init_params(kp, NUM_FEATURES, NUM_CLASSES, NUM_LAYERS,
                         HIDDEN_DIM, HEADS)

    out = complex_gnn_forward(params, x, edge_index, batch=None)
    out = jax.block_until_ready(out)

    assert out.shape == (NUM_NODES, NUM_CLASSES)
    assert bool(jnp.all(jnp.isfinite(out)))
    # rows of log_softmax should (exp-)sum to ~1
    assert bool(jnp.allclose(jnp.sum(jnp.exp(out), axis=-1), 1.0, atol=1e-4))

    print("KERNEL_OK")
</pallas_src>

<mosaic_0001>
module attributes {stable_mosaic.version = 11 : i64} {
  func.func @fused_gnn_kernel(%arg0: memref<32x16xf32, #tpu.memory_space<vmem>>, %arg1: memref<32x32xf32, #tpu.memory_space<vmem>>, %arg2: memref<32x32xbf16, #tpu.memory_space<vmem>>, %arg3: memref<16x256xf32, #tpu.memory_space<vmem>>, %arg4: memref<128x4xf32, #tpu.memory_space<vmem>>, %arg5: memref<4x128xf32, #tpu.memory_space<vmem>>, %arg6: memref<1x128xf32, #tpu.memory_space<vmem>>, %arg7: memref<1x128xf32, #tpu.memory_space<vmem>>, %arg8: memref<128x256xf32, #tpu.memory_space<vmem>>, %arg9: memref<128x4xf32, #tpu.memory_space<vmem>>, %arg10: memref<4x128xf32, #tpu.memory_space<vmem>>, %arg11: memref<1x128xf32, #tpu.memory_space<vmem>>, %arg12: memref<1x128xf32, #tpu.memory_space<vmem>>, %arg13: memref<128x256xf32, #tpu.memory_space<vmem>>, %arg14: memref<128x4xf32, #tpu.memory_space<vmem>>, %arg15: memref<4x128xf32, #tpu.memory_space<vmem>>, %arg16: memref<1x128xf32, #tpu.memory_space<vmem>>, %arg17: memref<1x128xf32, #tpu.memory_space<vmem>>, %arg18: memref<128x64xf32, #tpu.memory_space<vmem>>, %arg19: memref<32x1xf32, #tpu.memory_space<vmem>>, %arg20: memref<1x32xf32, #tpu.memory_space<vmem>>, %arg21: memref<1x32xf32, #tpu.memory_space<vmem>>, %arg22: memref<1x32xf32, #tpu.memory_space<vmem>>, %arg23: memref<32x8xf32, #tpu.memory_space<vmem>>, %arg24: memref<1x8xf32, #tpu.memory_space<vmem>>, %arg25: memref<8x32xf32, #tpu.memory_space<vmem>>, %arg26: memref<1x32xf32, #tpu.memory_space<vmem>>, %arg27: memref<32x8xf32, #tpu.memory_space<vmem>>, %arg28: memref<1x8xf32, #tpu.memory_space<vmem>>, %arg29: memref<32x8xf32, #tpu.memory_space<vmem>>) attributes {dimension_semantics = [], scalar_prefetch = 0 : i64, scratch_operands = 0 : i64, tpu.core_type = #tpu.core_type<tc>} {
    %c0 = arith.constant 0 : index
    %c0_0 = arith.constant 0 : index
    %0 = vector.load %arg0[%c0, %c0_0] : memref<32x16xf32, #tpu.memory_space<vmem>>, vector<32x16xf32>
    %c0_1 = arith.constant 0 : index
    %c0_2 = arith.constant 0 : index
    %1 = vector.load %arg1[%c0_1, %c0_2] : memref<32x32xf32, #tpu.memory_space<vmem>>, vector<32x32xf32>
    %c0_3 = arith.constant 0 : index
    %c0_4 = arith.constant 0 : index
    %2 = vector.load %arg2[%c0_3, %c0_4] : memref<32x32xbf16, #tpu.memory_space<vmem>>, vector<32x32xbf16>
    %c0_5 = arith.constant 0 : index
    %c0_6 = arith.constant 0 : index
    %3 = vector.load %arg3[%c0_5, %c0_6] : memref<16x256xf32, #tpu.memory_space<vmem>>, vector<16x256xf32>
    %c0_7 = arith.constant 0 : index
    %c0_8 = arith.constant 0 : index
    %4 = vector.load %arg4[%c0_7, %c0_8] : memref<128x4xf32, #tpu.memory_space<vmem>>, vector<128x4xf32>
    %c0_9 = arith.constant 0 : index
    %c0_10 = arith.constant 0 : index
    %5 = vector.load %arg5[%c0_9, %c0_10] : memref<4x128xf32, #tpu.memory_space<vmem>>, vector<4x128xf32>
    %c0_11 = arith.constant 0 : index
    %c0_12 = arith.constant 0 : index
    %6 = vector.load %arg6[%c0_11, %c0_12] : memref<1x128xf32, #tpu.memory_space<vmem>>, vector<1x128xf32>
    %c0_13 = arith.constant 0 : index
    %c0_14 = arith.constant 0 : index
    %7 = vector.load %arg7[%c0_13, %c0_14] : memref<1x128xf32, #tpu.memory_space<vmem>>, vector<1x128xf32>
    %cst = arith.constant dense<0.000000e+00> : vector<32x256xf32>
    %8 = tpu.matmul %0, %3, %cst {dimension_numbers = #tpu.dot_dimension_numbers<[1], [0], [0], [1], [0, 0, 1, 1], [], []>} : vector<32x16xf32>, vector<16x256xf32>, vector<32x256xf32> -> vector<32x256xf32>
    %9 = vector.extract_strided_slice %8 {offsets = [0, 0], sizes = [32, 128], strides = [1, 1]} : vector<32x256xf32> to vector<32x128xf32>
    %10 = vector.extract_strided_slice %8 {offsets = [0, 128], sizes = [32, 128], strides = [1, 1]} : vector<32x256xf32> to vector<32x128xf32>
    %cst_15 = arith.constant dense<0.000000e+00> : vector<32x4xf32>
    %11 = tpu.matmul %9, %4, %cst_15 {dimension_numbers = #tpu.dot_dimension_numbers<[1], [0], [0], [1], [0, 0, 1, 1], [], []>} : vector<32x128xf32>, vector<128x4xf32>, vector<32x4xf32> -> vector<32x4xf32>
    %cst_16 = arith.constant dense<0.000000e+00> : vector<4x32xf32>
    %12 = tpu.matmul %5, %9, %cst_16 {dimension_numbers = #tpu.dot_dimension_numbers<[1], [1], [0], [0], [0, 0, 1, 0], [], []>} : vector<4x128xf32>, vector<32x128xf32>, vector<4x32xf32> -> vector<4x32xf32>
    %13 = vector.extract_strided_slice %11 {offsets = [0, 0], sizes = [32, 1], strides = [1, 1]} : vector<32x4xf32> to vector<32x1xf32>
    %14 = vector.extract_strided_slice %12 {offsets = [0, 0], sizes = [1, 32], strides = [1, 1]} : vector<4x32xf32> to vector<1x32xf32>
    %15 = vector.broadcast %13 : vector<32x1xf32> to vector<32x32xf32>
    %16 = vector.broadcast %14 : vector<1x32xf32> to vector<32x32xf32>
    %17 = arith.addf %15, %16 : vector<32x32xf32>
    %cst_17 = arith.constant 0.000000e+00 : f32
    %18 = vector.broadcast %cst_17 : f32 to vector<32x32xf32>
    %19 = arith.cmpf ogt, %17, %18 : vector<32x32xf32>
    %cst_18 = arith.constant 2.000000e-01 : f32
    %20 = vector.broadcast %cst_18 : f32 to vector<32x32xf32>
    %21 = arith.mulf %20, %17 : vector<32x32xf32>
    %22 = arith.select %19, %17, %21 : vector<32x32xi1>, vector<32x32xf32>
    %23 = arith.addf %22, %1 : vector<32x32xf32>
    %cst_19 = arith.constant dense<0xFF800000> : vector<32xf32>
    %24 = vector.multi_reduction <maximumf>, %23, %cst_19 [1] : vector<32x32xf32> to vector<32xf32>
    %25 = vector.shape_cast %24 : vector<32xf32> to vector<32x1xf32>
    %26 = vector.broadcast %25 : vector<32x1xf32> to vector<32x32xf32>
    %27 = arith.subf %23, %26 : vector<32x32xf32>
    %28 = math.exp %27 : vector<32x32xf32>
    %cst_20 = arith.constant dense<0.000000e+00> : vector<32xf32>
    %29 = vector.multi_reduction <add>, %28, %cst_20 [1] : vector<32x32xf32> to vector<32xf32>
    %30 = vector.shape_cast %29 : vector<32xf32> to vector<32x1xf32>
    %31 = tpu.reciprocal %30 {approx = true} : vector<32x1xf32> -> vector<32x1xf32>
    %32 = vector.broadcast %31 : vector<32x1xf32> to vector<32x32xf32>
    %33 = arith.mulf %28, %32 : vector<32x32xf32>
    %34 = arith.truncf %33 : vector<32x32xf32> to vector<32x32xbf16>
    %35 = vector.extract_strided_slice %9 {offsets = [0, 0], sizes = [32, 32], strides = [1, 1]} : vector<32x128xf32> to vector<32x32xf32>
    %36 = arith.truncf %35 : vector<32x32xf32> to vector<32x32xbf16>
    %cst_21 = arith.constant dense<0.000000e+00> : vector<32x32xf32>
    %37 = tpu.matmul %34, %36, %cst_21 {dimension_numbers = #tpu.dot_dimension_numbers<[1], [0], [0], [1], [0, 0, 1, 1], [], []>} : vector<32x32xbf16>, vector<32x32xbf16>, vector<32x32xf32> -> vector<32x32xf32>
    %38 = vector.extract_strided_slice %11 {offsets = [0, 1], sizes = [32, 1], strides = [1, 1]} : vector<32x4xf32> to vector<32x1xf32>
    %39 = vector.extract_strided_slice %12 {offsets = [1, 0], sizes = [1, 32], strides = [1, 1]} : vector<4x32xf32> to vector<1x32xf32>
    %40 = vector.broadcast %38 : vector<32x1xf32> to vector<32x32xf32>
    %41 = vector.broadcast %39 : vector<1x32xf32> to vector<32x32xf32>
    %42 = arith.addf %40, %41 : vector<32x32xf32>
    %cst_22 = arith.constant 0.000000e+00 : f32
    %43 = vector.broadcast %cst_22 : f32 to vector<32x32xf32>
    %44 = arith.cmpf ogt, %42, %43 : vector<32x32xf32>
    %cst_23 = arith.constant 2.000000e-01 : f32
    %45 = vector.broadcast %cst_23 : f32 to vector<32x32xf32>
    %46 = arith.mulf %45, %42 : vector<32x32xf32>
    %47 = arith.select %44, %42, %46 : vector<32x32xi1>, vector<32x32xf32>
    %48 = arith.addf %47, %1 : vector<32x32xf32>
    %cst_24 = arith.constant dense<0xFF800000> : vector<32xf32>
    %49 = vector.multi_reduction <maximumf>, %48, %cst_24 [1] : vector<32x32xf32> to vector<32xf32>
    %50 = vector.shape_cast %49 : vector<32xf32> to vector<32x1xf32>
    %51 = vector.broadcast %50 : vector<32x1xf32> to vector<32x32xf32>
    %52 = arith.subf %48, %51 : vector<32x32xf32>
    %53 = math.exp %52 : vector<32x32xf32>
    %cst_25 = arith.constant dense<0.000000e+00> : vector<32xf32>
    %54 = vector.multi_reduction <add>, %53, %cst_25 [1] : vector<32x32xf32> to vector<32xf32>
    %55 = vector.shape_cast %54 : vector<32xf32> to vector<32x1xf32>
    %56 = tpu.reciprocal %55 {approx = true} : vector<32x1xf32> -> vector<32x1xf32>
    %57 = vector.broadcast %56 : vector<32x1xf32> to vector<32x32xf32>
    %58 = arith.mulf %53, %57 : vector<32x32xf32>
    %59 = arith.truncf %58 : vector<32x32xf32> to vector<32x32xbf16>
    %60 = vector.extract_strided_slice %9 {offsets = [0, 32], sizes = [32, 32], strides = [1, 1]} : vector<32x128xf32> to vector<32x32xf32>
    %61 = arith.truncf %60 : vector<32x32xf32> to vector<32x32xbf16>
    %cst_26 = arith.constant dense<0.000000e+00> : vector<32x32xf32>
    %62 = tpu.matmul %59, %61, %cst_26 {dimension_numbers = #tpu.dot_dimension_numbers<[1], [0], [0], [1], [0, 0, 1, 1], [], []>} : vector<32x32xbf16>, vector<32x32xbf16>, vector<32x32xf32> -> vector<32x32xf32>
    %63 = vector.extract_strided_slice %11 {offsets = [0, 2], sizes = [32, 1], strides = [1, 1]} : vector<32x4xf32> to vector<32x1xf32>
    %64 = vector.extract_strided_slice %12 {offsets = [2, 0], sizes = [1, 32], strides = [1, 1]} : vector<4x32xf32> to vector<1x32xf32>
    %65 = vector.broadcast %63 : vector<32x1xf32> to vector<32x32xf32>
    %66 = vector.broadcast %64 : vector<1x32xf32> to vector<32x32xf32>
    %67 = arith.addf %65, %66 : vector<32x32xf32>
    %cst_27 = arith.constant 0.000000e+00 : f32
    %68 = vector.broadcast %cst_27 : f32 to vector<32x32xf32>
    %69 = arith.cmpf ogt, %67, %68 : vector<32x32xf32>
    %cst_28 = arith.constant 2.000000e-01 : f32
    %70 = vector.broadcast %cst_28 : f32 to vector<32x32xf32>
    %71 = arith.mulf %70, %67 : vector<32x32xf32>
    %72 = arith.select %69, %67, %71 : vector<32x32xi1>, vector<32x32xf32>
    %73 = arith.addf %72, %1 : vector<32x32xf32>
    %cst_29 = arith.constant dense<0xFF800000> : vector<32xf32>
    %74 = vector.multi_reduction <maximumf>, %73, %cst_29 [1] : vector<32x32xf32> to vector<32xf32>
    %75 = vector.shape_cast %74 : vector<32xf32> to vector<32x1xf32>
    %76 = vector.broadcast %75 : vector<32x1xf32> to vector<32x32xf32>
    %77 = arith.subf %73, %76 : vector<32x32xf32>
    %78 = math.exp %77 : vector<32x32xf32>
    %cst_30 = arith.constant dense<0.000000e+00> : vector<32xf32>
    %79 = vector.multi_reduction <add>, %78, %cst_30 [1] : vector<32x32xf32> to vector<32xf32>
    %80 = vector.shape_cast %79 : vector<32xf32> to vector<32x1xf32>
    %81 = tpu.reciprocal %80 {approx = true} : vector<32x1xf32> -> vector<32x1xf32>
    %82 = vector.broadcast %81 : vector<32x1xf32> to vector<32x32xf32>
    %83 = arith.mulf %78, %82 : vector<32x32xf32>
    %84 = arith.truncf %83 : vector<32x32xf32> to vector<32x32xbf16>
    %85 = vector.extract_strided_slice %9 {offsets = [0, 64], sizes = [32, 32], strides = [1, 1]} : vector<32x128xf32> to vector<32x32xf32>
    %86 = arith.truncf %85 : vector<32x32xf32> to vector<32x32xbf16>
    %cst_31 = arith.constant dense<0.000000e+00> : vector<32x32xf32>
    %87 = tpu.matmul %84, %86, %cst_31 {dimension_numbers = #tpu.dot_dimension_numbers<[1], [0], [0], [1], [0, 0, 1, 1], [], []>} : vector<32x32xbf16>, vector<32x32xbf16>, vector<32x32xf32> -> vector<32x32xf32>
    %88 = vector.extract_strided_slice %11 {offsets = [0, 3], sizes = [32, 1], strides = [1, 1]} : vector<32x4xf32> to vector<32x1xf32>
    %89 = vector.extract_strided_slice %12 {offsets = [3, 0], sizes = [1, 32], strides = [1, 1]} : vector<4x32xf32> to vector<1x32xf32>
    %90 = vector.broadcast %88 : vector<32x1xf32> to vector<32x32xf32>
    %91 = vector.broadcast %89 : vector<1x32xf32> to vector<32x32xf32>
    %92 = arith.addf %90, %91 : vector<32x32xf32>
    %cst_32 = arith.constant 0.000000e+00 : f32
    %93 = vector.broadcast %cst_32 : f32 to vector<32x32xf32>
    %94 = arith.cmpf ogt, %92, %93 : vector<32x32xf32>
    %cst_33 = arith.constant 2.000000e-01 : f32
    %95 = vector.broadcast %cst_33 : f32 to vector<32x32xf32>
    %96 = arith.mulf %95, %92 : vector<32x32xf32>
    %97 = arith.select %94, %92, %96 : vector<32x32xi1>, vector<32x32xf32>
    %98 = arith.addf %97, %1 : vector<32x32xf32>
    %cst_34 = arith.constant dense<0xFF800000> : vector<32xf32>
    %99 = vector.multi_reduction <maximumf>, %98, %cst_34 [1] : vector<32x32xf32> to vector<32xf32>
    %100 = vector.shape_cast %99 : vector<32xf32> to vector<32x1xf32>
    %101 = vector.broadcast %100 : vector<32x1xf32> to vector<32x32xf32>
    %102 = arith.subf %98, %101 : vector<32x32xf32>
    %103 = math.exp %102 : vector<32x32xf32>
    %cst_35 = arith.constant dense<0.000000e+00> : vector<32xf32>
    %104 = vector.multi_reduction <add>, %103, %cst_35 [1] : vector<32x32xf32> to vector<32xf32>
    %105 = vector.shape_cast %104 : vector<32xf32> to vector<32x1xf32>
    %106 = tpu.reciprocal %105 {approx = true} : vector<32x1xf32> -> vector<32x1xf32>
    %107 = vector.broadcast %106 : vector<32x1xf32> to vector<32x32xf32>
    %108 = arith.mulf %103, %107 : vector<32x32xf32>
    %109 = arith.truncf %108 : vector<32x32xf32> to vector<32x32xbf16>
    %110 = vector.extract_strided_slice %9 {offsets = [0, 96], sizes = [32, 32], strides = [1, 1]} : vector<32x128xf32> to vector<32x32xf32>
    %111 = arith.truncf %110 : vector<32x32xf32> to vector<32x32xbf16>
    %cst_36 = arith.constant dense<0.000000e+00> : vector<32x32xf32>
    %112 = tpu.matmul %109, %111, %cst_36 {dimension_numbers = #tpu.dot_dimension_numbers<[1], [0], [0], [1], [0, 0, 1, 1], [], []>} : vector<32x32xbf16>, vector<32x32xbf16>, vector<32x32xf32> -> vector<32x32xf32>
    %113 = tpu.concatenate %37, %62, %87, %112 in 1 : vector<32x32xf32>, vector<32x32xf32>, vector<32x32xf32>, vector<32x32xf32> -> vector<32x128xf32>
    %114 = arith.addf %113, %10 : vector<32x128xf32>
    %115 = vector.broadcast %6 : vector<1x128xf32> to vector<32x128xf32>
    %116 = arith.mulf %114, %115 : vector<32x128xf32>
    %117 = vector.broadcast %7 : vector<1x128xf32> to vector<32x128xf32>
    %118 = arith.addf %116, %117 : vector<32x128xf32>
    %cst_37 = arith.constant 0.000000e+00 : f32
    %119 = vector.broadcast %cst_37 : f32 to vector<32x128xf32>
    %120 = arith.cmpf ogt, %118, %119 : vector<32x128xf32>
    %cst_38 = arith.constant 0.000000e+00 : f32
    %121 = vector.broadcast %cst_38 : f32 to vector<32x128xf32>
    %122 = arith.minimumf %118, %121 : vector<32x128xf32>
    %123 = math.exp %122 : vector<32x128xf32>
    %cst_39 = arith.constant 1.000000e+00 : f32
    %124 = vector.broadcast %cst_39 : f32 to vector<32x128xf32>
    %125 = arith.subf %123, %124 : vector<32x128xf32>
    %126 = arith.select %120, %118, %125 : vector<32x128xi1>, vector<32x128xf32>
    %c0_40 = arith.constant 0 : index
    %c0_41 = arith.constant 0 : index
    %127 = vector.load %arg8[%c0_40, %c0_41] : memref<128x256xf32, #tpu.memory_space<vmem>>, vector<128x256xf32>
    %c0_42 = arith.constant 0 : index
    %c0_43 = arith.constant 0 : index
    %128 = vector.load %arg9[%c0_42, %c0_43] : memref<128x4xf32, #tpu.memory_space<vmem>>, vector<128x4xf32>
    %c0_44 = arith.constant 0 : index
    %c0_45 = arith.constant 0 : index
    %129 = vector.load %arg10[%c0_44, %c0_45] : memref<4x128xf32, #tpu.memory_space<vmem>>, vector<4x128xf32>
    %c0_46 = arith.constant 0 : index
    %c0_47 = arith.constant 0 : index
    %130 = vector.load %arg11[%c0_46, %c0_47] : memref<1x128xf32, #tpu.memory_space<vmem>>, vector<1x128xf32>
    %c0_48 = arith.constant 0 : index
    %c0_49 = arith.constant 0 : index
    %131 = vector.load %arg12[%c0_48, %c0_49] : memref<1x128xf32, #tpu.memory_space<vmem>>, vector<1x128xf32>
    %cst_50 = arith.constant dense<0.000000e+00> : vector<32x256xf32>
    %132 = tpu.matmul %126, %127, %cst_50 {dimension_numbers = #tpu.dot_dimension_numbers<[1], [0], [0], [1], [0, 0, 1, 1], [], []>} : vector<32x128xf32>, vector<128x256xf32>, vector<32x256xf32> -> vector<32x256xf32>
    %133 = vector.extract_strided_slice %132 {offsets = [0, 0], sizes = [32, 128], strides = [1, 1]} : vector<32x256xf32> to vector<32x128xf32>
    %134 = vector.extract_strided_slice %132 {offsets = [0, 128], sizes = [32, 128], strides = [1, 1]} : vector<32x256xf32> to vector<32x128xf32>
    %cst_51 = arith.constant dense<0.000000e+00> : vector<32x4xf32>
    %135 = tpu.matmul %133, %128, %cst_51 {dimension_numbers = #tpu.dot_dimension_numbers<[1], [0], [0], [1], [0, 0, 1, 1], [], []>} : vector<32x128xf32>, vector<128x4xf32>, vector<32x4xf32> -> vector<32x4xf32>
    %cst_52 = arith.constant dense<0.000000e+00> : vector<4x32xf32>
    %136 = tpu.matmul %129, %133, %cst_52 {dimension_numbers = #tpu.dot_dimension_numbers<[1], [1], [0], [0], [0, 0, 1, 0], [], []>} : vector<4x128xf32>, vector<32x128xf32>, vector<4x32xf32> -> vector<4x32xf32>
    %137 = vector.extract_strided_slice %135 {offsets = [0, 0], sizes = [32, 1], strides = [1, 1]} : vector<32x4xf32> to vector<32x1xf32>
    %138 = vector.extract_strided_slice %136 {offsets = [0, 0], sizes = [1, 32], strides = [1, 1]} : vector<4x32xf32> to vector<1x32xf32>
    %139 = vector.broadcast %137 : vector<32x1xf32> to vector<32x32xf32>
    %140 = vector.broadcast %138 : vector<1x32xf32> to vector<32x32xf32>
    %141 = arith.addf %139, %140 : vector<32x32xf32>
    %cst_53 = arith.constant 0.000000e+00 : f32
    %142 = vector.broadcast %cst_53 : f32 to vector<32x32xf32>
    %143 = arith.cmpf ogt, %141, %142 : vector<32x32xf32>
    %cst_54 = arith.constant 2.000000e-01 : f32
    %144 = vector.broadcast %cst_54 : f32 to vector<32x32xf32>
    %145 = arith.mulf %144, %141 : vector<32x32xf32>
    %146 = arith.select %143, %141, %145 : vector<32x32xi1>, vector<32x32xf32>
    %147 = arith.addf %146, %1 : vector<32x32xf32>
    %cst_55 = arith.constant dense<0xFF800000> : vector<32xf32>
    %148 = vector.multi_reduction <maximumf>, %147, %cst_55 [1] : vector<32x32xf32> to vector<32xf32>
    %149 = vector.shape_cast %148 : vector<32xf32> to vector<32x1xf32>
    %150 = vector.broadcast %149 : vector<32x1xf32> to vector<32x32xf32>
    %151 = arith.subf %147, %150 : vector<32x32xf32>
    %152 = math.exp %151 : vector<32x32xf32>
    %cst_56 = arith.constant dense<0.000000e+00> : vector<32xf32>
    %153 = vector.multi_reduction <add>, %152, %cst_56 [1] : vector<32x32xf32> to vector<32xf32>
    %154 = vector.shape_cast %153 : vector<32xf32> to vector<32x1xf32>
    %155 = tpu.reciprocal %154 {approx = true} : vector<32x1xf32> -> vector<32x1xf32>
    %156 = vector.broadcast %155 : vector<32x1xf32> to vector<32x32xf32>
    %157 = arith.mulf %152, %156 : vector<32x32xf32>
    %158 = arith.truncf %157 : vector<32x32xf32> to vector<32x32xbf16>
    %159 = vector.extract_strided_slice %133 {offsets = [0, 0], sizes = [32, 32], strides = [1, 1]} : vector<32x128xf32> to vector<32x32xf32>
    %160 = arith.truncf %159 : vector<32x32xf32> to vector<32x32xbf16>
    %cst_57 = arith.constant dense<0.000000e+00> : vector<32x32xf32>
    %161 = tpu.matmul %158, %160, %cst_57 {dimension_numbers = #tpu.dot_dimension_numbers<[1], [0], [0], [1], [0, 0, 1, 1], [], []>} : vector<32x32xbf16>, vector<32x32xbf16>, vector<32x32xf32> -> vector<32x32xf32>
    %162 = vector.extract_strided_slice %135 {offsets = [0, 1], sizes = [32, 1], strides = [1, 1]} : vector<32x4xf32> to vector<32x1xf32>
    %163 = vector.extract_strided_slice %136 {offsets = [1, 0], sizes = [1, 32], strides = [1, 1]} : vector<4x32xf32> to vector<1x32xf32>
    %164 = vector.broadcast %162 : vector<32x1xf32> to vector<32x32xf32>
    %165 = vector.broadcast %163 : vector<1x32xf32> to vector<32x32xf32>
    %166 = arith.addf %164, %165 : vector<32x32xf32>
    %cst_58 = arith.constant 0.000000e+00 : f32
    %167 = vector.broadcast %cst_58 : f32 to vector<32x32xf32>
    %168 = arith.cmpf ogt, %166, %167 : vector<32x32xf32>
    %cst_59 = arith.constant 2.000000e-01 : f32
    %169 = vector.broadcast %cst_59 : f32 to vector<32x32xf32>
    %170 = arith.mulf %169, %166 : vector<32x32xf32>
    %171 = arith.select %168, %166, %170 : vector<32x32xi1>, vector<32x32xf32>
    %172 = arith.addf %171, %1 : vector<32x32xf32>
    %cst_60 = arith.constant dense<0xFF800000> : vector<32xf32>
    %173 = vector.multi_reduction <maximumf>, %172, %cst_60 [1] : vector<32x32xf32> to vector<32xf32>
    %174 = vector.shape_cast %173 : vector<32xf32> to vector<32x1xf32>
    %175 = vector.broadcast %174 : vector<32x1xf32> to vector<32x32xf32>
    %176 = arith.subf %172, %175 : vector<32x32xf32>
    %177 = math.exp %176 : vector<32x32xf32>
    %cst_61 = arith.constant dense<0.000000e+00> : vector<32xf32>
    %178 = vector.multi_reduction <add>, %177, %cst_61 [1] : vector<32x32xf32> to vector<32xf32>
    %179 = vector.shape_cast %178 : vector<32xf32> to vector<32x1xf32>
    %180 = tpu.reciprocal %179 {approx = true} : vector<32x1xf32> -> vector<32x1xf32>
    %181 = vector.broadcast %180 : vector<32x1xf32> to vector<32x32xf32>
    %182 = arith.mulf %177, %181 : vector<32x32xf32>
    %183 = arith.truncf %182 : vector<32x32xf32> to vector<32x32xbf16>
    %184 = vector.extract_strided_slice %133 {offsets = [0, 32], sizes = [32, 32], strides = [1, 1]} : vector<32x128xf32> to vector<32x32xf32>
    %185 = arith.truncf %184 : vector<32x32xf32> to vector<32x32xbf16>
    %cst_62 = arith.constant dense<0.000000e+00> : vector<32x32xf32>
    %186 = tpu.matmul %183, %185, %cst_62 {dimension_numbers = #tpu.dot_dimension_numbers<[1], [0], [0], [1], [0, 0, 1, 1], [], []>} : vector<32x32xbf16>, vector<32x32xbf16>, vector<32x32xf32> -> vector<32x32xf32>
    %187 = vector.extract_strided_slice %135 {offsets = [0, 2], sizes = [32, 1], strides = [1, 1]} : vector<32x4xf32> to vector<32x1xf32>
    %188 = vector.extract_strided_slice %136 {offsets = [2, 0], sizes = [1, 32], strides = [1, 1]} : vector<4x32xf32> to vector<1x32xf32>
    %189 = vector.broadcast %187 : vector<32x1xf32> to vector<32x32xf32>
    %190 = vector.broadcast %188 : vector<1x32xf32> to vector<32x32xf32>
    %191 = arith.addf %189, %190 : vector<32x32xf32>
    %cst_63 = arith.constant 0.000000e+00 : f32
    %192 = vector.broadcast %cst_63 : f32 to vector<32x32xf32>
    %193 = arith.cmpf ogt, %191, %192 : vector<32x32xf32>
    %cst_64 = arith.constant 2.000000e-01 : f32
    %194 = vector.broadcast %cst_64 : f32 to vector<32x32xf32>
    %195 = arith.mulf %194, %191 : vector<32x32xf32>
    %196 = arith.select %193, %191, %195 : vector<32x32xi1>, vector<32x32xf32>
    %197 = arith.addf %196, %1 : vector<32x32xf32>
    %cst_65 = arith.constant dense<0xFF800000> : vector<32xf32>
    %198 = vector.multi_reduction <maximumf>, %197, %cst_65 [1] : vector<32x32xf32> to vector<32xf32>
    %199 = vector.shape_cast %198 : vector<32xf32> to vector<32x1xf32>
    %200 = vector.broadcast %199 : vector<32x1xf32> to vector<32x32xf32>
    %201 = arith.subf %197, %200 : vector<32x32xf32>
    %202 = math.exp %201 : vector<32x32xf32>
    %cst_66 = arith.constant dense<0.000000e+00> : vector<32xf32>
    %203 = vector.multi_reduction <add>, %202, %cst_66 [1] : vector<32x32xf32> to vector<32xf32>
    %204 = vector.shape_cast %203 : vector<32xf32> to vector<32x1xf32>
    %205 = tpu.reciprocal %204 {approx = true} : vector<32x1xf32> -> vector<32x1xf32>
    %206 = vector.broadcast %205 : vector<32x1xf32> to vector<32x32xf32>
    %207 = arith.mulf %202, %206 : vector<32x32xf32>
    %208 = arith.truncf %207 : vector<32x32xf32> to vector<32x32xbf16>
    %209 = vector.extract_strided_slice %133 {offsets = [0, 64], sizes = [32, 32], strides = [1, 1]} : vector<32x128xf32> to vector<32x32xf32>
    %210 = arith.truncf %209 : vector<32x32xf32> to vector<32x32xbf16>
    %cst_67 = arith.constant dense<0.000000e+00> : vector<32x32xf32>
    %211 = tpu.matmul %208, %210, %cst_67 {dimension_numbers = #tpu.dot_dimension_numbers<[1], [0], [0], [1], [0, 0, 1, 1], [], []>} : vector<32x32xbf16>, vector<32x32xbf16>, vector<32x32xf32> -> vector<32x32xf32>
    %212 = vector.extract_strided_slice %135 {offsets = [0, 3], sizes = [32, 1], strides = [1, 1]} : vector<32x4xf32> to vector<32x1xf32>
    %213 = vector.extract_strided_slice %136 {offsets = [3, 0], sizes = [1, 32], strides = [1, 1]} : vector<4x32xf32> to vector<1x32xf32>
    %214 = vector.broadcast %212 : vector<32x1xf32> to vector<32x32xf32>
    %215 = vector.broadcast %213 : vector<1x32xf32> to vector<32x32xf32>
    %216 = arith.addf %214, %215 : vector<32x32xf32>
    %cst_68 = arith.constant 0.000000e+00 : f32
    %217 = vector.broadcast %cst_68 : f32 to vector<32x32xf32>
    %218 = arith.cmpf ogt, %216, %217 : vector<32x32xf32>
    %cst_69 = arith.constant 2.000000e-01 : f32
    %219 = vector.broadcast %cst_69 : f32 to vector<32x32xf32>
    %220 = arith.mulf %219, %216 : vector<32x32xf32>
    %221 = arith.select %218, %216, %220 : vector<32x32xi1>, vector<32x32xf32>
    %222 = arith.addf %221, %1 : vector<32x32xf32>
    %cst_70 = arith.constant dense<0xFF800000> : vector<32xf32>
    %223 = vector.multi_reduction <maximumf>, %222, %cst_70 [1] : vector<32x32xf32> to vector<32xf32>
    %224 = vector.shape_cast %223 : vector<32xf32> to vector<32x1xf32>
    %225 = vector.broadcast %224 : vector<32x1xf32> to vector<32x32xf32>
    %226 = arith.subf %222, %225 : vector<32x32xf32>
    %227 = math.exp %226 : vector<32x32xf32>
    %cst_71 = arith.constant dense<0.000000e+00> : vector<32xf32>
    %228 = vector.multi_reduction <add>, %227, %cst_71 [1] : vector<32x32xf32> to vector<32xf32>
    %229 = vector.shape_cast %228 : vector<32xf32> to vector<32x1xf32>
    %230 = tpu.reciprocal %229 {approx = true} : vector<32x1xf32> -> vector<32x1xf32>
    %231 = vector.broadcast %230 : vector<32x1xf32> to vector<32x32xf32>
    %232 = arith.mulf %227, %231 : vector<32x32xf32>
    %233 = arith.truncf %232 : vector<32x32xf32> to vector<32x32xbf16>
    %234 = vector.extract_strided_slice %133 {offsets = [0, 96], sizes = [32, 32], strides = [1, 1]} : vector<32x128xf32> to vector<32x32xf32>
    %235 = arith.truncf %234 : vector<32x32xf32> to vector<32x32xbf16>
    %cst_72 = arith.constant dense<0.000000e+00> : vector<32x32xf32>
    %236 = tpu.matmul %233, %235, %cst_72 {dimension_numbers = #tpu.dot_dimension_numbers<[1], [0], [0], [1], [0, 0, 1, 1], [], []>} : vector<32x32xbf16>, vector<32x32xbf16>, vector<32x32xf32> -> vector<32x32xf32>
    %237 = tpu.concatenate %161, %186, %211, %236 in 1 : vector<32x32xf32>, vector<32x32xf32>, vector<32x32xf32>, vector<32x32xf32> -> vector<32x128xf32>
    %238 = arith.addf %237, %134 : vector<32x128xf32>
    %239 = vector.broadcast %130 : vector<1x128xf32> to vector<32x128xf32>
    %240 = arith.mulf %238, %239 : vector<32x128xf32>
    %241 = vector.broadcast %131 : vector<1x128xf32> to vector<32x128xf32>
    %242 = arith.addf %240, %241 : vector<32x128xf32>
    %cst_73 = arith.constant 0.000000e+00 : f32
    %243 = vector.broadcast %cst_73 : f32 to vector<32x128xf32>
    %244 = arith.cmpf ogt, %242, %243 : vector<32x128xf32>
    %cst_74 = arith.constant 0.000000e+00 : f32
    %245 = vector.broadcast %cst_74 : f32 to vector<32x128xf32>
    %246 = arith.minimumf %242, %245 : vector<32x128xf32>
    %247 = math.exp %246 : vector<32x128xf32>
    %cst_75 = arith.constant 1.000000e+00 : f32
    %248 = vector.broadcast %cst_75 : f32 to vector<32x128xf32>
    %249 = arith.subf %247, %248 : vector<32x128xf32>
    %250 = arith.select %244, %242, %249 : vector<32x128xi1>, vector<32x128xf32>
    %c0_76 = arith.constant 0 : index
    %c0_77 = arith.constant 0 : index
    %251 = vector.load %arg13[%c0_76, %c0_77] : memref<128x256xf32, #tpu.memory_space<vmem>>, vector<128x256xf32>
    %c0_78 = arith.constant 0 : index
    %c0_79 = arith.constant 0 : index
    %252 = vector.load %arg14[%c0_78, %c0_79] : memref<128x4xf32, #tpu.memory_space<vmem>>, vector<128x4xf32>
    %c0_80 = arith.constant 0 : index
    %c0_81 = arith.constant 0 : index
    %253 = vector.load %arg15[%c0_80, %c0_81] : memref<4x128xf32, #tpu.memory_space<vmem>>, vector<4x128xf32>
    %c0_82 = arith.constant 0 : index
    %c0_83 = arith.constant 0 : index
    %254 = vector.load %arg16[%c0_82, %c0_83] : memref<1x128xf32, #tpu.memory_space<vmem>>, vector<1x128xf32>
    %c0_84 = arith.constant 0 : index
    %c0_85 = arith.constant 0 : index
    %255 = vector.load %arg17[%c0_84, %c0_85] : memref<1x128xf32, #tpu.memory_space<vmem>>, vector<1x128xf32>
    %cst_86 = arith.constant dense<0.000000e+00> : vector<32x256xf32>
    %256 = tpu.matmul %250, %251, %cst_86 {dimension_numbers = #tpu.dot_dimension_numbers<[1], [0], [0], [1], [0, 0, 1, 1], [], []>} : vector<32x128xf32>, vector<128x256xf32>, vector<32x256xf32> -> vector<32x256xf32>
    %257 = vector.extract_strided_slice %256 {offsets = [0, 0], sizes = [32, 128], strides = [1, 1]} : vector<32x256xf32> to vector<32x128xf32>
    %258 = vector.extract_strided_slice %256 {offsets = [0, 128], sizes = [32, 128], strides = [1, 1]} : vector<32x256xf32> to vector<32x128xf32>
    %cst_87 = arith.constant dense<0.000000e+00> : vector<32x4xf32>
    %259 = tpu.matmul %257, %252, %cst_87 {dimension_numbers = #tpu.dot_dimension_numbers<[1], [0], [0], [1], [0, 0, 1, 1], [], []>} : vector<32x128xf32>, vector<128x4xf32>, vector<32x4xf32> -> vector<32x4xf32>
    %cst_88 = arith.constant dense<0.000000e+00> : vector<4x32xf32>
    %260 = tpu.matmul %253, %257, %cst_88 {dimension_numbers = #tpu.dot_dimension_numbers<[1], [1], [0], [0], [0, 0, 1, 0], [], []>} : vector<4x128xf32>, vector<32x128xf32>, vector<4x32xf32> -> vector<4x32xf32>
    %261 = vector.extract_strided_slice %259 {offsets = [0, 0], sizes = [32, 1], strides = [1, 1]} : vector<32x4xf32> to vector<32x1xf32>
    %262 = vector.extract_strided_slice %260 {offsets = [0, 0], sizes = [1, 32], strides = [1, 1]} : vector<4x32xf32> to vector<1x32xf32>
    %263 = vector.broadcast %261 : vector<32x1xf32> to vector<32x32xf32>
    %264 = vector.broadcast %262 : vector<1x32xf32> to vector<32x32xf32>
    %265 = arith.addf %263, %264 : vector<32x32xf32>
    %cst_89 = arith.constant 0.000000e+00 : f32
    %266 = vector.broadcast %cst_89 : f32 to vector<32x32xf32>
    %267 = arith.cmpf ogt, %265, %266 : vector<32x32xf32>
    %cst_90 = arith.constant 2.000000e-01 : f32
    %268 = vector.broadcast %cst_90 : f32 to vector<32x32xf32>
    %269 = arith.mulf %268, %265 : vector<32x32xf32>
    %270 = arith.select %267, %265, %269 : vector<32x32xi1>, vector<32x32xf32>
    %271 = arith.addf %270, %1 : vector<32x32xf32>
    %cst_91 = arith.constant dense<0xFF800000> : vector<32xf32>
    %272 = vector.multi_reduction <maximumf>, %271, %cst_91 [1] : vector<32x32xf32> to vector<32xf32>
    %273 = vector.shape_cast %272 : vector<32xf32> to vector<32x1xf32>
    %274 = vector.broadcast %273 : vector<32x1xf32> to vector<32x32xf32>
    %275 = arith.subf %271, %274 : vector<32x32xf32>
    %276 = math.exp %275 : vector<32x32xf32>
    %cst_92 = arith.constant dense<0.000000e+00> : vector<32xf32>
    %277 = vector.multi_reduction <add>, %276, %cst_92 [1] : vector<32x32xf32> to vector<32xf32>
    %278 = vector.shape_cast %277 : vector<32xf32> to vector<32x1xf32>
    %279 = tpu.reciprocal %278 {approx = true} : vector<32x1xf32> -> vector<32x1xf32>
    %280 = vector.broadcast %279 : vector<32x1xf32> to vector<32x32xf32>
    %281 = arith.mulf %276, %280 : vector<32x32xf32>
    %282 = arith.truncf %281 : vector<32x32xf32> to vector<32x32xbf16>
    %283 = vector.extract_strided_slice %257 {offsets = [0, 0], sizes = [32, 32], strides = [1, 1]} : vector<32x128xf32> to vector<32x32xf32>
    %284 = arith.truncf %283 : vector<32x32xf32> to vector<32x32xbf16>
    %cst_93 = arith.constant dense<0.000000e+00> : vector<32x32xf32>
    %285 = tpu.matmul %282, %284, %cst_93 {dimension_numbers = #tpu.dot_dimension_numbers<[1], [0], [0], [1], [0, 0, 1, 1], [], []>} : vector<32x32xbf16>, vector<32x32xbf16>, vector<32x32xf32> -> vector<32x32xf32>
    %286 = vector.extract_strided_slice %259 {offsets = [0, 1], sizes = [32, 1], strides = [1, 1]} : vector<32x4xf32> to vector<32x1xf32>
    %287 = vector.extract_strided_slice %260 {offsets = [1, 0], sizes = [1, 32], strides = [1, 1]} : vector<4x32xf32> to vector<1x32xf32>
    %288 = vector.broadcast %286 : vector<32x1xf32> to vector<32x32xf32>
    %289 = vector.broadcast %287 : vector<1x32xf32> to vector<32x32xf32>
    %290 = arith.addf %288, %289 : vector<32x32xf32>
    %cst_94 = arith.constant 0.000000e+00 : f32
    %291 = vector.broadcast %cst_94 : f32 to vector<32x32xf32>
    %292 = arith.cmpf ogt, %290, %291 : vector<32x32xf32>
    %cst_95 = arith.constant 2.000000e-01 : f32
    %293 = vector.broadcast %cst_95 : f32 to vector<32x32xf32>
    %294 = arith.mulf %293, %290 : vector<32x32xf32>
    %295 = arith.select %292, %290, %294 : vector<32x32xi1>, vector<32x32xf32>
    %296 = arith.addf %295, %1 : vector<32x32xf32>
    %cst_96 = arith.constant dense<0xFF800000> : vector<32xf32>
    %297 = vector.multi_reduction <maximumf>, %296, %cst_96 [1] : vector<32x32xf32> to vector<32xf32>
    %298 = vector.shape_cast %297 : vector<32xf32> to vector<32x1xf32>
    %299 = vector.broadcast %298 : vector<32x1xf32> to vector<32x32xf32>
    %300 = arith.subf %296, %299 : vector<32x32xf32>
    %301 = math.exp %300 : vector<32x32xf32>
    %cst_97 = arith.constant dense<0.000000e+00> : vector<32xf32>
    %302 = vector.multi_reduction <add>, %301, %cst_97 [1] : vector<32x32xf32> to vector<32xf32>
    %303 = vector.shape_cast %302 : vector<32xf32> to vector<32x1xf32>
    %304 = tpu.reciprocal %303 {approx = true} : vector<32x1xf32> -> vector<32x1xf32>
    %305 = vector.broadcast %304 : vector<32x1xf32> to vector<32x32xf32>
    %306 = arith.mulf %301, %305 : vector<32x32xf32>
    %307 = arith.truncf %306 : vector<32x32xf32> to vector<32x32xbf16>
    %308 = vector.extract_strided_slice %257 {offsets = [0, 32], sizes = [32, 32], strides = [1, 1]} : vector<32x128xf32> to vector<32x32xf32>
    %309 = arith.truncf %308 : vector<32x32xf32> to vector<32x32xbf16>
    %cst_98 = arith.constant dense<0.000000e+00> : vector<32x32xf32>
    %310 = tpu.matmul %307, %309, %cst_98 {dimension_numbers = #tpu.dot_dimension_numbers<[1], [0], [0], [1], [0, 0, 1, 1], [], []>} : vector<32x32xbf16>, vector<32x32xbf16>, vector<32x32xf32> -> vector<32x32xf32>
    %311 = vector.extract_strided_slice %259 {offsets = [0, 2], sizes = [32, 1], strides = [1, 1]} : vector<32x4xf32> to vector<32x1xf32>
    %312 = vector.extract_strided_slice %260 {offsets = [2, 0], sizes = [1, 32], strides = [1, 1]} : vector<4x32xf32> to vector<1x32xf32>
    %313 = vector.broadcast %311 : vector<32x1xf32> to vector<32x32xf32>
    %314 = vector.broadcast %312 : vector<1x32xf32> to vector<32x32xf32>
    %315 = arith.addf %313, %314 : vector<32x32xf32>
    %cst_99 = arith.constant 0.000000e+00 : f32
    %316 = vector.broadcast %cst_99 : f32 to vector<32x32xf32>
    %317 = arith.cmpf ogt, %315, %316 : vector<32x32xf32>
    %cst_100 = arith.constant 2.000000e-01 : f32
    %318 = vector.broadcast %cst_100 : f32 to vector<32x32xf32>
    %319 = arith.mulf %318, %315 : vector<32x32xf32>
    %320 = arith.select %317, %315, %319 : vector<32x32xi1>, vector<32x32xf32>
    %321 = arith.addf %320, %1 : vector<32x32xf32>
    %cst_101 = arith.constant dense<0xFF800000> : vector<32xf32>
    %322 = vector.multi_reduction <maximumf>, %321, %cst_101 [1] : vector<32x32xf32> to vector<32xf32>
    %323 = vector.shape_cast %322 : vector<32xf32> to vector<32x1xf32>
    %324 = vector.broadcast %323 : vector<32x1xf32> to vector<32x32xf32>
    %325 = arith.subf %321, %324 : vector<32x32xf32>
    %326 = math.exp %325 : vector<32x32xf32>
    %cst_102 = arith.constant dense<0.000000e+00> : vector<32xf32>
    %327 = vector.multi_reduction <add>, %326, %cst_102 [1] : vector<32x32xf32> to vector<32xf32>
    %328 = vector.shape_cast %327 : vector<32xf32> to vector<32x1xf32>
    %329 = tpu.reciprocal %328 {approx = true} : vector<32x1xf32> -> vector<32x1xf32>
    %330 = vector.broadcast %329 : vector<32x1xf32> to vector<32x32xf32>
    %331 = arith.mulf %326, %330 : vector<32x32xf32>
    %332 = arith.truncf %331 : vector<32x32xf32> to vector<32x32xbf16>
    %333 = vector.extract_strided_slice %257 {offsets = [0, 64], sizes = [32, 32], strides = [1, 1]} : vector<32x128xf32> to vector<32x32xf32>
    %334 = arith.truncf %333 : vector<32x32xf32> to vector<32x32xbf16>
    %cst_103 = arith.constant dense<0.000000e+00> : vector<32x32xf32>
    %335 = tpu.matmul %332, %334, %cst_103 {dimension_numbers = #tpu.dot_dimension_numbers<[1], [0], [0], [1], [0, 0, 1, 1], [], []>} : vector<32x32xbf16>, vector<32x32xbf16>, vector<32x32xf32> -> vector<32x32xf32>
    %336 = vector.extract_strided_slice %259 {offsets = [0, 3], sizes = [32, 1], strides = [1, 1]} : vector<32x4xf32> to vector<32x1xf32>
    %337 = vector.extract_strided_slice %260 {offsets = [3, 0], sizes = [1, 32], strides = [1, 1]} : vector<4x32xf32> to vector<1x32xf32>
    %338 = vector.broadcast %336 : vector<32x1xf32> to vector<32x32xf32>
    %339 = vector.broadcast %337 : vector<1x32xf32> to vector<32x32xf32>
    %340 = arith.addf %338, %339 : vector<32x32xf32>
    %cst_104 = arith.constant 0.000000e+00 : f32
    %341 = vector.broadcast %cst_104 : f32 to vector<32x32xf32>
    %342 = arith.cmpf ogt, %340, %341 : vector<32x32xf32>
    %cst_105 = arith.constant 2.000000e-01 : f32
    %343 = vector.broadcast %cst_105 : f32 to vector<32x32xf32>
    %344 = arith.mulf %343, %340 : vector<32x32xf32>
    %345 = arith.select %342, %340, %344 : vector<32x32xi1>, vector<32x32xf32>
    %346 = arith.addf %345, %1 : vector<32x32xf32>
    %cst_106 = arith.constant dense<0xFF800000> : vector<32xf32>
    %347 = vector.multi_reduction <maximumf>, %346, %cst_106 [1] : vector<32x32xf32> to vector<32xf32>
    %348 = vector.shape_cast %347 : vector<32xf32> to vector<32x1xf32>
    %349 = vector.broadcast %348 : vector<32x1xf32> to vector<32x32xf32>
    %350 = arith.subf %346, %349 : vector<32x32xf32>
    %351 = math.exp %350 : vector<32x32xf32>
    %cst_107 = arith.constant dense<0.000000e+00> : vector<32xf32>
    %352 = vector.multi_reduction <add>, %351, %cst_107 [1] : vector<32x32xf32> to vector<32xf32>
    %353 = vector.shape_cast %352 : vector<32xf32> to vector<32x1xf32>
    %354 = tpu.reciprocal %353 {approx = true} : vector<32x1xf32> -> vector<32x1xf32>
    %355 = vector.broadcast %354 : vector<32x1xf32> to vector<32x32xf32>
    %356 = arith.mulf %351, %355 : vector<32x32xf32>
    %357 = arith.truncf %356 : vector<32x32xf32> to vector<32x32xbf16>
    %358 = vector.extract_strided_slice %257 {offsets = [0, 96], sizes = [32, 32], strides = [1, 1]} : vector<32x128xf32> to vector<32x32xf32>
    %359 = arith.truncf %358 : vector<32x32xf32> to vector<32x32xbf16>
    %cst_108 = arith.constant dense<0.000000e+00> : vector<32x32xf32>
    %360 = tpu.matmul %357, %359, %cst_108 {dimension_numbers = #tpu.dot_dimension_numbers<[1], [0], [0], [1], [0, 0, 1, 1], [], []>} : vector<32x32xbf16>, vector<32x32xbf16>, vector<32x32xf32> -> vector<32x32xf32>
    %361 = tpu.concatenate %285, %310, %335, %360 in 1 : vector<32x32xf32>, vector<32x32xf32>, vector<32x32xf32>, vector<32x32xf32> -> vector<32x128xf32>
    %362 = arith.addf %361, %258 : vector<32x128xf32>
    %363 = vector.broadcast %254 : vector<1x128xf32> to vector<32x128xf32>
    %364 = arith.mulf %362, %363 : vector<32x128xf32>
    %365 = vector.broadcast %255 : vector<1x128xf32> to vector<32x128xf32>
    %366 = arith.addf %364, %365 : vector<32x128xf32>
    %cst_109 = arith.constant 0.000000e+00 : f32
    %367 = vector.broadcast %cst_109 : f32 to vector<32x128xf32>
    %368 = arith.cmpf ogt, %366, %367 : vector<32x128xf32>
    %cst_110 = arith.constant 0.000000e+00 : f32
    %369 = vector.broadcast %cst_110 : f32 to vector<32x128xf32>
    %370 = arith.minimumf %366, %369 : vector<32x128xf32>
    %371 = math.exp %370 : vector<32x128xf32>
    %cst_111 = arith.constant 1.000000e+00 : f32
    %372 = vector.broadcast %cst_111 : f32 to vector<32x128xf32>
    %373 = arith.subf %371, %372 : vector<32x128xf32>
    %374 = arith.select %368, %366, %373 : vector<32x128xi1>, vector<32x128xf32>
    %c0_112 = arith.constant 0 : index
    %c0_113 = arith.constant 0 : index
    %375 = vector.load %arg18[%c0_112, %c0_113] : memref<128x64xf32, #tpu.memory_space<vmem>>, vector<128x64xf32>
    %c0_114 = arith.constant 0 : index
    %c0_115 = arith.constant 0 : index
    %376 = vector.load %arg19[%c0_114, %c0_115] : memref<32x1xf32, #tpu.memory_space<vmem>>, vector<32x1xf32>
    %c0_116 = arith.constant 0 : index
    %c0_117 = arith.constant 0 : index
    %377 = vector.load %arg20[%c0_116, %c0_117] : memref<1x32xf32, #tpu.memory_space<vmem>>, vector<1x32xf32>
    %c0_118 = arith.constant 0 : index
    %c0_119 = arith.constant 0 : index
    %378 = vector.load %arg21[%c0_118, %c0_119] : memref<1x32xf32, #tpu.memory_space<vmem>>, vector<1x32xf32>
    %c0_120 = arith.constant 0 : index
    %c0_121 = arith.constant 0 : index
    %379 = vector.load %arg22[%c0_120, %c0_121] : memref<1x32xf32, #tpu.memory_space<vmem>>, vector<1x32xf32>
    %cst_122 = arith.constant dense<0.000000e+00> : vector<32x64xf32>
    %380 = tpu.matmul %374, %375, %cst_122 {dimension_numbers = #tpu.dot_dimension_numbers<[1], [0], [0], [1], [0, 0, 1, 1], [], []>} : vector<32x128xf32>, vector<128x64xf32>, vector<32x64xf32> -> vector<32x64xf32>
    %381 = vector.extract_strided_slice %380 {offsets = [0, 0], sizes = [32, 32], strides = [1, 1]} : vector<32x64xf32> to vector<32x32xf32>
    %382 = vector.extract_strided_slice %380 {offsets = [0, 32], sizes = [32, 32], strides = [1, 1]} : vector<32x64xf32> to vector<32x32xf32>
    %cst_123 = arith.constant dense<0.000000e+00> : vector<32x1xf32>
    %383 = tpu.matmul %381, %376, %cst_123 {dimension_numbers = #tpu.dot_dimension_numbers<[1], [0], [0], [1], [0, 0, 1, 1], [], []>} : vector<32x32xf32>, vector<32x1xf32>, vector<32x1xf32> -> vector<32x1xf32>
    %cst_124 = arith.constant dense<0.000000e+00> : vector<1x32xf32>
    %384 = tpu.matmul %377, %381, %cst_124 {dimension_numbers = #tpu.dot_dimension_numbers<[1], [1], [0], [0], [0, 0, 1, 0], [], []>} : vector<1x32xf32>, vector<32x32xf32>, vector<1x32xf32> -> vector<1x32xf32>
    %385 = vector.broadcast %383 : vector<32x1xf32> to vector<32x32xf32>
    %386 = vector.broadcast %384 : vector<1x32xf32> to vector<32x32xf32>
    %387 = arith.addf %385, %386 : vector<32x32xf32>
    %cst_125 = arith.constant 0.000000e+00 : f32
    %388 = vector.broadcast %cst_125 : f32 to vector<32x32xf32>
    %389 = arith.cmpf ogt, %387, %388 : vector<32x32xf32>
    %cst_126 = arith.constant 2.000000e-01 : f32
    %390 = vector.broadcast %cst_126 : f32 to vector<32x32xf32>
    %391 = arith.mulf %390, %387 : vector<32x32xf32>
    %392 = arith.select %389, %387, %391 : vector<32x32xi1>, vector<32x32xf32>
    %393 = arith.addf %392, %1 : vector<32x32xf32>
    %cst_127 = arith.constant dense<0xFF800000> : vector<32xf32>
    %394 = vector.multi_reduction <maximumf>, %393, %cst_127 [1] : vector<32x32xf32> to vector<32xf32>
    %395 = vector.shape_cast %394 : vector<32xf32> to vector<32x1xf32>
    %396 = vector.broadcast %395 : vector<32x1xf32> to vector<32x32xf32>
    %397 = arith.subf %393, %396 : vector<32x32xf32>
    %398 = math.exp %397 : vector<32x32xf32>
    %cst_128 = arith.constant dense<0.000000e+00> : vector<32xf32>
    %399 = vector.multi_reduction <add>, %398, %cst_128 [1] : vector<32x32xf32> to vector<32xf32>
    %400 = vector.shape_cast %399 : vector<32xf32> to vector<32x1xf32>
    %401 = tpu.reciprocal %400 {approx = true} : vector<32x1xf32> -> vector<32x1xf32>
    %402 = vector.broadcast %401 : vector<32x1xf32> to vector<32x32xf32>
    %403 = arith.mulf %398, %402 : vector<32x32xf32>
    %404 = arith.truncf %403 : vector<32x32xf32> to vector<32x32xbf16>
    %405 = arith.truncf %381 : vector<32x32xf32> to vector<32x32xbf16>
    %cst_129 = arith.constant dense<0.000000e+00> : vector<32x32xf32>
    %406 = tpu.matmul %404, %405, %cst_129 {dimension_numbers = #tpu.dot_dimension_numbers<[1], [0], [0], [1], [0, 0, 1, 1], [], []>} : vector<32x32xbf16>, vector<32x32xbf16>, vector<32x32xf32> -> vector<32x32xf32>
    %cst_130 = arith.constant 1.000000e+00 : f32
    %407 = vector.broadcast %cst_130 : f32 to vector<32x32xf32>
    %408 = arith.mulf %406, %407 : vector<32x32xf32>
    %409 = arith.addf %408, %382 : vector<32x32xf32>
    %410 = vector.broadcast %378 : vector<1x32xf32> to vector<32x32xf32>
    %411 = arith.mulf %409, %410 : vector<32x32xf32>
    %412 = vector.broadcast %379 : vector<1x32xf32> to vector<32x32xf32>
    %413 = arith.addf %411, %412 : vector<32x32xf32>
    %cst_131 = arith.constant 0.000000e+00 : f32
    %414 = vector.broadcast %cst_131 : f32 to vector<32x32xf32>
    %415 = arith.cmpf ogt, %413, %414 : vector<32x32xf32>
    %cst_132 = arith.constant 0.000000e+00 : f32
    %416 = vector.broadcast %cst_132 : f32 to vector<32x32xf32>
    %417 = arith.minimumf %413, %416 : vector<32x32xf32>
    %418 = math.exp %417 : vector<32x32xf32>
    %cst_133 = arith.constant 1.000000e+00 : f32
    %419 = vector.broadcast %cst_133 : f32 to vector<32x32xf32>
    %420 = arith.subf %418, %419 : vector<32x32xf32>
    %421 = arith.select %415, %413, %420 : vector<32x32xi1>, vector<32x32xf32>
    %c0_134 = arith.constant 0 : index
    %c0_135 = arith.constant 0 : index
    %422 = vector.load %arg23[%c0_134, %c0_135] : memref<32x8xf32, #tpu.memory_space<vmem>>, vector<32x8xf32>
    %c0_136 = arith.constant 0 : index
    %c0_137 = arith.constant 0 : index
    %423 = vector.load %arg24[%c0_136, %c0_137] : memref<1x8xf32, #tpu.memory_space<vmem>>, vector<1x8xf32>
    %cst_138 = arith.constant dense<0.000000e+00> : vector<32x8xf32>
    %424 = tpu.matmul %421, %422, %cst_138 {dimension_numbers = #tpu.dot_dimension_numbers<[1], [0], [0], [1], [0, 0, 1, 1], [], []>} : vector<32x32xf32>, vector<32x8xf32>, vector<32x8xf32> -> vector<32x8xf32>
    %425 = arith.truncf %424 : vector<32x8xf32> to vector<32x8xbf16>
    %cst_139 = arith.constant dense<0.000000e+00> : vector<32x8xf32>
    %426 = tpu.matmul %2, %425, %cst_139 {dimension_numbers = #tpu.dot_dimension_numbers<[1], [0], [0], [1], [0, 0, 1, 1], [], []>} : vector<32x32xbf16>, vector<32x8xbf16>, vector<32x8xf32> -> vector<32x8xf32>
    %427 = vector.broadcast %423 : vector<1x8xf32> to vector<32x8xf32>
    %428 = arith.addf %426, %427 : vector<32x8xf32>
    %c0_140 = arith.constant 0 : index
    %c0_141 = arith.constant 0 : index
    %429 = vector.load %arg25[%c0_140, %c0_141] : memref<8x32xf32, #tpu.memory_space<vmem>>, vector<8x32xf32>
    %c0_142 = arith.constant 0 : index
    %c0_143 = arith.constant 0 : index
    %430 = vector.load %arg26[%c0_142, %c0_143] : memref<1x32xf32, #tpu.memory_space<vmem>>, vector<1x32xf32>
    %c0_144 = arith.constant 0 : index
    %c0_145 = arith.constant 0 : index
    %431 = vector.load %arg27[%c0_144, %c0_145] : memref<32x8xf32, #tpu.memory_space<vmem>>, vector<32x8xf32>
    %c0_146 = arith.constant 0 : index
    %c0_147 = arith.constant 0 : index
    %432 = vector.load %arg28[%c0_146, %c0_147] : memref<1x8xf32, #tpu.memory_space<vmem>>, vector<1x8xf32>
    %cst_148 = arith.constant dense<0.000000e+00> : vector<32x32xf32>
    %433 = tpu.matmul %428, %429, %cst_148 {dimension_numbers = #tpu.dot_dimension_numbers<[1], [0], [0], [1], [0, 0, 1, 1], [], []>} : vector<32x8xf32>, vector<8x32xf32>, vector<32x32xf32> -> vector<32x32xf32>
    %434 = vector.broadcast %430 : vector<1x32xf32> to vector<32x32xf32>
    %435 = arith.addf %433, %434 : vector<32x32xf32>
    %cst_149 = arith.constant 0.000000e+00 : f32
    %436 = vector.broadcast %cst_149 : f32 to vector<32x32xf32>
    %437 = arith.maximumf %435, %436 : vector<32x32xf32>
    %cst_150 = arith.constant dense<0.000000e+00> : vector<32x8xf32>
    %438 = tpu.matmul %437, %431, %cst_150 {dimension_numbers = #tpu.dot_dimension_numbers<[1], [0], [0], [1], [0, 0, 1, 1], [], []>} : vector<32x32xf32>, vector<32x8xf32>, vector<32x8xf32> -> vector<32x8xf32>
    %439 = vector.broadcast %432 : vector<1x8xf32> to vector<32x8xf32>
    %440 = arith.addf %438, %439 : vector<32x8xf32>
    %cst_151 = arith.constant dense<0xFF800000> : vector<32xf32>
    %441 = vector.multi_reduction <maximumf>, %440, %cst_151 [1] : vector<32x8xf32> to vector<32xf32>
    %442 = vector.shape_cast %441 : vector<32xf32> to vector<32x1xf32>
    %443 = vector.broadcast %442 : vector<32x1xf32> to vector<32x8xf32>
    %444 = arith.subf %440, %443 : vector<32x8xf32>
    %445 = math.exp %444 : vector<32x8xf32>
    %cst_152 = arith.constant dense<0.000000e+00> : vector<32xf32>
    %446 = vector.multi_reduction <add>, %445, %cst_152 [1] : vector<32x8xf32> to vector<32xf32>
    %447 = vector.shape_cast %446 : vector<32xf32> to vector<32x1xf32>
    %448 = math.log %447 : vector<32x1xf32>
    %449 = arith.addf %442, %448 : vector<32x1xf32>
    %450 = vector.broadcast %449 : vector<32x1xf32> to vector<32x8xf32>
    %451 = arith.subf %440, %450 : vector<32x8xf32>
    %c0_153 = arith.constant 0 : index
    %c0_154 = arith.constant 0 : index
    %452 = vector.load %arg29[%c0_153, %c0_154] : memref<32x8xf32, #tpu.memory_space<vmem>>, vector<32x8xf32>
    tpu.vector_store %arg29[%c0_153, %c0_154], %451 {strides = array<i32>} : memref<32x8xf32, #tpu.memory_space<vmem>>, vector<32x8xf32>,
    return
  }
}

</mosaic_0001>

<bundles_post_ra>
// kernel: tpu_custom_call.1
= control target key start
LH: loop header
LB: loop body
LE: loop exit
PB: predicated region body
PF: predicated region fallthrough
CT: control target
= control target key end

     0   :  { %s3280_s3 = smov 3   ;;  %s3281_s10 = smov 4   ;;  %vm158_vm0 = vcmask 130048   ;;  %v3285_v29 = vmov 3   ;;  %v3286_v30 = vmov 0   ;;  %v3287_v31 = vmov 1   ;;  %s4545_s0 = inlined_call_operand.smem [shape: u32[30], index: -1, kind: input, shape index: {}] }
   0x1   :  { %s3324_s6 = sld [smem:[%s4545_s0 + %s3280_s3]]   ;;  %s3282_s14 = smov 32   ;;  %2958 = vset.pattern.permute.xlu2 %v3285_v29  ;;  %2957 = vset.pattern.permute.xlu0 %v3286_v30  ;;  %v3288_v36 = vmov 2   ;;  %vm319_vm2 = vcmask 261120  }
   0x2   :  { %s3329_s9 = sld [smem:[%s4545_s0]]   ;;  %s3283_s15 = smov 96   ;;  %2963 = vset.pattern.permute.xlu1 %v3287_v31 }
   0x3   :  { %s3334_s13 = sld [smem:[%s4545_s0 + %s3281_s10]]   ;;  %s3284_s16 = smov 5  }
   0x4   :  { %s2807_s19 = sld [smem:[%s4545_s0 + %s3284_s16]]   ;;  %s3289_s20 = smov 1  }
   0x5   :  { %s3410_s23 = sld [smem:[%s4545_s0 + %s3289_s20]]   ;;  %s3290_s24 = smov 64  }
   0x6   :  { %s3291_s25 = smov 6   ;;  %s3292_s29 = smov 7  }
   0x7   :  { %v137_v0 = vld [vmem:[%s3324_s6 + $0x10] sm:$0xff]  ;;  %v135_v1 = vld [vmem:[%s3324_s6] sm:$0xff]  ;;  %s3640_s28 = sld [smem:[%s4545_s0 + %s3291_s25]]   ;;  %s3293_s3 = smov 8  }
   0x8   :  { %185 = vmatpush.msra.mxu0 %v137_v0  ;;  %2915 = vmatpush.msra.mxu3 %v137_v0  ;;  %v3339_v2 = vld [vmem:[%s3329_s9] sm:$0xff]  ;;  %v3342_v3 = vld [vmem:[%s3329_s9 + $0x8] sm:$0xff]  ;;  %v3353_v8 = vld [vmem:[%s3329_s9 + $0x10] sm:$0xff]  ;;  %s3649_s2 = sld [smem:[%s4545_s0 + %s3292_s29]]   ;;  %s3294_s7 = smov 9  }
   0x9   :  { %v154_v4 = vld [vmem:[%s3334_s13 + $0x78] sm:$0xff]  ;;  %v153_v5 = vld [vmem:[%s3334_s13 + $0x70] sm:$0xff]  ;;  %v152_v6 = vld [vmem:[%s3334_s13 + $0x68] sm:$0xff]  ;;  %s3723_s10 = sld [smem:[%s4545_s0 + %s3294_s7]]   ;;  %s3295_s11 = smov 10  }
   0xa   :  { %186 = vmatpush.msra.mxu0 %v135_v1  ;;  %2916 = vmatpush.msra.mxu3 %v135_v1  ;;  %v151_v7 = vld [vmem:[%s3334_s13 + $0x60] sm:$0xff]  ;;  %v150_v9 = vld [vmem:[%s3334_s13 + $0x58] sm:$0xff]  ;;  %v149_v10 = vld [vmem:[%s3334_s13 + $0x50] sm:$0xff]  ;;  %s2812_s16 = sld [smem:[%s4545_s0 + %s3295_s11]]   ;;  %s3296_s17 = smov 11  }
   0xb   :  { %2832 = vmatmul.msk.f32.vlgmr.msra.gmra.mxu0 %vm158_vm0, %v3339_v2  ;;  %2833 = vmatmul.msk.f32.vlgmr.msra.gmra.mxu3 %vm158_vm0, %v3342_v3  ;;  %v148_v11 = vld [vmem:[%s3334_s13 + $0x48] sm:$0xff]  ;;  %v147_v12 = vld [vmem:[%s3334_s13 + $0x40] sm:$0xff]  ;;  %v3362_v13 = vld [vmem:[%s3329_s9 + $0x18] sm:$0xff]  ;;  %s4001_s20 = sld [smem:[%s4545_s0 + %s3296_s17]]   ;;  %s3297_s21 = smov 12  }
   0xc   :  { %229 = vmatpush.msra.mxu2 %v154_v4  ;;  %v146_v14 = vld [vmem:[%s3334_s13 + $0x38] sm:$0xff]  ;;  %v145_v15 = vld [vmem:[%s3334_s13 + $0x30] sm:$0xff]  ;;  %v144_v16 = vld [vmem:[%s3334_s13 + $0x28] sm:$0xff]  ;;  %s4007_s26 = sld [smem:[%s4545_s0 + %s3297_s21]]   ;;  %s3298_s27 = smov 13  }
   0xd   :  { %v143_v17 = vld [vmem:[%s3334_s13 + $0x20] sm:$0xff]  ;;  %v142_v18 = vld [vmem:[%s3334_s13 + $0x18] sm:$0xff]  ;;  %v141_v19 = vld [vmem:[%s3334_s13 + $0x10] sm:$0xff]  ;;  %s4021_s30 = sld [smem:[%s4545_s0 + %s3298_s27]]   ;;  %s3299_s1 = smov 14  }
   0xe   :  { %230 = vmatpush.msra.mxu2 %v153_v5  ;;  %v140_v20 = vld [vmem:[%s3334_s13 + $0x8] sm:$0xff]  ;;  %v139_v21 = vld [vmem:[%s3334_s13] sm:$0xff]  ;;  %s4081_s4 = sld [smem:[%s4545_s0 + %s3299_s1]]   ;;  %s3300_s5 = smov 15  }
   0xf   :  { %v155_v28 = vld [vmem:[%s2807_s19] sm:$0xf]  ;;  %v128_v63 = vld [vmem:[%s3410_s23 + $0x8] sm:$0xff]  ;;  %s2817_s8 = sld [smem:[%s4545_s0 + %s3300_s5]]   ;;  %s3302_s12 = smov 17  }
  0x10   :  { %231 = vmatpush.msra.mxu2 %v152_v6  ;;  %v127_v45 = vld [vmem:[%s3410_s23] sm:$0xff]  ;;  %s4384_s17 = sld [smem:[%s4545_s0 + %s3302_s12]]   ;;  %s3303_s18 = smov 18  }
  0x11   :  { %s2820_s21 = sld [smem:[%s4545_s0 + %s3303_s18]]   ;;  %s3312_s22 = smov 25  }
  0x12   :  { %232 = vmatpush.msra.mxu2 %v151_v7  ;;  %s2827_s27 = sld [smem:[%s4545_s0 + %s3312_s22]]  }
  0x13   :  { %2834 = vmatmul.msk.f32.gmra.mxu3 %vm158_vm0, %v3353_v8 }
  0x14   :  { %233 = vmatpush.msra.mxu2 %v150_v9 }
  0x16   :  { %234 = vmatpush.msra.mxu2 %v149_v10 }
  0x18   :  { %235 = vmatpush.msra.mxu2 %v148_v11 }
  0x1a   :  { %236 = vmatpush.msra.mxu2 %v147_v12 }
  0x1b   :  { %2835 = vmatmul.msk.f32.gmra.mxu3 %vm158_vm0, %v3362_v13 }
  0x1c   :  { %237 = vmatpush.msra.mxu2 %v146_v14 }
  0x1e   :  { %238 = vmatpush.msra.mxu2 %v145_v15 }
  0x20   :  { %239 = vmatpush.msra.mxu2 %v144_v16 }
  0x22   :  { %240 = vmatpush.msra.mxu2 %v143_v17 }
  0x24   :  { %241 = vmatpush.msra.mxu2 %v142_v18 }
  0x26   :  { %242 = vmatpush.msra.mxu2 %v141_v19 }
  0x28   :  { %243 = vmatpush.msra.mxu2 %v140_v20 }
  0x2a   :  { %244 = vmatpush.msra.mxu2 %v139_v21 }
  0x88   :  { %v188_v22 = vpop.f32.mrf.mxu0 }
  0x89   :  { %245 = vmatmul.f32.vlgmr.msra.gmra.mxu2 %v188_v22 }
  0x8e   :  { %v191_v23 = vpop.f32.mrf.mxu3 }
  0x8f   :  { %v3374_v24 = vpack.c.bf16 %v191_v23, %v188_v22 }
  0x91   :  { %706 = vrot.lane.b32.xlu0 %v3374_v24, %s3282_s14  ;;  %248 = vmatmul.f32.gmra.mxu2 %v191_v23 }
  0x96   :  { %v194_v25 = vpop.f32.mrf.mxu3 }
  0x99   :  { %251 = vmatmul.f32.gmra.mxu2 %v194_v25 }
  0x9e   :  { %v197_v26 = vpop.f32.mrf.mxu3 }
  0x9f   :  { %v3378_v27 = vpack.c.bf16 %v197_v26, %v194_v25  ;;  %270 = vmatpush.xpose.msrb.mxu3 %v197_v26 }
  0xa1   :  { %708 = vrot.lane.b32.xlu1 %v3378_v27, %s3282_s14  ;;  %480 = vrot.lane.b32.xlu2 %v3378_v27, %s3283_s15 }
  0xa2   :  { %254 = vmatmul.f32.gmra.mxu2 %v197_v26 }
  0xa3   :  { %271 = vmatpush.xpose.msrb.mxu3 %v194_v25 }
  0xa7   :  { %272 = vmatpush.xpose.msrb.mxu3 %v191_v23 }
  0xab   :  { %273 = vmatpush.xpose.msrb.mxu3 %v188_v22 }
  0xae   :  { %274 = vmatmul.f32.vlgmr.msrb.gmra.mxu3 %v155_v28 }
  0xaf   :  { %380 = vmatpush.bf16.msra.mxu3 %v3378_v27 }
  0xb3   :  { %381 = vmatpush.bf16.msra.mxu3 %v3374_v24 }
  0xfb   :  { %v481_v32 = vpop.permute.xlu2 %480 }
  0xfc   :  { %496 = vmatpush.bf16.msrb.mxu0 %v481_v32 }
 0x103   :  { %v707_v37 = vpop.permute.xlu0 %706 }
 0x10c   :  { %v246_v33 = vpop.f32.mrf.mxu2 }
 0x10d   :  { %624 = vperm.xlu2 %2958, %v246_v33   ;;  %280 = vperm.xlu0 %2957, %v246_v33  }
 0x113   :  { %v709_v34 = vpop.permute.xlu1 %708 }
 0x114   :  { %v249_v35 = vpop.f32.mrf.mxu2  ;;  %724 = vmatpush.bf16.msrb.mxu3 %v709_v34 }
 0x115   :  { %2960 = vset.pattern.permute.xlu2 %v3288_v36  ;;  %2959 = vset.pattern.permute.xlu0 %v3287_v31 }
 0x116   :  { %398 = vperm.xlu1 %2963, %v249_v35   ;;  %510 = vperm.xlu2 %2960, %v246_v33  }
 0x117   :  { %394 = vperm.xlu0 %2959, %v246_v33   ;;  %v129_v33 = vld [vmem:[%s3410_s23 + $0x10] sm:$0xff] }
 0x118   :  { %725 = vmatpush.bf16.msrb.mxu3 %v707_v37 }
 0x11c   :  { %v252_v38 = vpop.f32.mrf.mxu2 }
 0x11e   :  { %2964 = vset.pattern.permute.xlu1 %v3288_v36  ;;  %2962 = vset.pattern.permute.xlu2 %v3285_v29 }
 0x11f   :  { %2961 = vset.pattern.permute.xlu0 %v3286_v30  ;;  %514 = vperm.xlu1 %2964, %v249_v35  }
 0x120   :  { %628 = vperm.xlu2 %2962, %v249_v35   ;;  %285 = vperm.xlu0 %2961, %v249_v35  }
 0x125   :  { %v255_v39 = vpop.f32.mrf.mxu2 }
 0x127   :  { %2965 = vset.pattern.permute.xlu1 %v3286_v30 }
 0x128   :  { %290 = vperm.xlu1 %2965, %v252_v38   ;;  %2972 = vset.pattern.permute.xlu2 %v3288_v36 }
 0x129   :  { %522 = vperm.xlu2 %2972, %v255_v39   ;;  %2975 = vset.pattern.permute.xlu0 %v3285_v29 }
 0x130   :  { %2966 = vset.pattern.permute.xlu1 %v3285_v29 }
 0x131   :  { %632 = vperm.xlu1 %2966, %v252_v38   ;;  %2973 = vset.pattern.permute.xlu2 %v3287_v31  ;;  %v275_v40 = vpop.f32.mrf.mxu3 }
 0x132   :  { %v3412_v41 = vperm.slane %v275_v40, 3  ;;  %v3421_v50 = vperm.slane %v275_v40, 0  ;;  %v3427_v59 = vperm.slane %v275_v40, 2  ;;  %v3431_v61 = vperm.slane %v275_v40, 1 }
 0x139   :  { %2967 = vset.pattern.permute.xlu1 %v3287_v31 }
 0x13a   :  { %402 = vperm.xlu1 %2967, %v252_v38  }
 0x142   :  { %2968 = vset.pattern.permute.xlu1 %v3288_v36 }
 0x143   :  { %518 = vperm.xlu1 %2968, %v252_v38  }
 0x14b   :  { %2969 = vset.pattern.permute.xlu1 %v3286_v30 }
 0x14c   :  { %295 = vperm.xlu1 %2969, %v255_v39  }
 0x154   :  { %2970 = vset.pattern.permute.xlu1 %v3285_v29 }
 0x155   :  { %636 = vperm.xlu1 %2970, %v255_v39  }
 0x15d   :  { %2971 = vset.pattern.permute.xlu1 %v3287_v31 }
 0x15e   :  { %406 = vperm.xlu1 %2971, %v255_v39  }
 0x166   :  { %2974 = vset.pattern.permute.xlu1 %v3288_v36 }
 0x167   :  { %v625_v42 = vpop.permute.xlu2 %624 }
 0x168   :  { %v640_v43 = vadd.f32 %v3412_v41, %v625_v42 }
 0x16a   :  { %v648_v44 = vmul.f32 0.2, %v640_v43  ;;  %vm644_vm1 = vcmp.gt.f32.partialorder %v640_v43, 0.0 }
 0x16c   :  { %v652_v46 = vsel %vm644_vm1, %v640_v43, %v648_v44 }
 0x16d   :  { %v3417_v47 = vadd.f32 %v652_v46, %v127_v45 }
 0x16f   :  { %v660_v48 = vsel %vm319_vm2, %v3417_v47, -inf }
 0x170   :  { %661 = vmax.xlane.f32.xlu0 %v660_v48  ;;  %v511_v49 = vpop.permute.xlu2 %510 }
 0x171   :  { %v526_v4 = vadd.f32 %v3427_v59, %v511_v49 }
 0x173   :  { %v534_v9 = vmul.f32 0.2, %v526_v4  ;;  %vm530_vm6 = vcmp.gt.f32.partialorder %v526_v4, 0.0 }
 0x175   :  { %v538_v17 = vsel %vm530_vm6, %v526_v4, %v534_v9 }
 0x176   :  { %v3445_v19 = vadd.f32 %v538_v17, %v127_v45 }
 0x178   :  { %v546_v21 = vsel %vm319_vm2, %v3445_v19, -inf }
 0x17a   :  { %v629_v51 = vpop.permute.xlu2 %628 }
 0x17b   :  { %v641_v53 = vadd.f32 %v3412_v41, %v629_v51 }
 0x17d   :  { %v649_v56 = vmul.f32 0.2, %v641_v53  ;;  %vm645_vm4 = vcmp.gt.f32.partialorder %v641_v53, 0.0 }
 0x17f   :  { %v281_v52 = vpop.permute.xlu0 %280  ;;  %v653_v0 = vsel %vm645_vm4, %v641_v53, %v649_v56  ;;  %vm794_vm4 = vcmask 785408  }
 0x180   :  { %v299_v54 = vadd.f32 %v3421_v50, %v281_v52  ;;  %v3436_v6 = vadd.f32 %v653_v0, %v128_v63 }
 0x182   :  { %v307_v55 = vmul.f32 0.2, %v299_v54  ;;  %vm303_vm3 = vcmp.gt.f32.partialorder %v299_v54, 0.0  ;;  %v663_v11 = vsel %vm319_vm2, %v3436_v6, -inf }
 0x183   :  { %v523_v53 = vpop.permute.xlu2 %522 }
 0x184   :  { %v311_v57 = vsel %vm303_vm3, %v299_v54, %v307_v55 }
 0x185   :  { %v3425_v58 = vadd.f32 %v311_v57, %v127_v45  ;;  %v529_v57 = vadd.f32 %v3427_v59, %v523_v53 }
 0x187   :  { %v320_v60 = vsel %vm319_vm2, %v3425_v58, -inf  ;;  %vm533_vm13 = vcmp.gt.f32.partialorder %v529_v57, 0.0 }
 0x188   :  { %v399_v62 = vpop.permute.xlu1 %398  ;;  %321 = vmax.xlane.f32.xlu2 %v320_v60 }
 0x189   :  { %v395_v1 = vpop.permute.xlu0 %394  ;;  %v411_v22 = vadd.f32 %v3431_v61, %v399_v62 }
 0x18a   :  { %v410_v5 = vadd.f32 %v3431_v61, %v395_v1  ;;  %v537_v1 = vmul.f32 0.2, %v529_v57 }
 0x18b   :  { %v419_v34 = vmul.f32 0.2, %v411_v22  ;;  %vm415_vm9 = vcmp.gt.f32.partialorder %v411_v22, 0.0 }
 0x18c   :  { %v418_v7 = vmul.f32 0.2, %v410_v5  ;;  %vm414_vm5 = vcmp.gt.f32.partialorder %v410_v5, 0.0 }
 0x18d   :  { %v423_v42 = vsel %vm415_vm9, %v411_v22, %v419_v34 }
 0x18e   :  { %v422_v10 = vsel %vm414_vm5, %v410_v5, %v418_v7 }
 0x18f   :  { %v3440_v12 = vadd.f32 %v422_v10, %v127_v45  ;;  %v3462_v45 = vadd.f32 %v423_v42, %v128_v63 }
 0x190   :  { %664 = vmax.xlane.f32.xlu2 %v663_v11  ;;  %v130_v11 = vld [vmem:[%s3410_s23 + $0x18] sm:$0xff] }
 0x191   :  { %v515_v14 = vpop.permute.xlu1 %514  ;;  %v430_v15 = vsel %vm319_vm2, %v3440_v12, -inf  ;;  %v433_v51 = vsel %vm319_vm2, %v3462_v45, -inf }
 0x192   :  { %431 = vmax.xlane.f32.xlu0 %v430_v15  ;;  %v286_v16 = vpop.permute.xlu0 %285  ;;  %v527_v39 = vadd.f32 %v3427_v59, %v515_v14  ;;  %v541_v14 = vsel %vm533_vm13, %v529_v57, %v537_v1 }
 0x193   :  { %v300_v18 = vadd.f32 %v3421_v50, %v286_v16  ;;  %v3482_v16 = vadd.f32 %v541_v14, %v130_v11 }
 0x194   :  { %v535_v46 = vmul.f32 0.2, %v527_v39  ;;  %vm531_vm11 = vcmp.gt.f32.partialorder %v527_v39, 0.0 }
 0x195   :  { %v308_v20 = vmul.f32 0.2, %v300_v18  ;;  %vm304_vm7 = vcmp.gt.f32.partialorder %v300_v18, 0.0 }
 0x196   :  { %v539_v54 = vsel %vm531_vm11, %v527_v39, %v535_v46 }
 0x197   :  { %v312_v25 = vsel %vm304_vm7, %v300_v18, %v308_v20  ;;  %v3472_v62 = vadd.f32 %v539_v54, %v128_v63  ;;  %v555_v20 = vsel %vm319_vm2, %v3482_v16, -inf }
 0x198   :  { %v3451_v32 = vadd.f32 %v312_v25, %v128_v63 }
 0x199   :  { %v549_v4 = vsel %vm319_vm2, %v3472_v62, -inf }
 0x19a   :  { %547 = vmax.xlane.f32.xlu0 %v546_v21  ;;  %v291_v23 = vpop.permute.xlu1 %290  ;;  %v323_v38 = vsel %vm319_vm2, %v3451_v32, -inf }
 0x19b   :  { %v301_v26 = vadd.f32 %v3421_v50, %v291_v23 }
 0x19d   :  { %v309_v28 = vmul.f32 0.2, %v301_v26  ;;  %vm305_vm8 = vcmp.gt.f32.partialorder %v301_v26, 0.0 }
 0x19f   :  { %v313_v35 = vsel %vm305_vm8, %v301_v26, %v309_v28 }
 0x1a0   :  { %v3454_v37 = vadd.f32 %v313_v35, %v129_v33 }
 0x1a2   :  { %324 = vmax.xlane.f32.xlu0 %v323_v38  ;;  %v326_v40 = vsel %vm319_vm2, %v3454_v37, -inf }
 0x1a3   :  { %v633_v43 = vpop.permute.xlu1 %632  ;;  %327 = vmax.xlane.f32.xlu1 %v326_v40 }
 0x1a4   :  { %v642_v44 = vadd.f32 %v3412_v41, %v633_v43 }
 0x1a6   :  { %v650_v48 = vmul.f32 0.2, %v642_v44  ;;  %vm646_vm10 = vcmp.gt.f32.partialorder %v642_v44, 0.0 }
 0x1a8   :  { %v654_v49 = vsel %vm646_vm10, %v642_v44, %v650_v48 }
 0x1a9   :  { %v3466_v52 = vadd.f32 %v654_v49, %v129_v33 }
 0x1aa   :  { %434 = vmax.xlane.f32.xlu0 %v433_v51 }
 0x1ab   :  { %v666_v55 = vsel %vm319_vm2, %v3466_v52, -inf }
 0x1ac   :  { %v403_v56 = vpop.permute.xlu1 %402  ;;  %667 = vmax.xlane.f32.xlu1 %v666_v55 }
 0x1ad   :  { %v412_v60 = vadd.f32 %v3431_v61, %v403_v56 }
 0x1af   :  { %v420_v0 = vmul.f32 0.2, %v412_v60  ;;  %vm416_vm12 = vcmp.gt.f32.partialorder %v412_v60, 0.0 }
 0x1b1   :  { %v424_v5 = vsel %vm416_vm12, %v412_v60, %v420_v0 }
 0x1b2   :  { %550 = vmax.xlane.f32.xlu0 %v549_v4  ;;  %v3476_v7 = vadd.f32 %v424_v5, %v129_v33 }
 0x1b4   :  { %v436_v9 = vsel %vm319_vm2, %v3476_v7, -inf }
 0x1b5   :  { %v519_v10 = vpop.permute.xlu1 %518  ;;  %437 = vmax.xlane.f32.xlu1 %v436_v9 }
 0x1b6   :  { %v528_v63 = vadd.f32 %v3427_v59, %v519_v10 }
 0x1b8   :  { %v536_v15 = vmul.f32 0.2, %v528_v63  ;;  %vm532_vm14 = vcmp.gt.f32.partialorder %v528_v63, 0.0 }
 0x1ba   :  { %v540_v17 = vsel %vm532_vm14, %v528_v63, %v536_v15 }
 0x1bb   :  { %v3484_v18 = vadd.f32 %v540_v17, %v129_v33 }
 0x1bd   :  { %556 = vmax.xlane.f32.xlu1 %v555_v20  ;;  %v552_v21 = vsel %vm319_vm2, %v3484_v18, -inf }
 0x1be   :  { %553 = vmax.xlane.f32.xlu0 %v552_v21  ;;  %v296_v22 = vpop.permute.xlu1 %295 }
 0x1bf   :  { %v302_v23 = vadd.f32 %v3421_v50, %v296_v22 }
 0x1c1   :  { %v310_v25 = vmul.f32 0.2, %v302_v23  ;;  %vm306_vm15 = vcmp.gt.f32.partialorder %v302_v23, 0.0 }
 0x1c3   :  { %v314_v59 = vsel %vm306_vm15, %v302_v23, %v310_v25 }
 0x1c4   :  { %v3491_v26 = vadd.f32 %v314_v59, %v130_v11 }
 0x1c6   :  { %v329_v28 = vsel %vm319_vm2, %v3491_v26, -inf }
 0x1c7   :  { %330 = vmax.xlane.f32.xlu0 %v329_v28  ;;  %v637_v33 = vpop.permute.xlu1 %636 }
 0x1c8   :  { %v643_v34 = vadd.f32 %v3412_v41, %v637_v33 }
 0x1ca   :  { %v651_v35 = vmul.f32 0.2, %v643_v34  ;;  %vm647_vm1 = vcmp.gt.f32.partialorder %v643_v34, 0.0 }
 0x1cc   :  { %v655_v38 = vsel %vm647_vm1, %v643_v34, %v651_v35 }
 0x1cd   :  { %v3496_v39 = vadd.f32 %v655_v38, %v130_v11 }
 0x1cf   :  { %v669_v50 = vsel %vm319_vm2, %v3496_v39, -inf }
 0x1d0   :  { %670 = vmax.xlane.f32.xlu0 %v669_v50  ;;  %v407_v40 = vpop.permute.xlu1 %406 }
 0x1d1   :  { %v413_v42 = vadd.f32 %v3431_v61, %v407_v40 }
 0x1d3   :  { %v421_v43 = vmul.f32 0.2, %v413_v42  ;;  %vm417_vm3 = vcmp.gt.f32.partialorder %v413_v42, 0.0 }
 0x1d5   :  { %v425_v44 = vsel %vm417_vm3, %v413_v42, %v421_v43 }
 0x1d6   :  { %v3501_v46 = vadd.f32 %v425_v44, %v130_v11 }
 0x1d8   :  { %v439_v41 = vsel %vm319_vm2, %v3501_v46, -inf }
 0x1d9   :  { %440 = vmax.xlane.f32.xlu2 %v439_v41 }
 0x1e3   :  { %v662_v48 = vpop.xlane.xlu0 %661 }
 0x1e4   :  { %v672_v53 = vsub.f32 %v3417_v47, %v662_v48 }
 0x1e6   :  { %v676_v55 = vmul.f32 1.442695, %v672_v53 }
 0x1fb   :  { %v322_v49 = vpop.xlane.xlu2 %321 }
 0x1fc   :  { %v332_v51 = vsub.f32 %v3425_v58, %v322_v49 }
 0x1fe   :  { %v336_v54 = vmul.f32 1.442695, %v332_v51 }
 0x200   :  { %3016 = vpow2.f32 %v336_v54 }
 0x201   :  { %3018 = vpow2.f32 %v676_v55 }
 0x203   :  { %v665_v58 = vpop.xlane.xlu2 %664 }
 0x204   :  { %v673_v10 = vsub.f32 %v3436_v6, %v665_v58 }
 0x205   :  { %v432_v56 = vpop.xlane.xlu0 %431 }
 0x206   :  { %v3507_v61 = vpop.eup %3016  ;;  %v442_v57 = vsub.f32 %v3440_v12, %v432_v56  ;;  %v678_v14 = vmul.f32 1.442695, %v673_v10 }
 0x207   :  { %v344_v60 = vsel %vm319_vm2, %v3507_v61, 0.0  ;;  %v3512_v1 = vpop.eup %3018 }
 0x208   :  { %v446_v0 = vmul.f32 1.442695, %v442_v57  ;;  %345 = vadd.xlane.f32.xlu1 %v344_v60  ;;  %v684_v5 = vsel %vm319_vm2, %v3512_v1, 0.0 }
 0x20a   :  { %3020 = vpow2.f32 %v446_v0 }
 0x20d   :  { %v548_v4 = vpop.xlane.xlu0 %547 }
 0x20e   :  { %v558_v47 = vsub.f32 %v3445_v19, %v548_v4 }
 0x210   :  { %v3517_v9 = vpop.eup %3020  ;;  %v562_v12 = vmul.f32 1.442695, %v558_v47  ;;  %685 = vadd.xlane.f32.xlu1 %v684_v5 }
 0x211   :  { %v454_v11 = vsel %vm319_vm2, %v3517_v9, 0.0 }
 0x212   :  { %3022 = vpow2.f32 %v562_v12  ;;  %455 = vadd.xlane.f32.xlu0 %v454_v11 }
 0x213   :  { %3024 = vpow2.f32 %v678_v14 }
 0x215   :  { %v325_v63 = vpop.xlane.xlu0 %324 }
 0x216   :  { %v333_v15 = vsub.f32 %v3451_v32, %v325_v63  ;;  %v328_v17 = vpop.xlane.xlu1 %327 }
 0x217   :  { %v334_v21 = vsub.f32 %v3454_v37, %v328_v17 }
 0x218   :  { %v3523_v19 = vpop.eup %3022  ;;  %v338_v20 = vmul.f32 1.442695, %v333_v15 }
 0x219   :  { %v570_v6 = vsel %vm319_vm2, %v3523_v19, 0.0  ;;  %v340_v22 = vmul.f32 1.442695, %v334_v21  ;;  %v3528_v25 = vpop.eup %3024 }
 0x21a   :  { %3026 = vpow2.f32 %v338_v20  ;;  %571 = vadd.xlane.f32.xlu2 %v570_v6  ;;  %v687_v37 = vsel %vm319_vm2, %v3528_v25, 0.0  ;;  %v138_v6 = vld [vmem:[%s3324_s6 + $0x18] sm:$0xff] }
 0x21b   :  { %3028 = vpow2.f32 %v340_v22  ;;  %214 = vmatpush.msra.mxu1 %v138_v6 }
 0x21d   :  { %v435_v23 = vpop.xlane.xlu0 %434 }
 0x21e   :  { %v443_v59 = vsub.f32 %v3462_v45, %v435_v23 }
 0x21f   :  { %v668_v54 = vpop.xlane.xlu1 %667 }
 0x220   :  { %v3531_v28 = vpop.eup %3026  ;;  %v448_v32 = vmul.f32 1.442695, %v443_v59  ;;  %v674_v56 = vsub.f32 %v3466_v52, %v668_v54 }
 0x221   :  { %v347_v33 = vsel %vm319_vm2, %v3531_v28, 0.0  ;;  %v3537_v35 = vpop.eup %3028 }
 0x222   :  { %3030 = vpow2.f32 %v448_v32  ;;  %348 = vadd.xlane.f32.xlu0 %v347_v33  ;;  %688 = vadd.xlane.f32.xlu2 %v687_v37  ;;  %v350_v42 = vsel %vm319_vm2, %v3537_v35, 0.0  ;;  %v680_v57 = vmul.f32 1.442695, %v674_v56 }
 0x225   :  { %v551_v34 = vpop.xlane.xlu0 %550 }
 0x226   :  { %v559_v38 = vsub.f32 %v3472_v62, %v551_v34 }
 0x228   :  { %v3540_v50 = vpop.eup %3030  ;;  %v564_v45 = vmul.f32 1.442695, %v559_v38 }
 0x229   :  { %v457_v40 = vsel %vm319_vm2, %v3540_v50, 0.0 }
 0x22a   :  { %3032 = vpow2.f32 %v564_v45  ;;  %458 = vadd.xlane.f32.xlu1 %v457_v40  ;;  %351 = vadd.xlane.f32.xlu2 %v350_v42 }
 0x230   :  { %v3546_v43 = vpop.eup %3032 }
 0x231   :  { %v554_v44 = vpop.xlane.xlu0 %553  ;;  %v573_v41 = vsel %vm319_vm2, %v3546_v43, 0.0 }
 0x232   :  { %574 = vadd.xlane.f32.xlu0 %v573_v41  ;;  %v560_v58 = vsub.f32 %v3484_v18, %v554_v44 }
 0x234   :  { %v566_v5 = vmul.f32 1.442695, %v560_v58 }
 0x23a   :  { %v331_v62 = vpop.xlane.xlu0 %330 }
 0x23b   :  { %v335_v48 = vsub.f32 %v3491_v26, %v331_v62 }
 0x23d   :  { %v342_v49 = vmul.f32 1.442695, %v335_v48 }
 0x23f   :  { %3034 = vpow2.f32 %v342_v49 }
 0x240   :  { %3036 = vpow2.f32 %v680_v57 }
 0x242   :  { %594 = vrot.lane.b32.xlu2 %v3378_v27, %s3290_s24 }
 0x243   :  { %478 = vrot.lane.b32.xlu1 %v3374_v24, %s3283_s15  ;;  %v671_v55 = vpop.xlane.xlu0 %670 }
 0x244   :  { %v675_v26 = vsub.f32 %v3496_v39, %v671_v55  ;;  %v438_v39 = vpop.xlane.xlu1 %437 }
 0x245   :  { %v3555_v51 = vpop.eup %3034  ;;  %v444_v11 = vsub.f32 %v3476_v7, %v438_v39  ;;  %v136_v7 = vld [vmem:[%s3324_s6 + $0x8] sm:$0xff]  ;;  %s3666_s6 = sld [smem:[%s4545_s0 + %s3293_s3]]  }
 0x246   :  { %v353_v53 = vsel %vm319_vm2, %v3555_v51, 0.0  ;;  %v682_v60 = vmul.f32 1.442695, %v675_v26  ;;  %v3565_v47 = vpop.eup %3036  ;;  %215 = vmatpush.msra.mxu1 %v136_v7 }
 0x247   :  { %354 = vadd.xlane.f32.xlu0 %v353_v53  ;;  %v690_v52 = vsel %vm319_vm2, %v3565_v47, 0.0  ;;  %v450_v63 = vmul.f32 1.442695, %v444_v11  ;;  %2836 = vmatmul.msk.f32.vlgmr.msra.gmra.mxu1 %vm158_vm0, %v3339_v2 }
 0x248   :  { %3038 = vpow2.f32 %v682_v60 }
 0x24c   :  { %v441_v27 = vpop.xlane.xlu2 %440  ;;  %v557_v15 = vpop.xlane.xlu1 %556 }
 0x24d   :  { %v445_v0 = vsub.f32 %v3501_v46, %v441_v27  ;;  %v561_v17 = vsub.f32 %v3482_v16, %v557_v15 }
 0x24e   :  { %v3567_v10 = vpop.eup %3038 }
 0x24f   :  { %v452_v4 = vmul.f32 1.442695, %v445_v0  ;;  %v568_v20 = vmul.f32 1.442695, %v561_v17  ;;  %2837 = vmatmul.msk.f32.gmra.mxu1 %vm158_vm0, %v3342_v3 }
 0x251   :  { %3040 = vpow2.f32 %v452_v4 }
 0x252   :  { %3042 = vpow2.f32 %v566_v5 }
 0x253   :  { %3044 = vpow2.f32 %v450_v63 }
 0x254   :  { %3046 = vpow2.f32 %v568_v20 }
 0x257   :  { %v3573_v18 = vpop.eup %3040  ;;  %2838 = vmatmul.msk.f32.gmra.mxu1 %vm158_vm0, %v3353_v8 }
 0x258   :  { %v3575_v46 = vpop.eup %3042  ;;  %v463_v12 = vsel %vm319_vm2, %v3573_v18, 0.0 }
 0x259   :  { %v576_v14 = vsel %vm319_vm2, %v3575_v46, 0.0  ;;  %v3583_v21 = vpop.eup %3044 }
 0x25a   :  { %v460_v22 = vsel %vm319_vm2, %v3583_v21, 0.0  ;;  %v3591_v23 = vpop.eup %3046 }
 0x25b   :  { %592 = vrot.lane.b32.xlu0 %v3374_v24, %s3290_s24  ;;  %v693_v24 = vsel %vm319_vm2, %v3567_v10, 0.0  ;;  %v579_v16 = vsel %vm319_vm2, %v3591_v23, 0.0 }
 0x25f   :  { %2839 = vmatmul.msk.f32.gmra.mxu1 %vm158_vm0, %v3362_v13  ;;  %vm789_vm0 = vcmask 523264  }
 0x26b   :  { %691 = vadd.xlane.f32.xlu2 %v690_v52 }
 0x26d   :  { %694 = vadd.xlane.f32.xlu1 %v693_v24 }
 0x273   :  { %464 = vadd.xlane.f32.xlu2 %v463_v12 }
 0x275   :  { %577 = vadd.xlane.f32.xlu1 %v576_v14 }
 0x27b   :  { %v346_v33 = vpop.xlane.xlu1 %345 }
 0x27c   :  { %3048 = vrcp.f32 %v346_v33 }
 0x282   :  { %v3049_v2 = vpop.eup %3048 }
 0x283   :  { %v360_v45 = vmul.f32 %v3049_v2, %v3507_v61  ;;  %v686_v44 = vpop.xlane.xlu1 %685 }
 0x285   :  { %461 = vadd.xlane.f32.xlu0 %v460_v22  ;;  %v456_v59 = vpop.xlane.xlu0 %455 }
 0x28d   :  { %v572_v32 = vpop.xlane.xlu2 %571  ;;  %580 = vadd.xlane.f32.xlu0 %v579_v16 }
 0x295   :  { %v349_v37 = vpop.xlane.xlu0 %348  ;;  %v689_v34 = vpop.xlane.xlu2 %688 }
 0x296   :  { %3050 = vrcp.f32 %v349_v37 }
 0x29c   :  { %v3051_v38 = vpop.eup %3050 }
 0x29d   :  { %v361_v40 = vmul.f32 %v3051_v38, %v3531_v28  ;;  %v352_v42 = vpop.xlane.xlu2 %351  ;;  %v459_v62 = vpop.xlane.xlu1 %458 }
 0x29e   :  { %3052 = vrcp.f32 %v459_v62 }
 0x29f   :  { %v364_v41 = vpack.c.bf16 %v361_v40, %v360_v45  ;;  %3054 = vrcp.f32 %v456_v59 }
 0x2a0   :  { %3056 = vrcp.f32 %v352_v42 }
 0x2a1   :  { %2840 = vmatmul.msk.bf16.vlgmr.msra.gmra.mxu3 %vm319_vm2, %v364_v41 }
 0x2a4   :  { %v3053_v8 = vpop.eup %3052 }
 0x2a5   :  { %v595_v3 = vpop.permute.xlu2 %594  ;;  %v3055_v48 = vpop.eup %3054  ;;  %v471_v61 = vmul.f32 %v3053_v8, %v3540_v50 }
 0x2a6   :  { %610 = vmatpush.bf16.msrb.mxu1 %v595_v3  ;;  %v575_v49 = vpop.xlane.xlu0 %574  ;;  %v470_v28 = vmul.f32 %v3055_v48, %v3517_v9  ;;  %v3057_v55 = vpop.eup %3056 }
 0x2a7   :  { %v362_v26 = vmul.f32 %v3057_v55, %v3537_v35  ;;  %v870_v55 = vld [vmem:[%s3666_s6 + $0xe8] sm:$0xff] }
 0x2a8   :  { %v474_v54 = vpack.c.bf16 %v471_v61, %v470_v28 }
 0x2b5   :  { %v479_v53 = vpop.permute.xlu1 %478 }
 0x2b6   :  { %497 = vmatpush.bf16.msrb.mxu0 %v479_v53  ;;  %v871_v53 = vld [vmem:[%s3666_s6 + $0xf0] sm:$0xff] }
 0x2b7   :  { %892 = vmatpush.msrb.mxu2 %v871_v53 }
 0x2b9   :  { %2842 = vmatmul.msk.bf16.vlgmr.msrb.gmra.mxu0 %vm319_vm2, %v474_v54  ;;  %v872_v54 = vld [vmem:[%s3666_s6 + $0xf8] sm:$0xff] }
 0x2ba   :  { %v355_v13 = vpop.xlane.xlu0 %354  ;;  %921 = vmatpush.msra.mxu0 %v872_v54 }
 0x2bb   :  { %3058 = vrcp.f32 %v355_v13  ;;  %v869_v13 = vld [vmem:[%s3666_s6 + $0xe0] sm:$0xff] }
 0x2bc   :  { %3060 = vrcp.f32 %v575_v49  ;;  %893 = vmatpush.msrb.mxu2 %v869_v13  ;;  %922 = vmatpush.msra.mxu0 %v870_v55 }
 0x2bd   :  { %3062 = vrcp.f32 %v572_v32 }
 0x2be   :  { %3064 = vrcp.f32 %v689_v34 }
 0x2bf   :  { %3066 = vrcp.f32 %v686_v44 }
 0x2c1   :  { %v3059_v56 = vpop.eup %3058 }
 0x2c2   :  { %v363_v57 = vmul.f32 %v3059_v56, %v3555_v51  ;;  %v3061_v9 = vpop.eup %3060  ;;  %v867_v56 = vld [vmem:[%s3666_s6 + $0xd0] sm:$0xff] }
 0x2c3   :  { %v3063_v50 = vpop.eup %3062  ;;  %v587_v60 = vmul.f32 %v3061_v9, %v3546_v43  ;;  %894 = vmatpush.msrb.mxu2 %v867_v56  ;;  %v863_v9 = vld [vmem:[%s3666_s6 + $0xb0] sm:$0xff] }
 0x2c4   :  { %v365_v27 = vpack.c.bf16 %v363_v57, %v362_v26  ;;  %v3065_v0 = vpop.eup %3064  ;;  %v586_v58 = vmul.f32 %v3063_v50, %v3523_v19  ;;  %v3625_v37 = vpop.f32.mrf.mxu1  ;;  %v868_v26 = vld [vmem:[%s3666_s6 + $0xd8] sm:$0xff]  ;;  %v865_v57 = vld [vmem:[%s3666_s6 + $0xc0] sm:$0xff] }
 0x2c5   :  { %v3067_v5 = vpop.eup %3066  ;;  %v701_v35 = vmul.f32 %v3065_v0, %v3528_v25  ;;  %923 = vmatpush.msra.mxu0 %v868_v26  ;;  %v864_v50 = vld [vmem:[%s3666_s6 + $0xb8] sm:$0xff]  ;;  %895 = vmatpush.msrb.mxu2 %v865_v57  ;;  %v862_v0 = vld [vmem:[%s3666_s6 + $0xa8] sm:$0xff] }
 0x2c6   :  { %2841 = vmatmul.msk.bf16.gmra.mxu3 %vm319_vm2, %v365_v27  ;;  %v590_v52 = vpack.c.bf16 %v587_v60, %v586_v58  ;;  %v700_v51 = vmul.f32 %v3067_v5, %v3512_v1  ;;  %v866_v27 = vld [vmem:[%s3666_s6 + $0xc8] sm:$0xff]  ;;  %v861_v60 = vld [vmem:[%s3666_s6 + $0xa0] sm:$0xff]  ;;  %v859_v58 = vld [vmem:[%s3666_s6 + $0x90] sm:$0xff] }
 0x2c7   :  { %924 = vmatpush.msra.mxu0 %v866_v27  ;;  %896 = vmatpush.msrb.mxu2 %v863_v9  ;;  %v857_v5 = vld [vmem:[%s3666_s6 + $0x80] sm:$0xff]  ;;  %v888_v9 = vld [vmem:[%s3723_s10 + $0x78] sm:$0xff] }
 0x2c8   :  { %v704_v24 = vpack.c.bf16 %v701_v35, %v700_v51  ;;  %v855_v35 = vld [vmem:[%s3666_s6 + $0x70] sm:$0xff]  ;;  %v856_v51 = vld [vmem:[%s3666_s6 + $0x78] sm:$0xff] }
 0x2c9   :  { %925 = vmatpush.msra.mxu0 %v864_v50  ;;  %897 = vmatpush.msrb.mxu2 %v861_v60  ;;  %v887_v50 = vld [vmem:[%s3723_s10 + $0x70] sm:$0xff] }
 0x2cb   :  { %926 = vmatpush.msra.mxu0 %v862_v0  ;;  %898 = vmatpush.msrb.mxu2 %v859_v58 }
 0x2cc   :  { %v3627_v34 = vpop.f32.mrf.mxu1 }
 0x2cd   :  { %v593_v4 = vpop.permute.xlu0 %592  ;;  %899 = vmatpush.msrb.mxu2 %v857_v5 }
 0x2ce   :  { %611 = vmatpush.bf16.msrb.mxu1 %v593_v4  ;;  %v860_v4 = vld [vmem:[%s3666_s6 + $0x98] sm:$0xff] }
 0x2cf   :  { %927 = vmatpush.msra.mxu0 %v860_v4  ;;  %900 = vmatpush.msrb.mxu2 %v855_v35  ;;  %v886_v4 = vld [vmem:[%s3723_s10 + $0x68] sm:$0xff]  ;;  %v885_v35 = vld [vmem:[%s3723_s10 + $0x60] sm:$0xff] }
 0x2d1   :  { %2844 = vmatmul.msk.bf16.vlgmr.msrb.gmra.mxu1 %vm319_vm2, %v590_v52  ;;  %v858_v52 = vld [vmem:[%s3666_s6 + $0x88] sm:$0xff] }
 0x2d2   :  { %928 = vmatpush.msra.mxu0 %v858_v52  ;;  %950 = vmatpush.msra.mxu1 %v888_v9  ;;  %v3272_v9 = vld [vmem:[%s3410_s23] sm:$0xff] }
 0x2d4   :  { %929 = vmatpush.msra.mxu0 %v856_v51  ;;  %951 = vmatpush.msra.mxu1 %v887_v50 }
 0x2d6   :  { %2846 = vmatmul.msk.bf16.vlgmr.msrb.gmra.mxu3 %vm319_vm2, %v704_v24  ;;  %v853_v24 = vld [vmem:[%s3666_s6 + $0x60] sm:$0xff]  ;;  %952 = vmatpush.msra.mxu1 %v886_v4 }
 0x2d7   :  { %901 = vmatpush.msrb.mxu2 %v853_v24 }
 0x2d8   :  { %953 = vmatpush.msra.mxu1 %v885_v35 }
 0x2de   :  { %v692_v39 = vpop.xlane.xlu2 %691 }
 0x2df   :  { %3068 = vrcp.f32 %v692_v39  ;;  %v854_v39 = vld [vmem:[%s3666_s6 + $0x68] sm:$0xff] }
 0x2e0   :  { %v695_v12 = vpop.xlane.xlu1 %694  ;;  %930 = vmatpush.msra.mxu0 %v854_v39  ;;  %v884_v39 = vld [vmem:[%s3723_s10 + $0x58] sm:$0xff] }
 0x2e1   :  { %3070 = vrcp.f32 %v695_v12  ;;  %v851_v12 = vld [vmem:[%s3666_s6 + $0x50] sm:$0xff]  ;;  %954 = vmatpush.msra.mxu1 %v884_v39 }
 0x2e2   :  { %902 = vmatpush.msrb.mxu2 %v851_v12  ;;  %v883_v12 = vld [vmem:[%s3723_s10 + $0x50] sm:$0xff] }
 0x2e3   :  { %955 = vmatpush.msra.mxu1 %v883_v12 }
 0x2e5   :  { %v3069_v43 = vpop.eup %3068 }
 0x2e6   :  { %v702_v19 = vmul.f32 %v3069_v43, %v3565_v47  ;;  %v465_v25 = vpop.xlane.xlu2 %464  ;;  %v852_v43 = vld [vmem:[%s3666_s6 + $0x58] sm:$0xff] }
 0x2e7   :  { %v3071_v11 = vpop.eup %3070  ;;  %3072 = vrcp.f32 %v465_v25  ;;  %931 = vmatpush.msra.mxu0 %v852_v43  ;;  %v845_v25 = vld [vmem:[%s3666_s6 + $0x20] sm:$0xff] }
 0x2e8   :  { %v703_v14 = vmul.f32 %v3071_v11, %v3567_v10  ;;  %v578_v1 = vpop.xlane.xlu1 %577  ;;  %v849_v11 = vld [vmem:[%s3666_s6 + $0x40] sm:$0xff] }
 0x2e9   :  { %903 = vmatpush.msrb.mxu2 %v849_v11 }
 0x2ea   :  { %v705_v63 = vpack.c.bf16 %v703_v14, %v702_v19  ;;  %v850_v19 = vld [vmem:[%s3666_s6 + $0x48] sm:$0xff]  ;;  %v847_v14 = vld [vmem:[%s3666_s6 + $0x30] sm:$0xff] }
 0x2eb   :  { %932 = vmatpush.msra.mxu0 %v850_v19  ;;  %904 = vmatpush.msrb.mxu2 %v847_v14 }
 0x2ec   :  { %2847 = vmatmul.msk.bf16.gmra.mxu3 %vm319_vm2, %v705_v63  ;;  %v848_v63 = vld [vmem:[%s3666_s6 + $0x38] sm:$0xff] }
 0x2ed   :  { %v3073_v17 = vpop.eup %3072  ;;  %933 = vmatpush.msra.mxu0 %v848_v63  ;;  %905 = vmatpush.msrb.mxu2 %v845_v25  ;;  %v882_v63 = vld [vmem:[%s3723_s10 + $0x48] sm:$0xff] }
 0x2ee   :  { %v473_v7 = vmul.f32 %v3073_v17, %v3573_v18  ;;  %v3632_v18 = vpop.f32.mrf.mxu1  ;;  %v844_v17 = vld [vmem:[%s3666_s6 + $0x18] sm:$0xff]  ;;  %956 = vmatpush.msra.mxu1 %v882_v63 }
 0x2f8   :  { %v462_v15 = vpop.xlane.xlu0 %461 }
 0x2f9   :  { %3074 = vrcp.f32 %v462_v15  ;;  %v846_v15 = vld [vmem:[%s3666_s6 + $0x28] sm:$0xff] }
 0x2fa   :  { %3076 = vrcp.f32 %v578_v1  ;;  %v843_v1 = vld [vmem:[%s3666_s6 + $0x10] sm:$0xff]  ;;  %934 = vmatpush.msra.mxu0 %v846_v15 }
 0x2fb   :  { %906 = vmatpush.msrb.mxu2 %v843_v1 }
 0x2fc   :  { %935 = vmatpush.msra.mxu0 %v844_v17  ;;  %v881_v17 = vld [vmem:[%s3723_s10 + $0x40] sm:$0xff] }
 0x2fd   :  { %957 = vmatpush.msra.mxu1 %v881_v17 }
 0x2ff   :  { %v3075_v20 = vpop.eup %3074 }
 0x300   :  { %v581_v6 = vpop.xlane.xlu0 %580  ;;  %v472_v22 = vmul.f32 %v3075_v20, %v3583_v21  ;;  %v3077_v10 = vpop.eup %3076  ;;  %v841_v20 = vld [vmem:[%s3666_s6] sm:$0xff] }
 0x301   :  { %3078 = vrcp.f32 %v581_v6  ;;  %v588_v59 = vmul.f32 %v3077_v10, %v3575_v46  ;;  %v842_v6 = vld [vmem:[%s3666_s6 + $0x8] sm:$0xff]  ;;  %907 = vmatpush.msrb.mxu2 %v841_v20  ;;  %v880_v20 = vld [vmem:[%s3723_s10 + $0x38] sm:$0xff]  ;;  %s3315_s6 = smov 29  }
 0x302   :  { %v475_v47 = vpack.c.bf16 %v473_v7, %v472_v22  ;;  %936 = vmatpush.msra.mxu0 %v842_v6  ;;  %958 = vmatpush.msra.mxu1 %v880_v20 }
 0x304   :  { %2843 = vmatmul.msk.bf16.gmra.mxu0 %vm319_vm2, %v475_v47 }
 0x307   :  { %v3079_v16 = vpop.eup %3078 }
 0x308   :  { %v589_v32 = vmul.f32 %v3079_v16, %v3591_v23  ;;  %v3642_v23 = vpop.f32.mrf.mxu1  ;;  %v3704_v16 = vld [vmem:[%s3640_s28] ss:$0 sm:$0xff]  ;;  %s3313_s28 = smov 27  }
 0x309   :  { %s2829_s1 = sld [smem:[%s4545_s0 + %s3313_s28]]  }
 0x30a   :  { %v591_v33 = vpack.c.bf16 %v589_v32, %v588_v59 }
 0x30c   :  { %2845 = vmatmul.msk.bf16.gmra.mxu1 %vm319_vm2, %v591_v33 }
 0x324   :  { %v3629_v2 = vpop.f32.mrf.mxu3 }
 0x32c   :  { %v3635_v46 = vpop.f32.mrf.mxu3 }
 0x336   :  { %v499_v21 = vpop.f32.mrf.mxu0 }
 0x337   :  { %741 = vrot.lane.b32.xlu2 %v499_v21, %s3282_s14  ;;  %v3709_v21 = vld [vmem:[%s3649_s2] ss:$0 sm:$0xff]  ;;  %s3314_s2 = smov 28  }
 0x338   :  { %s2830_s5 = sld [smem:[%s4545_s0 + %s3314_s2]]  }
 0x33e   :  { %v501_v38 = vpop.f32.mrf.mxu0 }
 0x33f   :  { %743 = vrot.lane.b32.xlu2 %v501_v38, %s3282_s14 }
 0x349   :  { %v3644_v45 = vpop.f32.mrf.mxu3 }
 0x34e   :  { %v613_v40 = vpop.f32.mrf.mxu1 }
 0x34f   :  { %757 = vrot.lane.b32.xlu1 %v613_v40, %s3290_s24 }
 0x351   :  { %v3652_v42 = vpop.f32.mrf.mxu3 }
 0x356   :  { %v615_v41 = vpop.f32.mrf.mxu1 }
 0x359   :  { %v727_v44 = vpop.f32.mrf.mxu3 }
 0x35a   :  { %773 = vrot.lane.b32.xlu0 %v727_v44, %s3283_s15 }
 0x361   :  { %v729_v3 = vpop.f32.mrf.mxu3 }
 0x362   :  { %759 = vrot.lane.b32.xlu0 %v615_v41, %s3290_s24  ;;  %775 = vrot.lane.b32.xlu1 %v729_v3, %s3283_s15 }
 0x36f   :  { %v732_v62 = vpop.f32.mrf.mxu3 }
 0x370   :  { %777 = vrot.lane.b32.xlu1 %v732_v62, %s3283_s15 }
 0x377   :  { %v734_v8 = vpop.f32.mrf.mxu3 }
 0x378   :  { %779 = vrot.lane.b32.xlu1 %v734_v8, %s3283_s15 }
 0x381   :  { %v504_v48 = vpop.f32.mrf.mxu0 }
 0x382   :  { %745 = vrot.lane.b32.xlu2 %v504_v48, %s3282_s14 }
 0x389   :  { %v506_v49 = vpop.f32.mrf.mxu0  ;;  %v618_v61 = vpop.f32.mrf.mxu1 }
 0x38a   :  { %747 = vrot.lane.b32.xlu2 %v506_v49, %s3282_s14  ;;  %761 = vrot.lane.b32.xlu0 %v618_v61, %s3290_s24 }
 0x391   :  { %v620_v28 = vpop.f32.mrf.mxu1  ;;  %v742_v22 = vpop.permute.xlu2 %741 }
 0x392   :  { %763 = vrot.lane.b32.xlu0 %v620_v28, %s3290_s24  ;;  %v785_v47 = vsel %vm319_vm2, %v3629_v2, %v742_v22  ;;  %v879_v22 = vld [vmem:[%s3723_s10 + $0x30] sm:$0xff] }
 0x393   :  { %959 = vmatpush.msra.mxu1 %v879_v22 }
 0x399   :  { %v744_v40 = vpop.permute.xlu2 %743 }
 0x39a   :  { %v786_v41 = vsel %vm319_vm2, %v3635_v46, %v744_v40  ;;  %v876_v40 = vld [vmem:[%s3723_s10 + $0x18] sm:$0xff] }
 0x3c1   :  { %v758_v7 = vpop.permute.xlu1 %757 }
 0x3c2   :  { %v790_v10 = vsel %vm789_vm0, %v785_v47, %v758_v7  ;;  %v878_v47 = vld [vmem:[%s3723_s10 + $0x28] sm:$0xff] }
 0x3c3   :  { %960 = vmatpush.msra.mxu1 %v878_v47 }
 0x3cc   :  { %v774_v59 = vpop.permute.xlu0 %773 }
 0x3cd   :  { %v795_v32 = vsel %vm794_vm4, %v790_v10, %v774_v59 }
 0x3ce   :  { %v799_v33 = vadd.f32 %v795_v32, %v3625_v37 }
 0x3d0   :  { %v806_v38 = vmul.f32 %v3704_v16, %v799_v33 }
 0x3d2   :  { %v813_v44 = vadd.f32 %v3709_v21, %v806_v38 }
 0x3d4   :  { %v760_v2 = vpop.permute.xlu0 %759  ;;  %v776_v3 = vpop.permute.xlu1 %775  ;;  %v821_v62 = vmin.f32 %v813_v44, 0.0  ;;  %vm817_vm5 = vcmp.gt.f32.partialorder %v813_v44, 0.0 }
 0x3d5   :  { %v791_v8 = vsel %vm789_vm0, %v786_v41, %v760_v2  ;;  %v874_v41 = vld [vmem:[%s3723_s10 + $0x8] sm:$0xff]  ;;  %v873_v2 = vld [vmem:[%s3723_s10] sm:$0xff] }
 0x3d6   :  { %v796_v48 = vsel %vm794_vm4, %v791_v8, %v776_v3  ;;  %v825_v49 = vmul.f32 1.442695, %v821_v62 }
 0x3d7   :  { %v800_v37 = vadd.f32 %v796_v48, %v3627_v34 }
 0x3d8   :  { %3080 = vpow2.f32 %v825_v49 }
 0x3d9   :  { %v807_v61 = vmul.f32 %v3704_v16, %v800_v37 }
 0x3db   :  { %v814_v28 = vadd.f32 %v3709_v21, %v807_v61  ;;  %v889_v61 = vld [vmem:[%s2812_s16] sm:$0xf]  ;;  %s3310_s16 = smov 2  }
 0x3dc   :  { %v746_v34 = vpop.permute.xlu2 %745  ;;  %s2804_s19 = sld [smem:[%s4545_s0 + %s3310_s16]]  }
 0x3dd   :  { %v822_v53 = vmin.f32 %v814_v28, 0.0  ;;  %vm818_vm6 = vcmp.gt.f32.partialorder %v814_v28, 0.0  ;;  %v787_v60 = vsel %vm319_vm2, %v3644_v45, %v746_v34 }
 0x3de   :  { %v3081_v54 = vpop.eup %3080 }
 0x3df   :  { %v2848_v13 = vadd.f32 -1.0, %v3081_v54  ;;  %v827_v55 = vmul.f32 1.442695, %v822_v53 }
 0x3e1   :  { %v837_v46 = vsel %vm817_vm5, %v813_v44, %v2848_v13  ;;  %3082 = vpow2.f32 %v827_v55  ;;  %v875_v44 = vld [vmem:[%s3723_s10 + $0x10] sm:$0xff] }
 0x3e2   :  { %908 = vmatmul.f32.vlgmr.msrb.gmra.mxu2 %v837_v46  ;;  %937 = vmatmul.f32.vlgmr.msra.gmra.mxu0 %v837_v46  ;;  %v778_v27 = vpop.permute.xlu1 %777 }
 0x3e4   :  { %v748_v51 = vpop.permute.xlu2 %747 }
 0x3e5   :  { %v788_v43 = vsel %vm319_vm2, %v3652_v42, %v748_v51 }
 0x3e7   :  { %v3083_v56 = vpop.eup %3082 }
 0x3e8   :  { %v2849_v26 = vadd.f32 -1.0, %v3083_v56 }
 0x3ea   :  { %v838_v57 = vsel %vm818_vm6, %v814_v28, %v2849_v26  ;;  %v780_v19 = vpop.permute.xlu1 %779 }
 0x3eb   :  { %911 = vmatmul.f32.gmra.mxu2 %v838_v57  ;;  %940 = vmatmul.f32.gmra.mxu0 %v838_v57 }
 0x3fc   :  { %v762_v0 = vpop.permute.xlu0 %761 }
 0x3fd   :  { %v792_v58 = vsel %vm789_vm0, %v787_v60, %v762_v0 }
 0x3fe   :  { %v797_v5 = vsel %vm794_vm4, %v792_v58, %v778_v27 }
 0x3ff   :  { %v801_v52 = vadd.f32 %v797_v5, %v3632_v18 }
 0x401   :  { %v808_v24 = vmul.f32 %v3704_v16, %v801_v52 }
 0x403   :  { %v815_v45 = vadd.f32 %v3709_v21, %v808_v24 }
 0x404   :  { %v764_v11 = vpop.permute.xlu0 %763 }
 0x405   :  { %v793_v18 = vsel %vm789_vm0, %v788_v43, %v764_v11  ;;  %v823_v14 = vmin.f32 %v815_v45, 0.0  ;;  %vm819_vm7 = vcmp.gt.f32.partialorder %v815_v45, 0.0 }
 0x406   :  { %v798_v25 = vsel %vm794_vm4, %v793_v18, %v780_v19 }
 0x407   :  { %v802_v15 = vadd.f32 %v798_v25, %v3642_v23  ;;  %v829_v1 = vmul.f32 1.442695, %v823_v14  ;;  %v877_v23 = vld [vmem:[%s3723_s10 + $0x20] sm:$0xff]  ;;  %s3309_s10 = smov 24  }
 0x408   :  { %961 = vmatpush.msra.mxu1 %v877_v23  ;;  %s2826_s13 = sld [smem:[%s4545_s0 + %s3309_s10]]  }
 0x409   :  { %3084 = vpow2.f32 %v829_v1  ;;  %v809_v42 = vmul.f32 %v3704_v16, %v802_v15 }
 0x40a   :  { %962 = vmatpush.msra.mxu1 %v876_v40 }
 0x40b   :  { %v816_v6 = vadd.f32 %v3709_v21, %v809_v42 }
 0x40c   :  { %963 = vmatpush.msra.mxu1 %v875_v44 }
 0x40d   :  { %v824_v7 = vmin.f32 %v816_v6, 0.0  ;;  %vm820_vm8 = vcmp.gt.f32.partialorder %v816_v6, 0.0 }
 0x40e   :  { %964 = vmatpush.msra.mxu1 %v874_v41 }
 0x40f   :  { %v3085_v10 = vpop.eup %3084  ;;  %v831_v59 = vmul.f32 1.442695, %v824_v7 }
 0x410   :  { %v2850_v32 = vadd.f32 -1.0, %v3085_v10  ;;  %965 = vmatpush.msra.mxu1 %v873_v2  ;;  %v3273_v10 = vld [vmem:[%s3410_s23 + $0x8] sm:$0xff] }
 0x411   :  { %3086 = vpow2.f32 %v831_v59 }
 0x412   :  { %v839_v16 = vsel %vm819_vm7, %v815_v45, %v2850_v32 }
 0x413   :  { %914 = vmatmul.f32.gmra.mxu2 %v839_v16  ;;  %943 = vmatmul.f32.gmra.mxu0 %v839_v16 }
 0x417   :  { %v3087_v33 = vpop.eup %3086 }
 0x418   :  { %v2851_v21 = vadd.f32 -1.0, %v3087_v33 }
 0x41a   :  { %v840_v38 = vsel %vm820_vm8, %v816_v6, %v2851_v21 }
 0x41b   :  { %917 = vmatmul.f32.gmra.mxu2 %v840_v38  ;;  %946 = vmatmul.f32.gmra.mxu0 %v840_v38 }
 0x465   :  { %v909_v3 = vpop.f32.mrf.mxu2 }
 0x466   :  { %966 = vmatmul.f32.vlgmr.msra.gmra.mxu1 %v909_v3 }
 0x46e   :  { %v912_v62 = vpop.f32.mrf.mxu2 }
 0x46f   :  { %969 = vmatmul.f32.gmra.mxu1 %v912_v62  ;;  %v3760_v37 = vpack.c.bf16 %v912_v62, %v909_v3 }
 0x496   :  { %v915_v8 = vpop.f32.mrf.mxu2 }
 0x497   :  { %972 = vmatmul.f32.gmra.mxu1 %v915_v8 }
 0x49e   :  { %v918_v48 = vpop.f32.mrf.mxu2 }
 0x49f   :  { %v3755_v49 = vpack.c.bf16 %v918_v48, %v915_v8  ;;  %975 = vmatmul.f32.gmra.mxu1 %v918_v48  ;;  %991 = vmatpush.xpose.msra.mxu3 %v918_v48 }
 0x4a1   :  { %1200 = vrot.lane.b32.xlu2 %v3755_v49, %s3283_s15  ;;  %1100 = vmatpush.bf16.msra.mxu2 %v3755_v49 }
 0x4a3   :  { %992 = vmatpush.xpose.msra.mxu3 %v915_v8 }
 0x4a5   :  { %1101 = vmatpush.bf16.msra.mxu2 %v3760_v37 }
 0x4a7   :  { %993 = vmatpush.xpose.msra.mxu3 %v912_v62 }
 0x4ab   :  { %994 = vmatpush.xpose.msra.mxu3 %v909_v3 }
 0x4ae   :  { %995 = vmatmul.f32.vlgmr.msra.gmra.mxu3 %v889_v61 }
 0x4e3   :  { %v967_v28 = vpop.f32.mrf.mxu1 }
 0x4e4   :  { %1344 = vperm.xlu0 %2975, %v967_v28   ;;  %1230 = vperm.xlu1 %2974, %v967_v28  }
 0x4e5   :  { %1114 = vperm.xlu2 %2973, %v967_v28  }
 0x4ec   :  { %2977 = vset.pattern.permute.xlu0 %v3287_v31  ;;  %2976 = vset.pattern.permute.xlu1 %v3286_v30  ;;  %v970_v53 = vpop.f32.mrf.mxu1 }
 0x4ed   :  { %2978 = vset.pattern.permute.xlu2 %v3288_v36  ;;  %1001 = vperm.xlu1 %2976, %v967_v28  }
 0x4ee   :  { %1118 = vperm.xlu0 %2977, %v970_v53   ;;  %1234 = vperm.xlu2 %2978, %v970_v53  }
 0x4f5   :  { %2979 = vset.pattern.permute.xlu1 %v3285_v29 }
 0x4f6   :  { %2980 = vset.pattern.permute.xlu2 %v3286_v30  ;;  %1348 = vperm.xlu1 %2979, %v970_v53  }
 0x4f7   :  { %1006 = vperm.xlu2 %2980, %v970_v53   ;;  %2985 = vset.pattern.permute.xlu0 %v3288_v36 }
 0x4fb   :  { %v1201_v54 = vpop.permute.xlu2 %1200 }
 0x4fc   :  { %1216 = vmatpush.bf16.msrb.mxu3 %v1201_v54 }
 0x4ff   :  { %2981 = vset.pattern.permute.xlu2 %v3287_v31 }
 0x514   :  { %v973_v13 = vpop.f32.mrf.mxu1 }
 0x515   :  { %1352 = vperm.xlu1 %2979, %v973_v13   ;;  %1122 = vperm.xlu2 %2981, %v973_v13  }
 0x51c   :  { %v976_v55 = vpop.f32.mrf.mxu1 }
 0x51d   :  { %2983 = vset.pattern.permute.xlu1 %v3286_v30  ;;  %2982 = vset.pattern.permute.xlu2 %v3288_v36 }
 0x51e   :  { %1242 = vperm.xlu0 %2985, %v976_v55   ;;  %1011 = vperm.xlu1 %2983, %v973_v13  }
 0x51f   :  { %1238 = vperm.xlu2 %2982, %v973_v13  }
 0x526   :  { %2984 = vset.pattern.permute.xlu1 %v3287_v31  ;;  %2988 = vset.pattern.permute.xlu0 %v3287_v31 }
 0x527   :  { %2986 = vset.pattern.permute.xlu2 %v3285_v29  ;;  %1126 = vperm.xlu1 %2984, %v976_v55  }
 0x528   :  { %1356 = vperm.xlu2 %2986, %v976_v55  }
 0x52f   :  { %2989 = vset.pattern.permute.xlu1 %v3288_v36 }
 0x530   :  { %2987 = vset.pattern.permute.xlu2 %v3286_v30 }
 0x531   :  { %1016 = vperm.xlu2 %2987, %v976_v55   ;;  %v996_v46 = vpop.f32.mrf.mxu3 }
 0x532   :  { %v3781_v56 = vperm.slane %v996_v46, 1  ;;  %v3789_v0 = vperm.slane %v996_v46, 3  ;;  %v3791_v58 = vperm.slane %v996_v46, 2  ;;  %v3799_v19 = vperm.slane %v996_v46, 0 }
 0x539   :  { %2992 = vset.pattern.permute.xlu2 %v3287_v31 }
 0x53f   :  { %v1115_v26 = vpop.permute.xlu2 %1114 }
 0x540   :  { %v1130_v57 = vadd.f32 %v3781_v56, %v1115_v26 }
 0x542   :  { %v1138_v34 = vmul.f32 0.2, %v1130_v57  ;;  %vm1134_vm9 = vcmp.gt.f32.partialorder %v1130_v57, 0.0 }
 0x544   :  { %v1142_v27 = vsel %vm1134_vm9, %v1130_v57, %v1138_v34 }
 0x545   :  { %v3785_v50 = vadd.f32 %v3272_v9, %v1142_v27  ;;  %v3274_v27 = vld [vmem:[%s3410_s23 + $0x10] sm:$0xff] }
 0x547   :  { %v1150_v60 = vsel %vm319_vm2, %v3785_v50, -inf }
 0x548   :  { %1151 = vmax.xlane.f32.xlu0 %v1150_v60  ;;  %v1235_v11 = vpop.permute.xlu2 %1234 }
 0x549   :  { %v1247_v25 = vadd.f32 %v3791_v58, %v1235_v11 }
 0x54b   :  { %v1255_v6 = vmul.f32 0.2, %v1247_v25  ;;  %vm1251_vm14 = vcmp.gt.f32.partialorder %v1247_v25, 0.0 }
 0x54d   :  { %v1259_v21 = vsel %vm1251_vm14, %v1247_v25, %v1255_v6 }
 0x54e   :  { %v3818_v40 = vadd.f32 %v3273_v10, %v1259_v21 }
 0x550   :  { %v1269_v2 = vsel %vm319_vm2, %v3818_v40, -inf }
 0x551   :  { %v1007_v23 = vpop.permute.xlu2 %1006 }
 0x552   :  { %v1021_v3 = vadd.f32 %v3799_v19, %v1007_v23 }
 0x554   :  { %v1029_v48 = vmul.f32 0.2, %v1021_v3  ;;  %vm1025_vm1 = vcmp.gt.f32.partialorder %v1021_v3, 0.0 }
 0x556   :  { %v1345_v4 = vpop.permute.xlu0 %1344  ;;  %v1231_v5 = vpop.permute.xlu1 %1230  ;;  %v1033_v53 = vsel %vm1025_vm1, %v1021_v3, %v1029_v48 }
 0x557   :  { %v1360_v52 = vadd.f32 %v3789_v0, %v1345_v4  ;;  %v1246_v35 = vadd.f32 %v3791_v58, %v1231_v5  ;;  %v3829_v55 = vadd.f32 %v3273_v10, %v1033_v53 }
 0x559   :  { %vm1364_vm10 = vcmp.gt.f32.partialorder %v1360_v52, 0.0  ;;  %v1368_v51 = vmul.f32 0.2, %v1360_v52  ;;  %vm1250_vm11 = vcmp.gt.f32.partialorder %v1246_v35, 0.0  ;;  %v1254_v24 = vmul.f32 0.2, %v1246_v35 }
 0x55a   :  { %v1043_v34 = vsel %vm319_vm2, %v3829_v55, -inf }
 0x55b   :  { %v1372_v39 = vsel %vm1364_vm10, %v1360_v52, %v1368_v51  ;;  %v1258_v45 = vsel %vm1250_vm11, %v1246_v35, %v1254_v24 }
 0x55c   :  { %v3795_v12 = vadd.f32 %v3272_v9, %v1372_v39  ;;  %v3797_v43 = vadd.f32 %v3272_v9, %v1258_v45 }
 0x55e   :  { %v1380_v18 = vsel %vm319_vm2, %v3795_v12, -inf  ;;  %v1266_v14 = vsel %vm319_vm2, %v3797_v43, -inf }
 0x55f   :  { %1381 = vmax.xlane.f32.xlu0 %v1380_v18  ;;  %1267 = vmax.xlane.f32.xlu2 %v1266_v14  ;;  %v1002_v63 = vpop.permute.xlu1 %1001 }
 0x560   :  { %v1119_v15 = vpop.permute.xlu0 %1118  ;;  %v1020_v1 = vadd.f32 %v3799_v19, %v1002_v63 }
 0x561   :  { %v1131_v17 = vadd.f32 %v3781_v56, %v1119_v15 }
 0x562   :  { %vm1024_vm12 = vcmp.gt.f32.partialorder %v1020_v1, 0.0  ;;  %v1028_v42 = vmul.f32 0.2, %v1020_v1 }
 0x563   :  { %vm1135_vm13 = vcmp.gt.f32.partialorder %v1131_v17, 0.0  ;;  %v1139_v20 = vmul.f32 0.2, %v1131_v17 }
 0x564   :  { %v1032_v22 = vsel %vm1024_vm12, %v1020_v1, %v1028_v42 }
 0x565   :  { %v1143_v7 = vsel %vm1135_vm13, %v1131_v17, %v1139_v20  ;;  %v3808_v47 = vadd.f32 %v3272_v9, %v1032_v22 }
 0x566   :  { %v3811_v59 = vadd.f32 %v3273_v10, %v1143_v7 }
 0x567   :  { %v1040_v32 = vsel %vm319_vm2, %v3808_v47, -inf }
 0x568   :  { %v1153_v16 = vsel %vm319_vm2, %v3811_v59, -inf  ;;  %1041 = vmax.xlane.f32.xlu0 %v1040_v32  ;;  %v1349_v33 = vpop.permute.xlu1 %1348  ;;  %v3275_v32 = vld [vmem:[%s3410_s23 + $0x18] sm:$0xff] }
 0x569   :  { %1154 = vmax.xlane.f32.xlu1 %v1153_v16  ;;  %v1361_v38 = vadd.f32 %v3789_v0, %v1349_v33 }
 0x56b   :  { %v1369_v44 = vmul.f32 0.2, %v1361_v38  ;;  %vm1365_vm15 = vcmp.gt.f32.partialorder %v1361_v38, 0.0 }
 0x56d   :  { %v1373_v62 = vsel %vm1365_vm15, %v1361_v38, %v1369_v44 }
 0x56e   :  { %v3823_v8 = vadd.f32 %v3273_v10, %v1373_v62 }
 0x56f   :  { %v1123_v41 = vpop.permute.xlu2 %1122 }
 0x570   :  { %1270 = vmax.xlane.f32.xlu0 %v1269_v2  ;;  %v1383_v61 = vsel %vm319_vm2, %v3823_v8, -inf  ;;  %v1132_v28 = vadd.f32 %v3781_v56, %v1123_v41 }
 0x572   :  { %v1140_v46 = vmul.f32 0.2, %v1132_v28  ;;  %vm1136_vm5 = vcmp.gt.f32.partialorder %v1132_v28, 0.0 }
 0x574   :  { %v1144_v60 = vsel %vm1136_vm5, %v1132_v28, %v1140_v46 }
 0x575   :  { %v3838_v5 = vadd.f32 %v3274_v27, %v1144_v60 }
 0x577   :  { %v1156_v35 = vsel %vm319_vm2, %v3838_v5, -inf }
 0x578   :  { %1384 = vmax.xlane.f32.xlu0 %v1383_v61 }
 0x579   :  { %v1239_v54 = vpop.permute.xlu2 %1238 }
 0x57a   :  { %v1248_v13 = vadd.f32 %v3791_v58, %v1239_v54 }
 0x57c   :  { %v1256_v26 = vmul.f32 0.2, %v1248_v13  ;;  %vm1252_vm3 = vcmp.gt.f32.partialorder %v1248_v13, 0.0 }
 0x57e   :  { %v1260_v57 = vsel %vm1252_vm3, %v1248_v13, %v1256_v26 }
 0x57f   :  { %v3834_v9 = vadd.f32 %v3274_v27, %v1260_v57 }
 0x580   :  { %1044 = vmax.xlane.f32.xlu0 %v1043_v34 }
 0x581   :  { %v1272_v4 = vsel %vm319_vm2, %v3834_v9, -inf }
 0x582   :  { %1273 = vmax.xlane.f32.xlu2 %v1272_v4  ;;  %v1357_v42 = vpop.permute.xlu2 %1356 }
 0x583   :  { %v1363_v22 = vadd.f32 %v3789_v0, %v1357_v42 }
 0x585   :  { %v1371_v33 = vmul.f32 0.2, %v1363_v22  ;;  %vm1367_vm10 = vcmp.gt.f32.partialorder %v1363_v22, 0.0 }
 0x587   :  { %v1353_v52 = vpop.permute.xlu1 %1352  ;;  %v1375_v41 = vsel %vm1367_vm10, %v1363_v22, %v1371_v33 }
 0x588   :  { %v1362_v51 = vadd.f32 %v3789_v0, %v1353_v52  ;;  %1157 = vmax.xlane.f32.xlu0 %v1156_v35 }
 0x58a   :  { %vm1366_vm6 = vcmp.gt.f32.partialorder %v1362_v51, 0.0  ;;  %v1370_v24 = vmul.f32 0.2, %v1362_v51 }
 0x58b   :  { %v1017_v3 = vpop.permute.xlu2 %1016 }
 0x58c   :  { %v1374_v39 = vsel %vm1366_vm6, %v1362_v51, %v1370_v24  ;;  %v1023_v46 = vadd.f32 %v3799_v19, %v1017_v3 }
 0x58d   :  { %v3843_v45 = vadd.f32 %v3274_v27, %v1374_v39 }
 0x58e   :  { %v1031_v34 = vmul.f32 0.2, %v1023_v46  ;;  %vm1027_vm11 = vcmp.gt.f32.partialorder %v1023_v46, 0.0 }
 0x58f   :  { %v1386_v11 = vsel %vm319_vm2, %v3843_v45, -inf }
 0x590   :  { %v1243_v18 = vpop.permute.xlu0 %1242  ;;  %1387 = vmax.xlane.f32.xlu0 %v1386_v11  ;;  %v1012_v14 = vpop.permute.xlu1 %1011  ;;  %v1035_v52 = vsel %vm1027_vm11, %v1023_v46, %v1031_v34 }
 0x591   :  { %v1249_v63 = vadd.f32 %v3791_v58, %v1243_v18  ;;  %v1022_v25 = vadd.f32 %v3799_v19, %v1012_v14  ;;  %v3891_v51 = vadd.f32 %v3275_v32, %v1035_v52 }
 0x593   :  { %vm1026_vm7 = vcmp.gt.f32.partialorder %v1022_v25, 0.0  ;;  %v1030_v15 = vmul.f32 0.2, %v1022_v25  ;;  %v1257_v1 = vmul.f32 0.2, %v1249_v63  ;;  %vm1253_vm8 = vcmp.gt.f32.partialorder %v1249_v63, 0.0 }
 0x594   :  { %v1049_v11 = vsel %vm319_vm2, %v3891_v51, -inf }
 0x595   :  { %v1034_v17 = vsel %vm1026_vm7, %v1022_v25, %v1030_v15  ;;  %v1261_v10 = vsel %vm1253_vm8, %v1249_v63, %v1257_v1 }
 0x596   :  { %v3849_v20 = vadd.f32 %v3274_v27, %v1034_v17  ;;  %v3858_v16 = vadd.f32 %v3275_v32, %v1261_v10 }
 0x598   :  { %v1046_v6 = vsel %vm319_vm2, %v3849_v20, -inf  ;;  %v1275_v0 = vsel %vm319_vm2, %v3858_v16, -inf }
 0x599   :  { %1047 = vmax.xlane.f32.xlu0 %v1046_v6  ;;  %v1127_v7 = vpop.permute.xlu1 %1126 }
 0x59a   :  { %1428 = vrot.lane.b32.xlu2 %v3755_v49, %s3282_s14  ;;  %v1133_v58 = vadd.f32 %v3781_v56, %v1127_v7  ;;  %v3866_v56 = vadd.f32 %v3275_v32, %v1375_v41 }
 0x59c   :  { %vm1137_vm9 = vcmp.gt.f32.partialorder %v1133_v58, 0.0  ;;  %v1141_v23 = vmul.f32 0.2, %v1133_v58  ;;  %v1389_v2 = vsel %vm319_vm2, %v3866_v56, -inf }
 0x59e   :  { %v1145_v21 = vsel %vm1137_vm9, %v1133_v58, %v1141_v23 }
 0x59f   :  { %v3860_v38 = vadd.f32 %v3275_v32, %v1145_v21 }
 0x5a1   :  { %1276 = vmax.xlane.f32.xlu0 %v1275_v0  ;;  %v1159_v44 = vsel %vm319_vm2, %v3860_v38, -inf }
 0x5a2   :  { %1160 = vmax.xlane.f32.xlu1 %v1159_v44 }
 0x5a9   :  { %1390 = vmax.xlane.f32.xlu0 %v1389_v2 }
 0x5bb   :  { %1314 = vrot.lane.b32.xlu1 %v3755_v49, %s3290_s24  ;;  %v1152_v62 = vpop.xlane.xlu0 %1151 }
 0x5bd   :  { %1198 = vrot.lane.b32.xlu0 %v3760_v37, %s3283_s15 }
 0x5c3   :  { %1312 = vrot.lane.b32.xlu1 %v3760_v37, %s3290_s24 }
 0x5d2   :  { %v1382_v48 = vpop.xlane.xlu0 %1381  ;;  %v1268_v61 = vpop.xlane.xlu2 %1267 }
 0x5d3   :  { %v1278_v28 = vsub.f32 %v3797_v43, %v1268_v61  ;;  %v1392_v49 = vsub.f32 %v3795_v12, %v1382_v48  ;;  %v1162_v43 = vsub.f32 %v3785_v50, %v1152_v62 }
 0x5d5   :  { %v1282_v53 = vmul.f32 1.442695, %v1278_v28  ;;  %v1396_v27 = vmul.f32 1.442695, %v1392_v49  ;;  %v1166_v12 = vmul.f32 1.442695, %v1162_v43 }
 0x5d7   :  { %3088 = vpow2.f32 %v1282_v53 }
 0x5db   :  { %v3877_v54 = vpop.xlane.xlu0 %1041 }
 0x5dc   :  { %v1155_v13 = vpop.xlane.xlu1 %1154 }
 0x5dd   :  { %v1163_v26 = vsub.f32 %v3811_v59, %v1155_v13  ;;  %v3882_v60 = vpop.eup %3088 }
 0x5de   :  { %v1290_v19 = vsel %vm319_vm2, %v3882_v60, 0.0 }
 0x5df   :  { %v1168_v57 = vmul.f32 1.442695, %v1163_v26 }
 0x5e1   :  { %3090 = vpow2.f32 %v1168_v57 }
 0x5e2   :  { %3092 = vpow2.f32 %v1396_v27 }
 0x5e3   :  { %v1271_v4 = vpop.xlane.xlu0 %1270  ;;  %3094 = vpow2.f32 %v1166_v12 }
 0x5e4   :  { %v1279_v50 = vsub.f32 %v3818_v40, %v1271_v4 }
 0x5e6   :  { %v1284_v14 = vmul.f32 1.442695, %v1279_v50 }
 0x5e7   :  { %v3887_v35 = vpop.eup %3090  ;;  %1291 = vadd.xlane.f32.xlu0 %v1290_v19 }
 0x5e8   :  { %v1177_v59 = vsel %vm319_vm2, %v3887_v35, 0.0  ;;  %v3893_v24 = vpop.eup %3092  ;;  %3096 = vpow2.f32 %v1284_v14 }
 0x5e9   :  { %1178 = vadd.xlane.f32.xlu2 %v1177_v59  ;;  %v1404_v18 = vsel %vm319_vm2, %v3893_v24, 0.0  ;;  %v3900_v63 = vpop.eup %3094 }
 0x5ea   :  { %v1174_v1 = vsel %vm319_vm2, %v3900_v63, 0.0 }
 0x5eb   :  { %v1385_v39 = vpop.xlane.xlu0 %1384 }
 0x5ec   :  { %v1393_v25 = vsub.f32 %v3823_v8, %v1385_v39 }
 0x5ed   :  { %1050 = vmax.xlane.f32.xlu1 %v1049_v11 }
 0x5ee   :  { %v1398_v17 = vmul.f32 1.442695, %v1393_v25  ;;  %v3907_v42 = vpop.eup %3096 }
 0x5ef   :  { %1405 = vadd.xlane.f32.xlu0 %v1404_v18  ;;  %v1293_v7 = vsel %vm319_vm2, %v3907_v42, 0.0 }
 0x5f0   :  { %3098 = vpow2.f32 %v1398_v17 }
 0x5f3   :  { %v1045_v15 = vpop.xlane.xlu0 %1044 }
 0x5f5   :  { %v3905_v40 = vpop.xlane.xlu2 %1273  ;;  %1175 = vadd.xlane.f32.xlu1 %v1174_v1 }
 0x5f6   :  { %v3912_v58 = vpop.eup %3098  ;;  %v1280_v39 = vsub.f32 %v3834_v9, %v3905_v40 }
 0x5f7   :  { %v1407_v32 = vsel %vm319_vm2, %v3912_v58, 0.0 }
 0x5f8   :  { %v1286_v18 = vmul.f32 1.442695, %v1280_v39 }
 0x5fb   :  { %v1158_v6 = vpop.xlane.xlu0 %1157 }
 0x5fc   :  { %v1164_v22 = vsub.f32 %v3838_v5, %v1158_v6 }
 0x5fd   :  { %v1429_v10 = vpop.permute.xlu2 %1428  ;;  %1294 = vadd.xlane.f32.xlu1 %v1293_v7 }
 0x5fe   :  { %v1170_v8 = vmul.f32 1.442695, %v1164_v22  ;;  %1444 = vmatpush.bf16.msrb.mxu1 %v1429_v10 }
 0x600   :  { %3100 = vpow2.f32 %v1170_v8 }
 0x603   :  { %v1388_v23 = vpop.xlane.xlu0 %1387 }
 0x604   :  { %v1394_v62 = vsub.f32 %v3843_v45, %v1388_v23  ;;  %v1052_v45 = vsub.f32 %v3808_v47, %v3877_v54 }
 0x605   :  { %1408 = vadd.xlane.f32.xlu1 %v1407_v32 }
 0x606   :  { %v3916_v33 = vpop.eup %3100  ;;  %v1400_v61 = vmul.f32 1.442695, %v1394_v62  ;;  %v1056_v26 = vmul.f32 1.442695, %v1052_v45 }
 0x607   :  { %v1180_v5 = vsel %vm319_vm2, %v3916_v33, 0.0 }
 0x608   :  { %1181 = vadd.xlane.f32.xlu2 %v1180_v5 }
 0x60c   :  { %v1048_v21 = vpop.xlane.xlu0 %1047 }
 0x60d   :  { %v1054_v47 = vsub.f32 %v3849_v20, %v1048_v21 }
 0x60f   :  { %v1060_v27 = vmul.f32 1.442695, %v1054_v47 }
 0x614   :  { %v1277_v0 = vpop.xlane.xlu0 %1276 }
 0x615   :  { %v1281_v44 = vsub.f32 %v3858_v16, %v1277_v0  ;;  %v1161_v41 = vpop.xlane.xlu1 %1160  ;;  %v1053_v16 = vsub.f32 %v3829_v55, %v1045_v15 }
 0x616   :  { %v1165_v2 = vsub.f32 %v3860_v38, %v1161_v41 }
 0x617   :  { %v1288_v3 = vmul.f32 1.442695, %v1281_v44 }
 0x618   :  { %v1172_v48 = vmul.f32 1.442695, %v1165_v2 }
 0x619   :  { %3102 = vpow2.f32 %v1288_v3 }
 0x61a   :  { %3104 = vpow2.f32 %v1172_v48 }
 0x61b   :  { %3106 = vpow2.f32 %v1400_v61 }
 0x61c   :  { %v1391_v28 = vpop.xlane.xlu0 %1390 }
 0x61d   :  { %v1395_v53 = vsub.f32 %v3866_v56, %v1391_v28 }
 0x61e   :  { %1426 = vrot.lane.b32.xlu1 %v3760_v37, %s3282_s14  ;;  %v1058_v37 = vmul.f32 1.442695, %v1053_v16 }
 0x61f   :  { %v3926_v13 = vpop.eup %3102  ;;  %v1402_v46 = vmul.f32 1.442695, %v1395_v53 }
 0x620   :  { %v3929_v49 = vpop.eup %3104  ;;  %v1299_v38 = vsel %vm319_vm2, %v3926_v13, 0.0 }
 0x621   :  { %3108 = vpow2.f32 %v1402_v46  ;;  %1300 = vadd.xlane.f32.xlu2 %v1299_v38  ;;  %v1183_v56 = vsel %vm319_vm2, %v3929_v49, 0.0  ;;  %v3937_v57 = vpop.eup %3106 }
 0x622   :  { %1184 = vadd.xlane.f32.xlu0 %v1183_v56  ;;  %3110 = vpow2.f32 %v1058_v37  ;;  %v1410_v34 = vsel %vm319_vm2, %v3937_v57, 0.0 }
 0x623   :  { %3112 = vpow2.f32 %v1056_v26 }
 0x624   :  { %3114 = vpow2.f32 %v1060_v27 }
 0x625   :  { %3116 = vpow2.f32 %v1286_v18 }
 0x627   :  { %v3939_v55 = vpop.eup %3108 }
 0x628   :  { %v1413_v54 = vsel %vm319_vm2, %v3939_v55, 0.0  ;;  %v3946_v43 = vpop.eup %3110 }
 0x629   :  { %1414 = vadd.xlane.f32.xlu2 %v1413_v54  ;;  %v3948_v52 = vpop.eup %3112  ;;  %v1067_v20 = vsel %vm319_vm2, %v3946_v43, 0.0 }
 0x62a   :  { %1411 = vadd.xlane.f32.xlu0 %v1410_v34  ;;  %v1064_v12 = vsel %vm319_vm2, %v3948_v52, 0.0  ;;  %v3954_v50 = vpop.eup %3114 }
 0x62b   :  { %v1070_v11 = vsel %vm319_vm2, %v3954_v50, 0.0  ;;  %v3960_v14 = vpop.eup %3116 }
 0x62c   :  { %v1296_v25 = vsel %vm319_vm2, %v3960_v14, 0.0 }
 0x62d   :  { %v1315_v4 = vpop.permute.xlu1 %1314 }
 0x62e   :  { %1330 = vmatpush.bf16.msrb.mxu0 %v1315_v4 }
 0x62f   :  { %v1199_v19 = vpop.permute.xlu0 %1198 }
 0x630   :  { %1217 = vmatpush.bf16.msrb.mxu3 %v1199_v19 }
 0x631   :  { %1068 = vadd.xlane.f32.xlu2 %v1067_v20 }
 0x632   :  { %1065 = vadd.xlane.f32.xlu0 %v1064_v12 }
 0x635   :  { %v1313_v59 = vpop.permute.xlu1 %1312 }
 0x636   :  { %1331 = vmatpush.bf16.msrb.mxu0 %v1313_v59 }
 0x63a   :  { %1071 = vadd.xlane.f32.xlu0 %v1070_v11 }
 0x648   :  { %1297 = vadd.xlane.f32.xlu1 %v1296_v25 }
 0x65a   :  { %v1292_v22 = vpop.xlane.xlu0 %1291 }
 0x65c   :  { %v1179_v6 = vpop.xlane.xlu2 %1178 }
 0x660   :  { %v1051_v15 = vpop.xlane.xlu1 %1050 }
 0x661   :  { %v1055_v1 = vsub.f32 %v3891_v51, %v1051_v15  ;;  %v3990_v15 = vpop.f32.mrf.mxu0 }
 0x662   :  { %v1406_v62 = vpop.xlane.xlu0 %1405 }
 0x663   :  { %v1062_v17 = vmul.f32 1.442695, %v1055_v1 }
 0x665   :  { %3118 = vpow2.f32 %v1062_v17 }
 0x666   :  { %3120 = vrcp.f32 %v1179_v6 }
 0x668   :  { %v1176_v9 = vpop.xlane.xlu1 %1175 }
 0x669   :  { %3122 = vrcp.f32 %v1176_v9  ;;  %v3992_v1 = vpop.f32.mrf.mxu0 }
 0x66a   :  { %3124 = vrcp.f32 %v1292_v22 }
 0x66b   :  { %v3965_v40 = vpop.eup %3118 }
 0x66c   :  { %v1073_v7 = vsel %vm319_vm2, %v3965_v40, 0.0  ;;  %v3121_v10 = vpop.eup %3120 }
 0x66d   :  { %1074 = vadd.xlane.f32.xlu2 %v1073_v7  ;;  %v1191_v23 = vmul.f32 %v3121_v10, %v3887_v35 }
 0x66f   :  { %v3123_v8 = vpop.eup %3122 }
 0x670   :  { %v1190_v51 = vmul.f32 %v3123_v8, %v3900_v63  ;;  %v1295_v32 = vpop.xlane.xlu1 %1294  ;;  %v3125_v21 = vpop.eup %3124 }
 0x671   :  { %3126 = vrcp.f32 %v1295_v32  ;;  %v1306_v44 = vmul.f32 %v3125_v21, %v3882_v60  ;;  %v3994_v9 = vpop.f32.mrf.mxu0 }
 0x672   :  { %v1194_v5 = vpack.c.bf16 %v1191_v23, %v1190_v51 }
 0x674   :  { %2854 = vmatmul.msk.bf16.vlgmr.msrb.gmra.mxu3 %vm319_vm2, %v1194_v5 }
 0x677   :  { %v3127_v0 = vpop.eup %3126 }
 0x678   :  { %v1307_v41 = vmul.f32 %v3127_v0, %v3907_v42  ;;  %v1409_v3 = vpop.xlane.xlu1 %1408  ;;  %v1589_v0 = vld [vmem:[%s4021_s30 + $0xf0] sm:$0xff] }
 0x679   :  { %3128 = vrcp.f32 %v1409_v3  ;;  %v4009_v7 = vpop.f32.mrf.mxu0  ;;  %1610 = vmatpush.msrb.mxu2 %v1589_v0  ;;  %v1588_v3 = vld [vmem:[%s4021_s30 + $0xe8] sm:$0xff] }
 0x67a   :  { %v1310_v2 = vpack.c.bf16 %v1307_v41, %v1306_v44  ;;  %3130 = vrcp.f32 %v1406_v62  ;;  %v1590_v44 = vld [vmem:[%s4021_s30 + $0xf8] sm:$0xff]  ;;  %v1587_v41 = vld [vmem:[%s4021_s30 + $0xe0] sm:$0xff]  ;;  %v1585_v62 = vld [vmem:[%s4021_s30 + $0xd0] sm:$0xff] }
 0x67b   :  { %v1182_v63 = vpop.xlane.xlu2 %1181  ;;  %1639 = vmatpush.msra.mxu3 %v1590_v44  ;;  %1611 = vmatpush.msrb.mxu2 %v1587_v41 }
 0x67c   :  { %2856 = vmatmul.msk.bf16.vlgmr.msrb.gmra.mxu0 %vm319_vm2, %v1310_v2  ;;  %3132 = vrcp.f32 %v1182_v63  ;;  %v1583_v63 = vld [vmem:[%s4021_s30 + $0xc0] sm:$0xff] }
 0x67d   :  { %1640 = vmatpush.msra.mxu3 %v1588_v3  ;;  %1612 = vmatpush.msrb.mxu2 %v1585_v62 }
 0x67f   :  { %v3129_v35 = vpop.eup %3128  ;;  %1613 = vmatpush.msrb.mxu2 %v1583_v63 }
 0x680   :  { %v3131_v48 = vpop.eup %3130  ;;  %v1421_v61 = vmul.f32 %v3129_v35, %v3912_v58  ;;  %v1586_v35 = vld [vmem:[%s4021_s30 + $0xd8] sm:$0xff] }
 0x681   :  { %v1420_v28 = vmul.f32 %v3131_v48, %v3893_v24  ;;  %v1584_v48 = vld [vmem:[%s4021_s30 + $0xc8] sm:$0xff]  ;;  %1641 = vmatpush.msra.mxu3 %v1586_v35 }
 0x682   :  { %v3133_v46 = vpop.eup %3132 }
 0x683   :  { %v1424_v16 = vpack.c.bf16 %v1421_v61, %v1420_v28  ;;  %v1192_v37 = vmul.f32 %v3133_v46, %v3916_v33  ;;  %1642 = vmatpush.msra.mxu3 %v1584_v48  ;;  %v1581_v28 = vld [vmem:[%s4021_s30 + $0xb0] sm:$0xff] }
 0x684   :  { %1614 = vmatpush.msrb.mxu2 %v1581_v28  ;;  %v1577_v46 = vld [vmem:[%s4021_s30 + $0x90] sm:$0xff]  ;;  %v1606_v28 = vld [vmem:[%s4081_s4 + $0x78] sm:$0xff] }
 0x685   :  { %1668 = vmatpush.msra.mxu0 %v1606_v28 }
 0x690   :  { %v1427_v53 = vpop.permute.xlu1 %1426 }
 0x691   :  { %1445 = vmatpush.bf16.msrb.mxu1 %v1427_v53  ;;  %v1582_v53 = vld [vmem:[%s4021_s30 + $0xb8] sm:$0xff] }
 0x692   :  { %1643 = vmatpush.msra.mxu3 %v1582_v53  ;;  %v1605_v53 = vld [vmem:[%s4081_s4 + $0x70] sm:$0xff] }
 0x693   :  { %1669 = vmatpush.msra.mxu0 %v1605_v53 }
 0x694   :  { %v1301_v60 = vpop.xlane.xlu2 %1300  ;;  %2858 = vmatmul.msk.bf16.vlgmr.msrb.gmra.mxu1 %vm319_vm2, %v1424_v16 }
 0x695   :  { %v1185_v42 = vpop.xlane.xlu0 %1184 }
 0x696   :  { %3134 = vrcp.f32 %v1185_v42  ;;  %v1580_v42 = vld [vmem:[%s4021_s30 + $0xa8] sm:$0xff] }
 0x697   :  { %1644 = vmatpush.msra.mxu3 %v1580_v42 }
 0x69c   :  { %v3135_v45 = vpop.eup %3134  ;;  %v1415_v38 = vpop.xlane.xlu2 %1414 }
 0x69d   :  { %3136 = vrcp.f32 %v1415_v38  ;;  %v1412_v56 = vpop.xlane.xlu0 %1411  ;;  %v1193_v58 = vmul.f32 %v3135_v45, %v3929_v49  ;;  %v1578_v45 = vld [vmem:[%s4021_s30 + $0x98] sm:$0xff]  ;;  %v1575_v38 = vld [vmem:[%s4021_s30 + $0x80] sm:$0xff] }
 0x69e   :  { %3138 = vrcp.f32 %v1412_v56  ;;  %1645 = vmatpush.msra.mxu3 %v1578_v45  ;;  %v1576_v56 = vld [vmem:[%s4021_s30 + $0x88] sm:$0xff] }
 0x69f   :  { %v1195_v24 = vpack.c.bf16 %v1193_v58, %v1192_v37  ;;  %v1573_v37 = vld [vmem:[%s4021_s30 + $0x70] sm:$0xff]  ;;  %v1574_v58 = vld [vmem:[%s4021_s30 + $0x78] sm:$0xff]  ;;  %v1604_v45 = vld [vmem:[%s4081_s4 + $0x68] sm:$0xff] }
 0x6a0   :  { %1646 = vmatpush.msra.mxu3 %v1576_v56  ;;  %1670 = vmatpush.msra.mxu0 %v1604_v45 }
 0x6a1   :  { %2855 = vmatmul.msk.bf16.gmra.mxu3 %vm319_vm2, %v1195_v24  ;;  %v1571_v24 = vld [vmem:[%s4021_s30 + $0x60] sm:$0xff] }
 0x6a2   :  { %1647 = vmatpush.msra.mxu3 %v1574_v58  ;;  %v1603_v58 = vld [vmem:[%s4081_s4 + $0x60] sm:$0xff] }
 0x6a3   :  { %v3137_v26 = vpop.eup %3136  ;;  %1671 = vmatpush.msra.mxu0 %v1603_v58 }
 0x6a4   :  { %v3139_v47 = vpop.eup %3138  ;;  %v1069_v54 = vpop.xlane.xlu2 %1068  ;;  %v1423_v34 = vmul.f32 %v3137_v26, %v3939_v55  ;;  %v1572_v26 = vld [vmem:[%s4021_s30 + $0x68] sm:$0xff] }
 0x6a5   :  { %3140 = vrcp.f32 %v1069_v54  ;;  %v1066_v27 = vpop.xlane.xlu0 %1065  ;;  %v1422_v4 = vmul.f32 %v3139_v47, %v3937_v57  ;;  %v1569_v47 = vld [vmem:[%s4021_s30 + $0x50] sm:$0xff]  ;;  %v1570_v54 = vld [vmem:[%s4021_s30 + $0x58] sm:$0xff]  ;;  %1648 = vmatpush.msra.mxu3 %v1572_v26 }
 0x6a6   :  { %3142 = vrcp.f32 %v1066_v27  ;;  %v1568_v27 = vld [vmem:[%s4021_s30 + $0x48] sm:$0xff] }
 0x6a7   :  { %v1425_v19 = vpack.c.bf16 %v1423_v34, %v1422_v4  ;;  %3144 = vrcp.f32 %v1301_v60  ;;  %v1579_v60 = vld [vmem:[%s4021_s30 + $0xa0] sm:$0xff]  ;;  %1649 = vmatpush.msra.mxu3 %v1570_v54  ;;  %v1565_v4 = vld [vmem:[%s4021_s30 + $0x30] sm:$0xff] }
 0x6a8   :  { %1615 = vmatpush.msrb.mxu2 %v1579_v60  ;;  %v1567_v34 = vld [vmem:[%s4021_s30 + $0x40] sm:$0xff] }
 0x6a9   :  { %2859 = vmatmul.msk.bf16.gmra.mxu1 %vm319_vm2, %v1425_v19  ;;  %v1566_v19 = vld [vmem:[%s4021_s30 + $0x38] sm:$0xff]  ;;  %1650 = vmatpush.msra.mxu3 %v1568_v27  ;;  %v1601_v27 = vld [vmem:[%s4081_s4 + $0x50] sm:$0xff] }
 0x6aa   :  { %1616 = vmatpush.msrb.mxu2 %v1577_v46 }
 0x6ab   :  { %v3141_v33 = vpop.eup %3140  ;;  %1651 = vmatpush.msra.mxu3 %v1566_v19 }
 0x6ac   :  { %v3143_v20 = vpop.eup %3142  ;;  %v1081_v49 = vmul.f32 %v3141_v33, %v3946_v43  ;;  %1617 = vmatpush.msrb.mxu2 %v1575_v38  ;;  %v1563_v33 = vld [vmem:[%s4021_s30 + $0x20] sm:$0xff] }
 0x6ad   :  { %v1080_v12 = vmul.f32 %v3143_v20, %v3948_v52  ;;  %v3145_v55 = vpop.eup %3144  ;;  %v1072_v43 = vpop.xlane.xlu0 %1071  ;;  %v1564_v20 = vld [vmem:[%s4021_s30 + $0x28] sm:$0xff] }
 0x6ae   :  { %v1309_v18 = vmul.f32 %v3145_v55, %v3926_v13  ;;  %1618 = vmatpush.msrb.mxu2 %v1573_v37  ;;  %1652 = vmatpush.msra.mxu3 %v1564_v20 }
 0x6af   :  { %v1084_v59 = vpack.c.bf16 %v1081_v49, %v1080_v12  ;;  %v1561_v49 = vld [vmem:[%s4021_s30 + $0x10] sm:$0xff]  ;;  %v1562_v12 = vld [vmem:[%s4021_s30 + $0x18] sm:$0xff] }
 0x6b0   :  { %1619 = vmatpush.msrb.mxu2 %v1571_v24  ;;  %1653 = vmatpush.msra.mxu3 %v1562_v12 }
 0x6b1   :  { %2852 = vmatmul.msk.bf16.vlgmr.msra.gmra.mxu2 %vm319_vm2, %v1084_v59  ;;  %v1559_v59 = vld [vmem:[%s4021_s30] sm:$0xff] }
 0x6b2   :  { %1620 = vmatpush.msrb.mxu2 %v1569_v47  ;;  %v1602_v47 = vld [vmem:[%s4081_s4 + $0x58] sm:$0xff] }
 0x6b3   :  { %1672 = vmatpush.msra.mxu0 %v1602_v47 }
 0x6b4   :  { %1621 = vmatpush.msrb.mxu2 %v1567_v34 }
 0x6b5   :  { %1673 = vmatpush.msra.mxu0 %v1601_v27 }
 0x6b6   :  { %1622 = vmatpush.msrb.mxu2 %v1565_v4 }
 0x6b8   :  { %1623 = vmatpush.msrb.mxu2 %v1563_v33 }
 0x6ba   :  { %1624 = vmatpush.msrb.mxu2 %v1561_v49  ;;  %v1600_v49 = vld [vmem:[%s4081_s4 + $0x48] sm:$0xff] }
 0x6bb   :  { %v1298_v39 = vpop.xlane.xlu1 %1297  ;;  %1674 = vmatpush.msra.mxu0 %v1600_v49 }
 0x6bc   :  { %3146 = vrcp.f32 %v1298_v39  ;;  %v1560_v39 = vld [vmem:[%s4021_s30 + $0x8] sm:$0xff]  ;;  %1625 = vmatpush.msrb.mxu2 %v1559_v59  ;;  %s3306_s30 = smov 21  }
 0x6bd   :  { %3148 = vrcp.f32 %v1072_v43  ;;  %1654 = vmatpush.msra.mxu3 %v1560_v39  ;;  %v4062_v43 = vld [vmem:[%s4001_s20] ss:$0 sm:$0xff]  ;;  %s4473_s3 = sld [smem:[%s4545_s0 + %s3306_s30]]   ;;  %s3311_s20 = smov 26  }
 0x6c2   :  { %v3147_v11 = vpop.eup %3146 }
 0x6c3   :  { %v1308_v57 = vmul.f32 %v3147_v11, %v3960_v14  ;;  %v3149_v17 = vpop.eup %3148 }
 0x6c4   :  { %v1082_v22 = vmul.f32 %v3149_v17, %v3954_v50 }
 0x6c5   :  { %v1311_v25 = vpack.c.bf16 %v1309_v18, %v1308_v57 }
 0x6c7   :  { %2857 = vmatmul.msk.bf16.gmra.mxu0 %vm319_vm2, %v1311_v25 }
 0x6e0   :  { %v1075_v52 = vpop.xlane.xlu2 %1074 }
 0x6e1   :  { %3150 = vrcp.f32 %v1075_v52 }
 0x6e7   :  { %v3151_v6 = vpop.eup %3150 }
 0x6e8   :  { %v1083_v14 = vmul.f32 %v3151_v6, %v3965_v40 }
 0x6ea   :  { %v1085_v13 = vpack.c.bf16 %v1083_v14, %v1082_v22  ;;  %v4068_v22 = vld [vmem:[%s4007_s26] ss:$0 sm:$0xff]  ;;  %s3305_s26 = smov 20  }
 0x6eb   :  { %s2822_s29 = sld [smem:[%s4545_s0 + %s3305_s26]]  }
 0x6ec   :  { %2853 = vmatmul.msk.bf16.gmra.mxu2 %vm319_vm2, %v1085_v13 }
 0x6f7   :  { %v1219_v50 = vpop.f32.mrf.mxu3 }
 0x6f8   :  { %1461 = vrot.lane.b32.xlu0 %v1219_v50, %s3282_s14 }
 0x6f9   :  { %v1333_v40 = vpop.f32.mrf.mxu0 }
 0x6fa   :  { %1477 = vrot.lane.b32.xlu1 %v1333_v40, %s3290_s24 }
 0x6ff   :  { %v1221_v10 = vpop.f32.mrf.mxu3 }
 0x700   :  { %1463 = vrot.lane.b32.xlu0 %v1221_v10, %s3282_s14 }
 0x701   :  { %v1335_v23 = vpop.f32.mrf.mxu0 }
 0x711   :  { %v1447_v8 = vpop.f32.mrf.mxu1 }
 0x712   :  { %1493 = vrot.lane.b32.xlu2 %v1447_v8, %s3283_s15 }
 0x719   :  { %v1449_v51 = vpop.f32.mrf.mxu1 }
 0x71a   :  { %1479 = vrot.lane.b32.xlu2 %v1335_v23, %s3290_s24  ;;  %1495 = vrot.lane.b32.xlu1 %v1449_v51, %s3283_s15 }
 0x724   :  { %v1224_v32 = vpop.f32.mrf.mxu3 }
 0x725   :  { %1465 = vrot.lane.b32.xlu0 %v1224_v32, %s3282_s14 }
 0x726   :  { %v1452_v5 = vpop.f32.mrf.mxu1 }
 0x727   :  { %1497 = vrot.lane.b32.xlu1 %v1452_v5, %s3283_s15 }
 0x72c   :  { %v1226_v21 = vpop.f32.mrf.mxu3 }
 0x72d   :  { %1467 = vrot.lane.b32.xlu0 %v1226_v21, %s3282_s14 }
 0x72e   :  { %v1454_v2 = vpop.f32.mrf.mxu1 }
 0x72f   :  { %1499 = vrot.lane.b32.xlu1 %v1454_v2, %s3283_s15 }
 0x734   :  { %v1103_v55 = vpop.f32.mrf.mxu2 }
 0x73c   :  { %v1105_v32 = vpop.f32.mrf.mxu2 }
 0x744   :  { %v1338_v61 = vpop.f32.mrf.mxu0 }
 0x745   :  { %1481 = vrot.lane.b32.xlu2 %v1338_v61, %s3290_s24 }
 0x74c   :  { %v1340_v16 = vpop.f32.mrf.mxu0 }
 0x74d   :  { %1483 = vrot.lane.b32.xlu2 %v1340_v16, %s3290_s24 }
 0x76a   :  { %v1462_v11 = vpop.permute.xlu0 %1461 }
 0x76b   :  { %v1505_v57 = vsel %vm319_vm2, %v1103_v55, %v1462_v11  ;;  %v1599_v55 = vld [vmem:[%s4081_s4 + $0x40] sm:$0xff] }
 0x76c   :  { %v1494_v18 = vpop.permute.xlu2 %1493  ;;  %v1478_v25 = vpop.permute.xlu1 %1477  ;;  %1675 = vmatpush.msra.mxu0 %v1599_v55 }
 0x76d   :  { %v1509_v52 = vsel %vm789_vm0, %v1505_v57, %v1478_v25  ;;  %v1598_v57 = vld [vmem:[%s4081_s4 + $0x38] sm:$0xff]  ;;  %v1597_v25 = vld [vmem:[%s4081_s4 + $0x30] sm:$0xff] }
 0x76e   :  { %v1513_v17 = vsel %vm794_vm4, %v1509_v52, %v1494_v18  ;;  %1676 = vmatpush.msra.mxu0 %v1598_v57  ;;  %v4173_v57 = vld [vmem:[%s3410_s23 + $0x8] sm:$0xff] }
 0x76f   :  { %v1517_v6 = vadd.f32 %v1513_v17, %v3990_v15  ;;  %v1108_v48 = vpop.f32.mrf.mxu2  ;;  %v1596_v17 = vld [vmem:[%s4081_s4 + $0x28] sm:$0xff] }
 0x770   :  { %1677 = vmatpush.msra.mxu0 %v1597_v25 }
 0x771   :  { %v1524_v14 = vmul.f32 %v4062_v43, %v1517_v6 }
 0x772   :  { %v1464_v51 = vpop.permute.xlu0 %1463  ;;  %1678 = vmatpush.msra.mxu0 %v1596_v17 }
 0x773   :  { %v1531_v13 = vadd.f32 %v4068_v22, %v1524_v14  ;;  %v1506_v5 = vsel %vm319_vm2, %v1105_v32, %v1464_v51  ;;  %v1595_v14 = vld [vmem:[%s4081_s4 + $0x20] sm:$0xff] }
 0x774   :  { %v1480_v15 = vpop.permute.xlu2 %1479  ;;  %1679 = vmatpush.msra.mxu0 %v1595_v14  ;;  %v1591_v51 = vld [vmem:[%s4081_s4] sm:$0xff] }
 0x775   :  { %v1539_v50 = vmin.f32 %v1531_v13, 0.0  ;;  %vm1535_vm12 = vcmp.gt.f32.partialorder %v1531_v13, 0.0  ;;  %v1510_v21 = vsel %vm789_vm0, %v1506_v5, %v1480_v15 }
 0x777   :  { %v1543_v40 = vmul.f32 1.442695, %v1539_v50  ;;  %v1110_v54 = vpop.f32.mrf.mxu2 }
 0x779   :  { %3152 = vpow2.f32 %v1543_v40  ;;  %v1592_v40 = vld [vmem:[%s4081_s4 + $0x8] sm:$0xff] }
 0x77f   :  { %v3153_v10 = vpop.eup %3152 }
 0x780   :  { %v2860_v8 = vadd.f32 -1.0, %v3153_v10 }
 0x782   :  { %v1555_v23 = vsel %vm1535_vm12, %v1531_v13, %v2860_v8 }
 0x783   :  { %1626 = vmatmul.f32.vlgmr.msrb.gmra.mxu2 %v1555_v23  ;;  %1655 = vmatmul.f32.vlgmr.msra.gmra.mxu3 %v1555_v23 }
 0x78c   :  { %v1496_v0 = vpop.permute.xlu1 %1495 }
 0x78d   :  { %v1514_v44 = vsel %vm794_vm4, %v1510_v21, %v1496_v0 }
 0x78e   :  { %v1518_v41 = vadd.f32 %v1514_v44, %v3992_v1 }
 0x790   :  { %v1525_v2 = vmul.f32 %v4062_v43, %v1518_v41  ;;  %v1607_v41 = vld [vmem:[%s2817_s8] sm:$0xf]  ;;  %s2831_s8 = sld [smem:[%s4545_s0 + %s3315_s6]]  }
 0x792   :  { %v1532_v3 = vadd.f32 %v4068_v22, %v1525_v2 }
 0x794   :  { %v1540_v62 = vmin.f32 %v1532_v3, 0.0  ;;  %vm1536_vm13 = vcmp.gt.f32.partialorder %v1532_v3, 0.0 }
 0x796   :  { %v1545_v35 = vmul.f32 1.442695, %v1540_v62 }
 0x797   :  { %v1466_v63 = vpop.permute.xlu0 %1465 }
 0x798   :  { %3154 = vpow2.f32 %v1545_v35  ;;  %v1507_v16 = vsel %vm319_vm2, %v1108_v48, %v1466_v63 }
 0x799   :  { %v1498_v1 = vpop.permute.xlu1 %1497 }
 0x79e   :  { %v3155_v61 = vpop.eup %3154 }
 0x79f   :  { %v1482_v60 = vpop.permute.xlu2 %1481  ;;  %v2861_v42 = vadd.f32 -1.0, %v3155_v61  ;;  %v1468_v24 = vpop.permute.xlu0 %1467 }
 0x7a0   :  { %v1511_v46 = vsel %vm789_vm0, %v1507_v16, %v1482_v60  ;;  %v1508_v4 = vsel %vm319_vm2, %v1110_v54, %v1468_v24 }
 0x7a1   :  { %v1515_v38 = vsel %vm794_vm4, %v1511_v46, %v1498_v1  ;;  %v1556_v56 = vsel %vm1536_vm13, %v1532_v3, %v2861_v42 }
 0x7a2   :  { %v1519_v37 = vadd.f32 %v1515_v38, %v3994_v9  ;;  %1629 = vmatmul.f32.gmra.mxu2 %v1556_v56  ;;  %1658 = vmatmul.f32.gmra.mxu3 %v1556_v56  ;;  %v1500_v9 = vpop.permute.xlu1 %1499 }
 0x7a4   :  { %v1526_v26 = vmul.f32 %v4062_v43, %v1519_v37 }
 0x7a6   :  { %v1533_v34 = vadd.f32 %v4068_v22, %v1526_v26 }
 0x7a7   :  { %v1484_v19 = vpop.permute.xlu2 %1483 }
 0x7a8   :  { %v1512_v33 = vsel %vm789_vm0, %v1508_v4, %v1484_v19  ;;  %v1541_v20 = vmin.f32 %v1533_v34, 0.0  ;;  %vm1537_vm14 = vcmp.gt.f32.partialorder %v1533_v34, 0.0 }
 0x7a9   :  { %v1516_v12 = vsel %vm794_vm4, %v1512_v33, %v1500_v9 }
 0x7aa   :  { %v1520_v59 = vadd.f32 %v1516_v12, %v4009_v7  ;;  %v1547_v39 = vmul.f32 1.442695, %v1541_v20 }
 0x7ac   :  { %3156 = vpow2.f32 %v1547_v39  ;;  %v1527_v11 = vmul.f32 %v4062_v43, %v1520_v59  ;;  %v1594_v43 = vld [vmem:[%s4081_s4 + $0x18] sm:$0xff] }
 0x7ad   :  { %1680 = vmatpush.msra.mxu0 %v1594_v43 }
 0x7ae   :  { %v1534_v18 = vadd.f32 %v4068_v22, %v1527_v11  ;;  %v1593_v22 = vld [vmem:[%s4081_s4 + $0x10] sm:$0xff]  ;;  %s3307_s4 = smov 22  }
 0x7af   :  { %1681 = vmatpush.msra.mxu0 %v1593_v22  ;;  %s4480_s7 = sld [smem:[%s4545_s0 + %s3307_s4]]  }
 0x7b0   :  { %v1542_v52 = vmin.f32 %v1534_v18, 0.0  ;;  %vm1538_vm15 = vcmp.gt.f32.partialorder %v1534_v18, 0.0 }
 0x7b1   :  { %1682 = vmatpush.msra.mxu0 %v1592_v40 }
 0x7b2   :  { %v3157_v7 = vpop.eup %3156  ;;  %v1549_v6 = vmul.f32 1.442695, %v1542_v52 }
 0x7b3   :  { %v2862_v13 = vadd.f32 -1.0, %v3157_v7  ;;  %1683 = vmatpush.msra.mxu0 %v1591_v51 }
 0x7b4   :  { %3158 = vpow2.f32 %v1549_v6 }
 0x7b5   :  { %v1557_v50 = vsel %vm1537_vm14, %v1533_v34, %v2862_v13 }
 0x7b6   :  { %1632 = vmatmul.f32.gmra.mxu2 %v1557_v50  ;;  %1661 = vmatmul.f32.gmra.mxu3 %v1557_v50 }
 0x7ba   :  { %v3159_v10 = vpop.eup %3158 }
 0x7bb   :  { %v2863_v8 = vadd.f32 -1.0, %v3159_v10 }
 0x7bd   :  { %v1558_v23 = vsel %vm1538_vm15, %v1534_v18, %v2863_v8 }
 0x7be   :  { %1635 = vmatmul.f32.gmra.mxu2 %v1558_v23  ;;  %1664 = vmatmul.f32.gmra.mxu3 %v1558_v23 }
 0x806   :  { %v1627_v32 = vpop.f32.mrf.mxu2 }
 0x807   :  { %1684 = vmatmul.f32.vlgmr.msra.gmra.mxu0 %v1627_v32 }
 0x825   :  { %v1630_v5 = vpop.f32.mrf.mxu2 }
 0x826   :  { %v4111_v15 = vpack.c.bf16 %v1630_v5, %v1627_v32  ;;  %1687 = vmatmul.f32.gmra.mxu0 %v1630_v5 }
 0x828   :  { %1916 = vrot.lane.b32.xlu2 %v4111_v15, %s3283_s15 }
 0x839   :  { %v1633_v21 = vpop.f32.mrf.mxu2 }
 0x83a   :  { %1690 = vmatmul.f32.gmra.mxu0 %v1633_v21 }
 0x841   :  { %v1636_v0 = vpop.f32.mrf.mxu2 }
 0x842   :  { %v4115_v44 = vpack.c.bf16 %v1636_v0, %v1633_v21  ;;  %1693 = vmatmul.f32.gmra.mxu0 %v1636_v0  ;;  %1709 = vmatpush.xpose.msra.mxu1 %v1636_v0 }
 0x844   :  { %2032 = vrot.lane.b32.xlu0 %v4115_v44, %s3290_s24  ;;  %1918 = vrot.lane.b32.xlu2 %v4115_v44, %s3283_s15 }
 0x846   :  { %1710 = vmatpush.xpose.msra.mxu1 %v1633_v21 }
 0x84a   :  { %1711 = vmatpush.xpose.msra.mxu1 %v1630_v5 }
 0x84e   :  { %1712 = vmatpush.xpose.msra.mxu1 %v1627_v32 }
 0x851   :  { %1713 = vmatmul.f32.vlgmr.msra.gmra.mxu1 %v1607_v41 }
 0x852   :  { %1818 = vmatpush.bf16.msrb.mxu1 %v4115_v44 }
 0x856   :  { %1819 = vmatpush.bf16.msrb.mxu1 %v4111_v15 }
 0x882   :  { %v1917_v3 = vpop.permute.xlu2 %1916 }
 0x884   :  { %v1685_v2 = vpop.f32.mrf.mxu0 }
 0x885   :  { %1948 = vperm.xlu1 %2989, %v1685_v2   ;;  %1832 = vperm.xlu0 %2988, %v1685_v2  }
 0x88d   :  { %2990 = vset.pattern.permute.xlu1 %v3285_v29  ;;  %2994 = vset.pattern.permute.xlu0 %v3285_v29 }
 0x88e   :  { %2062 = vperm.xlu1 %2990, %v1685_v2  }
 0x896   :  { %2991 = vset.pattern.permute.xlu1 %v3286_v30 }
 0x897   :  { %1719 = vperm.xlu1 %2991, %v1685_v2  }
 0x89e   :  { %v1919_v62 = vpop.permute.xlu2 %1918 }
 0x89f   :  { %1934 = vmatpush.bf16.msra.mxu2 %v1919_v62 }
 0x8a3   :  { %v1688_v35 = vpop.f32.mrf.mxu0  ;;  %1935 = vmatpush.bf16.msra.mxu2 %v1917_v3 }
 0x8a4   :  { %2066 = vperm.xlu0 %2994, %v1688_v35   ;;  %1836 = vperm.xlu2 %2992, %v1688_v35  }
 0x8ac   :  { %2995 = vset.pattern.permute.xlu0 %v3286_v30  ;;  %2993 = vset.pattern.permute.xlu2 %v3288_v36 }
 0x8ad   :  { %1724 = vperm.xlu0 %2995, %v1688_v35   ;;  %1952 = vperm.xlu2 %2993, %v1688_v35   ;;  %v4200_v35 = vld [vmem:[%s3410_s23 + $0x10] sm:$0xff] }
 0x8b5   :  { %2998 = vset.pattern.permute.xlu0 %v3285_v29  ;;  %2996 = vset.pattern.permute.xlu2 %v3287_v31 }
 0x8b6   :  { %v2033_v63 = vpop.permute.xlu0 %2032 }
 0x8b7   :  { %v1691_v48 = vpop.f32.mrf.mxu0  ;;  %2048 = vmatpush.bf16.msrb.mxu3 %v2033_v63 }
 0x8b8   :  { %1729 = vperm.xlu1 %2991, %v1691_v48   ;;  %2070 = vperm.xlu0 %2998, %v1691_v48  }
 0x8b9   :  { %1840 = vperm.xlu2 %2996, %v1691_v48  }
 0x8bf   :  { %v1694_v61 = vpop.f32.mrf.mxu0 }
 0x8c0   :  { %2999 = vset.pattern.permute.xlu1 %v3287_v31  ;;  %3002 = vset.pattern.permute.xlu0 %v3286_v30 }
 0x8c1   :  { %2997 = vset.pattern.permute.xlu2 %v3288_v36  ;;  %1734 = vperm.xlu0 %3002, %v1694_v61  }
 0x8c2   :  { %1956 = vperm.xlu2 %2997, %v1691_v48   ;;  %1844 = vperm.xlu1 %2999, %v1694_v61  }
 0x8ca   :  { %3001 = vset.pattern.permute.xlu2 %v3285_v29  ;;  %3000 = vset.pattern.permute.xlu1 %v3288_v36 }
 0x8cb   :  { %2074 = vperm.xlu2 %3001, %v1694_v61   ;;  %1960 = vperm.xlu1 %3000, %v1694_v61  }
 0x8ce   :  { %v1714_v1 = vpop.f32.mrf.mxu1 }
 0x8cf   :  { %v4140_v31 = vperm.slane %v1714_v1, 1  ;;  %v4142_v28 = vperm.slane %v1714_v1, 2  ;;  %v4146_v38 = vperm.slane %v1714_v1, 3  ;;  %v4166_v20 = vperm.slane %v1714_v1, 0 }
 0x8d3   :  { %3003 = vset.pattern.permute.xlu2 %v3286_v30  ;;  %3004 = vset.pattern.permute.xlu1 %v3286_v30  ;;  %v4149_v30 = vld [vmem:[%s3410_s23] sm:$0xff] }
 0x8f7   :  { %v1833_v53 = vpop.permute.xlu0 %1832  ;;  %v1949_v16 = vpop.permute.xlu1 %1948 }
 0x8f8   :  { %v1848_v60 = vadd.f32 %v4140_v31, %v1833_v53  ;;  %v1964_v29 = vadd.f32 %v4142_v28, %v1949_v16 }
 0x8fa   :  { %vm1852_vm1 = vcmp.gt.f32.partialorder %v1848_v60, 0.0  ;;  %v1856_v36 = vmul.f32 0.2, %v1848_v60  ;;  %vm1968_vm3 = vcmp.gt.f32.partialorder %v1964_v29, 0.0  ;;  %v1972_v42 = vmul.f32 0.2, %v1964_v29 }
 0x8fc   :  { %v1860_v46 = vsel %vm1852_vm1, %v1848_v60, %v1856_v36  ;;  %v1976_v45 = vsel %vm1968_vm3, %v1964_v29, %v1972_v42 }
 0x8fd   :  { %v4152_v56 = vadd.f32 %v4149_v30, %v1860_v46  ;;  %v4155_v37 = vadd.f32 %v4149_v30, %v1976_v45 }
 0x8fe   :  { %v1837_v58 = vpop.permute.xlu2 %1836 }
 0x8ff   :  { %v1868_v24 = vsel %vm319_vm2, %v4152_v56, -inf  ;;  %v1984_v26 = vsel %vm319_vm2, %v4155_v37, -inf  ;;  %v1849_v54 = vadd.f32 %v4140_v31, %v1837_v58 }
 0x900   :  { %1869 = vmax.xlane.f32.xlu2 %v1868_v24  ;;  %1985 = vmax.xlane.f32.xlu0 %v1984_v26  ;;  %v2063_v47 = vpop.permute.xlu1 %2062 }
 0x901   :  { %v2078_v34 = vadd.f32 %v4146_v38, %v2063_v47  ;;  %v1857_v4 = vmul.f32 0.2, %v1849_v54  ;;  %vm1853_vm6 = vcmp.gt.f32.partialorder %v1849_v54, 0.0 }
 0x903   :  { %vm2082_vm5 = vcmp.gt.f32.partialorder %v2078_v34, 0.0  ;;  %v2086_v27 = vmul.f32 0.2, %v2078_v34  ;;  %v1861_v59 = vsel %vm1853_vm6, %v1849_v54, %v1857_v4 }
 0x904   :  { %v4176_v18 = vadd.f32 %v4173_v57, %v1861_v59 }
 0x905   :  { %v2090_v19 = vsel %vm2082_vm5, %v2078_v34, %v2086_v27 }
 0x906   :  { %v4164_v9 = vadd.f32 %v4149_v30, %v2090_v19  ;;  %v1871_v7 = vsel %vm319_vm2, %v4176_v18, -inf }
 0x907   :  { %v1953_v33 = vpop.permute.xlu2 %1952 }
 0x908   :  { %v2098_v49 = vsel %vm319_vm2, %v4164_v9, -inf  ;;  %v1965_v39 = vadd.f32 %v4142_v28, %v1953_v33 }
 0x909   :  { %2099 = vmax.xlane.f32.xlu1 %v2098_v49  ;;  %v1720_v12 = vpop.permute.xlu1 %1719 }
 0x90a   :  { %v1738_v55 = vadd.f32 %v4166_v20, %v1720_v12  ;;  %v1973_v25 = vmul.f32 0.2, %v1965_v39  ;;  %vm1969_vm8 = vcmp.gt.f32.partialorder %v1965_v39, 0.0 }
 0x90c   :  { %vm1742_vm7 = vcmp.gt.f32.partialorder %v1738_v55, 0.0  ;;  %v1746_v11 = vmul.f32 0.2, %v1738_v55  ;;  %v1977_v14 = vsel %vm1969_vm8, %v1965_v39, %v1973_v25  ;;  %v4231_v39 = vld [vmem:[%s3410_s23 + $0x18] sm:$0xff]  ;;  %s3301_s23 = smov 16  }
 0x90d   :  { %v4186_v43 = vadd.f32 %v4173_v57, %v1977_v14  ;;  %s4379_s11 = sld [smem:[%s4545_s0 + %s3301_s23]]  }
 0x90e   :  { %v1750_v52 = vsel %vm1742_vm7, %v1738_v55, %v1746_v11 }
 0x90f   :  { %v4179_v17 = vadd.f32 %v4149_v30, %v1750_v52  ;;  %v1987_v10 = vsel %vm319_vm2, %v4186_v43, -inf }
 0x911   :  { %1872 = vmax.xlane.f32.xlu1 %v1871_v7  ;;  %v1758_v6 = vsel %vm319_vm2, %v4179_v17, -inf }
 0x912   :  { %1759 = vmax.xlane.f32.xlu2 %v1758_v6 }
 0x913   :  { %v1841_v13 = vpop.permute.xlu2 %1840 }
 0x914   :  { %v1850_v41 = vadd.f32 %v4140_v31, %v1841_v13 }
 0x916   :  { %v2067_v50 = vpop.permute.xlu0 %2066  ;;  %v1858_v1 = vmul.f32 0.2, %v1850_v41  ;;  %vm1854_vm12 = vcmp.gt.f32.partialorder %v1850_v41, 0.0 }
 0x917   :  { %v2079_v22 = vadd.f32 %v4146_v38, %v2067_v50 }
 0x918   :  { %v1862_v60 = vsel %vm1854_vm12, %v1850_v41, %v1858_v1 }
 0x919   :  { %vm2083_vm9 = vcmp.gt.f32.partialorder %v2079_v22, 0.0  ;;  %v2087_v40 = vmul.f32 0.2, %v2079_v22  ;;  %v4215_v45 = vadd.f32 %v4200_v35, %v1862_v60 }
 0x91a   :  { %1988 = vmax.xlane.f32.xlu2 %v1987_v10 }
 0x91b   :  { %v2091_v8 = vsel %vm2083_vm9, %v2079_v22, %v2087_v40  ;;  %v1874_v27 = vsel %vm319_vm2, %v4215_v45, -inf }
 0x91c   :  { %v1957_v23 = vpop.permute.xlu2 %1956  ;;  %v4193_v32 = vadd.f32 %v4173_v57, %v2091_v8 }
 0x91d   :  { %v1966_v51 = vadd.f32 %v4142_v28, %v1957_v23 }
 0x91e   :  { %v2101_v2 = vsel %vm319_vm2, %v4193_v32, -inf }
 0x91f   :  { %vm1970_vm10 = vcmp.gt.f32.partialorder %v1966_v51, 0.0  ;;  %v1974_v5 = vmul.f32 0.2, %v1966_v51  ;;  %v1725_v21 = vpop.permute.xlu0 %1724 }
 0x920   :  { %v1739_v0 = vadd.f32 %v4166_v20, %v1725_v21 }
 0x921   :  { %v1978_v3 = vsel %vm1970_vm10, %v1966_v51, %v1974_v5 }
 0x922   :  { %vm1743_vm11 = vcmp.gt.f32.partialorder %v1739_v0, 0.0  ;;  %v1747_v62 = vmul.f32 0.2, %v1739_v0  ;;  %2102 = vmax.xlane.f32.xlu2 %v2101_v2  ;;  %v4203_v63 = vadd.f32 %v4200_v35, %v1978_v3 }
 0x924   :  { %v1990_v48 = vsel %vm319_vm2, %v4203_v63, -inf  ;;  %v1751_v61 = vsel %vm1743_vm11, %v1739_v0, %v1747_v62 }
 0x925   :  { %1991 = vmax.xlane.f32.xlu0 %v1990_v48  ;;  %v4208_v53 = vadd.f32 %v4173_v57, %v1751_v61  ;;  %v2075_v11 = vpop.permute.xlu2 %2074 }
 0x926   :  { %v2081_v7 = vadd.f32 %v4146_v38, %v2075_v11 }
 0x927   :  { %v1761_v16 = vsel %vm319_vm2, %v4208_v53, -inf }
 0x928   :  { %v2089_v14 = vmul.f32 0.2, %v2081_v7  ;;  %vm2085_vm3 = vcmp.gt.f32.partialorder %v2081_v7, 0.0 }
 0x92a   :  { %v2071_v29 = vpop.permute.xlu0 %2070  ;;  %1762 = vmax.xlane.f32.xlu2 %v1761_v16  ;;  %v1730_v36 = vpop.permute.xlu1 %1729  ;;  %v2093_v40 = vsel %vm2085_vm3, %v2081_v7, %v2089_v14 }
 0x92b   :  { %v2080_v42 = vadd.f32 %v4146_v38, %v2071_v29  ;;  %v1740_v46 = vadd.f32 %v4166_v20, %v1730_v36  ;;  %v4246_v10 = vadd.f32 %v4231_v39, %v2093_v40 }
 0x92d   :  { %vm2084_vm13 = vcmp.gt.f32.partialorder %v2080_v42, 0.0  ;;  %v2088_v58 = vmul.f32 0.2, %v2080_v42  ;;  %vm1744_vm14 = vcmp.gt.f32.partialorder %v1740_v46, 0.0  ;;  %v1748_v24 = vmul.f32 0.2, %v1740_v46 }
 0x92f   :  { %v2092_v26 = vsel %vm2084_vm13, %v2080_v42, %v2088_v58  ;;  %v1752_v47 = vsel %vm1744_vm14, %v1740_v46, %v1748_v24 }
 0x930   :  { %v4218_v54 = vadd.f32 %v4200_v35, %v2092_v26  ;;  %v4221_v34 = vadd.f32 %v4200_v35, %v1752_v47 }
 0x932   :  { %1875 = vmax.xlane.f32.xlu2 %v1874_v27  ;;  %v2104_v4 = vsel %vm319_vm2, %v4218_v54, -inf  ;;  %v1764_v19 = vsel %vm319_vm2, %v4221_v34, -inf }
 0x933   :  { %2105 = vmax.xlane.f32.xlu1 %v2104_v4  ;;  %1765 = vmax.xlane.f32.xlu0 %v1764_v19  ;;  %v1735_v38 = vpop.permute.xlu0 %1734 }
 0x934   :  { %v1845_v33 = vpop.permute.xlu1 %1844  ;;  %v1741_v8 = vadd.f32 %v4166_v20, %v1735_v38 }
 0x935   :  { %v1851_v49 = vadd.f32 %v4140_v31, %v1845_v33 }
 0x936   :  { %v1749_v23 = vmul.f32 0.2, %v1741_v8  ;;  %vm1745_vm5 = vcmp.gt.f32.partialorder %v1741_v8, 0.0 }
 0x937   :  { %vm1855_vm15 = vcmp.gt.f32.partialorder %v1851_v49, 0.0  ;;  %v1859_v12 = vmul.f32 0.2, %v1851_v49 }
 0x938   :  { %v1753_v51 = vsel %vm1745_vm5, %v1741_v8, %v1749_v23 }
 0x939   :  { %v1863_v59 = vsel %vm1855_vm15, %v1851_v49, %v1859_v12  ;;  %v4256_v5 = vadd.f32 %v4231_v39, %v1753_v51 }
 0x93a   :  { %v4234_v55 = vadd.f32 %v4231_v39, %v1863_v59 }
 0x93b   :  { %v1767_v41 = vsel %vm319_vm2, %v4256_v5, -inf }
 0x93c   :  { %v1877_v25 = vsel %vm319_vm2, %v4234_v55, -inf }
 0x93d   :  { %1878 = vmax.xlane.f32.xlu2 %v1877_v25  ;;  %v1961_v52 = vpop.permute.xlu1 %1960 }
 0x93e   :  { %v1967_v6 = vadd.f32 %v4142_v28, %v1961_v52  ;;  %v2107_v28 = vsel %vm319_vm2, %v4246_v10, -inf }
 0x940   :  { %vm1971_vm1 = vcmp.gt.f32.partialorder %v1967_v6, 0.0  ;;  %v1975_v31 = vmul.f32 0.2, %v1967_v6 }
 0x942   :  { %v1979_v13 = vsel %vm1971_vm1, %v1967_v6, %v1975_v31  ;;  %vm2653_vm1 = vcmask 64512  }
 0x943   :  { %v4241_v50 = vadd.f32 %v4231_v39, %v1979_v13 }
 0x945   :  { %v1993_v22 = vsel %vm319_vm2, %v4241_v50, -inf }
 0x946   :  { %1994 = vmax.xlane.f32.xlu2 %v1993_v22 }
 0x94c   :  { %2030 = vrot.lane.b32.xlu1 %v4111_v15, %s3290_s24 }
 0x94e   :  { %2108 = vmax.xlane.f32.xlu2 %v2107_v28 }
 0x966   :  { %2146 = vrot.lane.b32.xlu2 %v4115_v44, %s3282_s14 }
 0x973   :  { %v1986_v21 = vpop.xlane.xlu0 %1985  ;;  %v1870_v3 = vpop.xlane.xlu2 %1869 }
 0x974   :  { %v1996_v0 = vsub.f32 %v4155_v37, %v1986_v21  ;;  %v1880_v62 = vsub.f32 %v4152_v56, %v1870_v3 }
 0x976   :  { %v2000_v2 = vmul.f32 1.442695, %v1996_v0  ;;  %1768 = vmax.xlane.f32.xlu1 %v1767_v41  ;;  %v1884_v16 = vmul.f32 1.442695, %v1880_v62 }
 0x978   :  { %3160 = vpow2.f32 %v2000_v2 }
 0x97c   :  { %v2100_v20 = vpop.xlane.xlu1 %2099 }
 0x97d   :  { %v2110_v44 = vsub.f32 %v4164_v9, %v2100_v20 }
 0x97e   :  { %v4263_v48 = vpop.eup %3160 }
 0x97f   :  { %v2114_v61 = vmul.f32 1.442695, %v2110_v44  ;;  %v2008_v1 = vsel %vm319_vm2, %v4263_v48, 0.0 }
 0x980   :  { %2009 = vadd.xlane.f32.xlu0 %v2008_v1 }
 0x981   :  { %3162 = vpow2.f32 %v2114_v61 }
 0x982   :  { %3164 = vpow2.f32 %v1884_v16 }
 0x984   :  { %v1873_v37 = vpop.xlane.xlu1 %1872 }
 0x985   :  { %v1881_v60 = vsub.f32 %v4176_v18, %v1873_v37  ;;  %v1760_v29 = vpop.xlane.xlu2 %1759 }
 0x986   :  { %v1770_v23 = vsub.f32 %v4179_v17, %v1760_v29 }
 0x987   :  { %v4268_v36 = vpop.eup %3162  ;;  %v1886_v9 = vmul.f32 1.442695, %v1881_v60 }
 0x988   :  { %v2122_v56 = vsel %vm319_vm2, %v4268_v36, 0.0  ;;  %v4272_v42 = vpop.eup %3164  ;;  %v1774_v21 = vmul.f32 1.442695, %v1770_v23 }
 0x989   :  { %2123 = vadd.xlane.f32.xlu1 %v2122_v56  ;;  %3166 = vpow2.f32 %v1886_v9  ;;  %v1892_v24 = vsel %vm319_vm2, %v4272_v42, 0.0 }
 0x98d   :  { %v1989_v46 = vpop.xlane.xlu2 %1988 }
 0x98e   :  { %v1997_v58 = vsub.f32 %v4186_v43, %v1989_v46 }
 0x98f   :  { %1893 = vadd.xlane.f32.xlu2 %v1892_v24  ;;  %v4277_v18 = vpop.eup %3166 }
 0x990   :  { %v2002_v26 = vmul.f32 1.442695, %v1997_v58  ;;  %v1895_v4 = vsel %vm319_vm2, %v4277_v18, 0.0 }
 0x992   :  { %3168 = vpow2.f32 %v2002_v26 }
 0x995   :  { %v2103_v47 = vpop.xlane.xlu2 %2102 }
 0x996   :  { %v2111_v27 = vsub.f32 %v4193_v32, %v2103_v47 }
 0x997   :  { %1896 = vadd.xlane.f32.xlu2 %v1895_v4 }
 0x998   :  { %v4282_v19 = vpop.eup %3168  ;;  %v2116_v33 = vmul.f32 1.442695, %v2111_v27  ;;  %v1992_v49 = vpop.xlane.xlu0 %1991 }
 0x999   :  { %v1998_v43 = vsub.f32 %v4203_v63, %v1992_v49  ;;  %v2011_v12 = vsel %vm319_vm2, %v4282_v19, 0.0 }
 0x99a   :  { %3170 = vpow2.f32 %v2116_v33  ;;  %2012 = vadd.xlane.f32.xlu1 %v2011_v12 }
 0x99b   :  { %v2004_v59 = vmul.f32 1.442695, %v1998_v43 }
 0x99d   :  { %3172 = vpow2.f32 %v2004_v59  ;;  %v1763_v11 = vpop.xlane.xlu2 %1762 }
 0x9a0   :  { %v4287_v25 = vpop.eup %3170 }
 0x9a1   :  { %v2125_v32 = vsel %vm319_vm2, %v4287_v25, 0.0 }
 0x9a2   :  { %2126 = vadd.xlane.f32.xlu1 %v2125_v32 }
 0x9a3   :  { %v4291_v52 = vpop.eup %3172 }
 0x9a4   :  { %v2014_v7 = vsel %vm319_vm2, %v4291_v52, 0.0 }
 0x9a5   :  { %2015 = vadd.xlane.f32.xlu0 %v2014_v7  ;;  %v1876_v63 = vpop.xlane.xlu2 %1875 }
 0x9a6   :  { %v1882_v6 = vsub.f32 %v4215_v45, %v1876_v63  ;;  %v2106_v31 = vpop.xlane.xlu1 %2105  ;;  %v1766_v26 = vpop.xlane.xlu0 %1765 }
 0x9a7   :  { %v2112_v13 = vsub.f32 %v4218_v54, %v2106_v31  ;;  %v1772_v47 = vsub.f32 %v4221_v34, %v1766_v26 }
 0x9a8   :  { %v1888_v14 = vmul.f32 1.442695, %v1882_v6 }
 0x9a9   :  { %v2118_v22 = vmul.f32 1.442695, %v2112_v13  ;;  %v1778_v33 = vmul.f32 1.442695, %v1772_v47 }
 0x9aa   :  { %3174 = vpow2.f32 %v1888_v14 }
 0x9ab   :  { %3176 = vpow2.f32 %v2118_v22 }
 0x9b0   :  { %v4297_v40 = vpop.eup %3174  ;;  %v1879_v28 = vpop.xlane.xlu2 %1878 }
 0x9b1   :  { %v1883_v38 = vsub.f32 %v4234_v55, %v1879_v28  ;;  %v1898_v8 = vsel %vm319_vm2, %v4297_v40, 0.0  ;;  %v4303_v45 = vpop.eup %3176 }
 0x9b2   :  { %1899 = vadd.xlane.f32.xlu2 %v1898_v8  ;;  %v2128_v0 = vsel %vm319_vm2, %v4303_v45, 0.0 }
 0x9b3   :  { %v1890_v51 = vmul.f32 1.442695, %v1883_v38 }
 0x9b5   :  { %3178 = vpow2.f32 %v1890_v51 }
 0x9b6   :  { %3180 = vpow2.f32 %v1774_v21 }
 0x9b9   :  { %v1995_v54 = vpop.xlane.xlu2 %1994 }
 0x9ba   :  { %v1999_v41 = vsub.f32 %v4241_v50, %v1995_v54  ;;  %2129 = vadd.xlane.f32.xlu2 %v2128_v0  ;;  %v1771_v50 = vsub.f32 %v4208_v53, %v1763_v11 }
 0x9bb   :  { %v4308_v2 = vpop.eup %3178 }
 0x9bc   :  { %v2006_v55 = vmul.f32 1.442695, %v1999_v41  ;;  %v1901_v3 = vsel %vm319_vm2, %v4308_v2, 0.0  ;;  %v4312_v20 = vpop.eup %3180  ;;  %v1776_v60 = vmul.f32 1.442695, %v1771_v50 }
 0x9bd   :  { %1902 = vadd.xlane.f32.xlu1 %v1901_v3  ;;  %v1782_v16 = vsel %vm319_vm2, %v4312_v20, 0.0 }
 0x9be   :  { %3182 = vpow2.f32 %v2006_v55  ;;  %v2031_v17 = vpop.permute.xlu1 %2030 }
 0x9bf   :  { %2049 = vmatpush.bf16.msrb.mxu3 %v2031_v17 }
 0x9c1   :  { %v2109_v62 = vpop.xlane.xlu2 %2108 }
 0x9c2   :  { %v2113_v44 = vsub.f32 %v4246_v10, %v2109_v62 }
 0x9c4   :  { %v4315_v61 = vpop.eup %3182  ;;  %v2120_v1 = vmul.f32 1.442695, %v2113_v44 }
 0x9c5   :  { %1783 = vadd.xlane.f32.xlu1 %v1782_v16  ;;  %v2017_v37 = vsel %vm319_vm2, %v4315_v61, 0.0 }
 0x9c6   :  { %3184 = vpow2.f32 %v2120_v1  ;;  %2018 = vadd.xlane.f32.xlu0 %v2017_v37 }
 0x9c7   :  { %3186 = vpow2.f32 %v1776_v60 }
 0x9c9   :  { %v2147_v29 = vpop.permute.xlu2 %2146 }
 0x9ca   :  { %2162 = vmatpush.bf16.msrb.mxu0 %v2147_v29 }
 0x9cc   :  { %v4322_v56 = vpop.eup %3184 }
 0x9cd   :  { %v2131_v10 = vsel %vm319_vm2, %v4322_v56, 0.0  ;;  %v4326_v53 = vpop.eup %3186 }
 0x9ce   :  { %2132 = vadd.xlane.f32.xlu2 %v2131_v10  ;;  %v1785_v9 = vsel %vm319_vm2, %v4326_v53, 0.0 }
 0x9d6   :  { %1786 = vadd.xlane.f32.xlu2 %v1785_v9 }
 0x9da   :  { %2144 = vrot.lane.b32.xlu0 %v4111_v15, %s3282_s14 }
 0x9e9   :  { %v1769_v46 = vpop.xlane.xlu1 %1768 }
 0x9ea   :  { %v1773_v58 = vsub.f32 %v4256_v5, %v1769_v46 }
 0x9ec   :  { %v1780_v24 = vmul.f32 1.442695, %v1773_v58 }
 0x9ee   :  { %3188 = vpow2.f32 %v1780_v24 }
 0x9ef   :  { %3190 = vpow2.f32 %v1778_v33 }
 0x9f3   :  { %v2010_v12 = vpop.xlane.xlu0 %2009 }
 0x9f4   :  { %v4334_v27 = vpop.eup %3188 }
 0x9f5   :  { %v1791_v4 = vsel %vm319_vm2, %v4334_v27, 0.0  ;;  %v4338_v49 = vpop.eup %3190 }
 0x9f6   :  { %1792 = vadd.xlane.f32.xlu1 %v1791_v4  ;;  %v1788_v15 = vsel %vm319_vm2, %v4338_v49, 0.0 }
 0x9fc   :  { %v2124_v5 = vpop.xlane.xlu1 %2123 }
 0xa02   :  { %v1894_v43 = vpop.xlane.xlu2 %1893 }
 0xa03   :  { %3192 = vrcp.f32 %v1894_v43 }
 0xa04   :  { %1789 = vadd.xlane.f32.xlu0 %v1788_v15 }
 0xa09   :  { %v3193_v11 = vpop.eup %3192 }
 0xa0a   :  { %v1897_v59 = vpop.xlane.xlu2 %1896  ;;  %v1908_v63 = vmul.f32 %v3193_v11, %v4272_v42 }
 0xa0b   :  { %3194 = vrcp.f32 %v1897_v59 }
 0xa0c   :  { %3196 = vrcp.f32 %v2010_v12 }
 0xa0d   :  { %v2013_v34 = vpop.xlane.xlu1 %2012 }
 0xa0e   :  { %3198 = vrcp.f32 %v2013_v34 }
 0xa11   :  { %v3195_v32 = vpop.eup %3194 }
 0xa12   :  { %v3197_v7 = vpop.eup %3196  ;;  %v1909_v6 = vmul.f32 %v3195_v32, %v4277_v18 }
 0xa13   :  { %v2024_v13 = vmul.f32 %v3197_v7, %v4263_v48 }
 0xa14   :  { %v3199_v31 = vpop.eup %3198  ;;  %v1912_v14 = vpack.c.bf16 %v1909_v6, %v1908_v63 }
 0xa15   :  { %v2025_v22 = vmul.f32 %v3199_v31, %v4282_v19  ;;  %v2127_v38 = vpop.xlane.xlu1 %2126 }
 0xa16   :  { %2866 = vmatmul.msk.bf16.vlgmr.msra.gmra.mxu2 %vm319_vm2, %v1912_v14 }
 0xa17   :  { %v2028_v28 = vpack.c.bf16 %v2025_v22, %v2024_v13  ;;  %v2292_v22 = vld [vmem:[%s2820_s21 + $0x78] sm:$0xff] }
 0xa18   :  { %v2016_v51 = vpop.xlane.xlu0 %2015  ;;  %2300 = vmatpush.msra.mxu1 %v2292_v22 }
 0xa19   :  { %2868 = vmatmul.msk.bf16.vlgmr.msrb.gmra.mxu3 %vm319_vm2, %v2028_v28  ;;  %v2291_v28 = vld [vmem:[%s2820_s21 + $0x70] sm:$0xff] }
 0xa1a   :  { %2301 = vmatpush.msra.mxu1 %v2291_v28 }
 0xa25   :  { %v1900_v8 = vpop.xlane.xlu2 %1899 }
 0xa26   :  { %3200 = vrcp.f32 %v1900_v8  ;;  %v2289_v8 = vld [vmem:[%s2820_s21 + $0x60] sm:$0xff] }
 0xa2c   :  { %v3201_v42 = vpop.eup %3200 }
 0xa2d   :  { %v1910_v18 = vmul.f32 %v3201_v42, %v4297_v40  ;;  %v2130_v54 = vpop.xlane.xlu2 %2129  ;;  %v2286_v42 = vld [vmem:[%s2820_s21 + $0x48] sm:$0xff] }
 0xa30   :  { %v1903_v23 = vpop.xlane.xlu1 %1902 }
 0xa31   :  { %3202 = vrcp.f32 %v1903_v23  ;;  %v2288_v23 = vld [vmem:[%s2820_s21 + $0x58] sm:$0xff] }
 0xa32   :  { %3204 = vrcp.f32 %v2016_v51  ;;  %v2287_v51 = vld [vmem:[%s2820_s21 + $0x50] sm:$0xff] }
 0xa37   :  { %v3203_v21 = vpop.eup %3202 }
 0xa38   :  { %v1911_v48 = vmul.f32 %v3203_v21, %v4308_v2  ;;  %v3205_v41 = vpop.eup %3204  ;;  %v1784_v50 = vpop.xlane.xlu1 %1783  ;;  %v2285_v21 = vld [vmem:[%s2820_s21 + $0x40] sm:$0xff] }
 0xa39   :  { %v2019_v19 = vpop.xlane.xlu0 %2018  ;;  %v2026_v3 = vmul.f32 %v3205_v41, %v4291_v52  ;;  %v2279_v41 = vld [vmem:[%s2820_s21 + $0x10] sm:$0xff] }
 0xa3a   :  { %3206 = vrcp.f32 %v2019_v19  ;;  %v1913_v0 = vpack.c.bf16 %v1911_v48, %v1910_v18  ;;  %v2284_v18 = vld [vmem:[%s2820_s21 + $0x38] sm:$0xff]  ;;  %v2283_v48 = vld [vmem:[%s2820_s21 + $0x30] sm:$0xff]  ;;  %v2281_v19 = vld [vmem:[%s2820_s21 + $0x20] sm:$0xff] }
 0xa3b   :  { %3208 = vrcp.f32 %v2127_v38  ;;  %v2290_v38 = vld [vmem:[%s2820_s21 + $0x68] sm:$0xff] }
 0xa3c   :  { %2867 = vmatmul.msk.bf16.gmra.mxu2 %vm319_vm2, %v1913_v0  ;;  %3210 = vrcp.f32 %v2124_v5  ;;  %2302 = vmatpush.msra.mxu1 %v2290_v38  ;;  %v2280_v0 = vld [vmem:[%s2820_s21 + $0x18] sm:$0xff] }
 0xa3d   :  { %3212 = vrcp.f32 %v1784_v50 }
 0xa3e   :  { %2303 = vmatpush.msra.mxu1 %v2289_v8 }
 0xa40   :  { %v3207_v55 = vpop.eup %3206  ;;  %2304 = vmatpush.msra.mxu1 %v2288_v23 }
 0xa41   :  { %v2027_v17 = vmul.f32 %v3207_v55, %v4315_v61  ;;  %v2133_v62 = vpop.xlane.xlu2 %2132  ;;  %v3209_v40 = vpop.eup %3208  ;;  %v2278_v55 = vld [vmem:[%s2820_s21 + $0x8] sm:$0xff] }
 0xa42   :  { %v3211_v2 = vpop.eup %3210  ;;  %v2139_v16 = vmul.f32 %v3209_v40, %v4287_v25  ;;  %2305 = vmatpush.msra.mxu1 %v2287_v51 }
 0xa43   :  { %v2029_v44 = vpack.c.bf16 %v2027_v17, %v2026_v3  ;;  %v2138_v37 = vmul.f32 %v3211_v2, %v4268_v36  ;;  %v3213_v52 = vpop.eup %3212  ;;  %v2277_v3 = vld [vmem:[%s2820_s21] sm:$0xff] }
 0xa44   :  { %v1798_v10 = vmul.f32 %v3213_v52, %v4312_v20  ;;  %v4363_v20 = vpop.f32.mrf.mxu3  ;;  %2306 = vmatpush.msra.mxu1 %v2286_v42  ;;  %v3009_v2 = vld [vmem:[%s4379_s11] ss:$0 sm:$0xff] }
 0xa45   :  { %2869 = vmatmul.msk.bf16.gmra.mxu3 %vm319_vm2, %v2029_v44  ;;  %v2142_v29 = vpack.c.bf16 %v2139_v16, %v2138_v37 }
 0xa46   :  { %2307 = vmatpush.msra.mxu1 %v2285_v21 }
 0xa48   :  { %2308 = vmatpush.msra.mxu1 %v2284_v18 }
 0xa49   :  { %v1787_v1 = vpop.xlane.xlu2 %1786 }
 0xa4a   :  { %3214 = vrcp.f32 %v1787_v1  ;;  %2309 = vmatpush.msra.mxu1 %v2283_v48 }
 0xa4b   :  { %3216 = vrcp.f32 %v2133_v62 }
 0xa4c   :  { %v2145_v60 = vpop.permute.xlu0 %2144  ;;  %3218 = vrcp.f32 %v2130_v54  ;;  %v4367_v12 = vpop.f32.mrf.mxu3  ;;  %v2282_v54 = vld [vmem:[%s2820_s21 + $0x28] sm:$0xff] }
 0xa4d   :  { %2163 = vmatpush.bf16.msrb.mxu0 %v2145_v60  ;;  %2310 = vmatpush.msra.mxu1 %v2282_v54  ;;  %v3010_v60 = vld [vmem:[%s4384_s17] ss:$0 sm:$0xff] }
 0xa4f   :  { %2311 = vmatpush.msra.mxu1 %v2281_v19 }
 0xa50   :  { %v3215_v61 = vpop.eup %3214  ;;  %2870 = vmatmul.msk.bf16.vlgmr.msrb.gmra.mxu0 %vm319_vm2, %v2142_v29 }
 0xa51   :  { %v1799_v9 = vmul.f32 %v3215_v61, %v4326_v53  ;;  %v3217_v25 = vpop.eup %3216  ;;  %2312 = vmatpush.msra.mxu1 %v2280_v0 }
 0xa52   :  { %v3219_v58 = vpop.eup %3218  ;;  %v2141_v36 = vmul.f32 %v3217_v25, %v4322_v56 }
 0xa53   :  { %v1802_v46 = vpack.c.bf16 %v1799_v9, %v1798_v10  ;;  %v2140_v24 = vmul.f32 %v3219_v58, %v4303_v45  ;;  %2313 = vmatpush.msra.mxu1 %v2279_v41 }
 0xa54   :  { %v4370_v45 = vpop.f32.mrf.mxu3 }
 0xa55   :  { %2864 = vmatmul.msk.bf16.vlgmr.msrb.gmra.mxu1 %vm319_vm2, %v1802_v46  ;;  %v2143_v26 = vpack.c.bf16 %v2141_v36, %v2140_v24 }
 0xa56   :  { %2314 = vmatpush.msra.mxu1 %v2278_v55 }
 0xa58   :  { %2315 = vmatpush.msra.mxu1 %v2277_v3 }
 0xa5c   :  { %v4372_v56 = vpop.f32.mrf.mxu3 }
 0xa60   :  { %2871 = vmatmul.msk.bf16.gmra.mxu0 %vm319_vm2, %v2143_v26 }
 0xa69   :  { %v1793_v47 = vpop.xlane.xlu1 %1792 }
 0xa6a   :  { %3220 = vrcp.f32 %v1793_v47 }
 0xa70   :  { %v3221_v53 = vpop.eup %3220 }
 0xa71   :  { %v1801_v15 = vmul.f32 %v3221_v53, %v4334_v27 }
 0xa77   :  { %v1790_v4 = vpop.xlane.xlu0 %1789 }
 0xa78   :  { %3222 = vrcp.f32 %v1790_v4 }
 0xa7e   :  { %v3223_v33 = vpop.eup %3222 }
 0xa7f   :  { %v1800_v43 = vmul.f32 %v3223_v33, %v4338_v49 }
 0xa81   :  { %v1803_v5 = vpack.c.bf16 %v1801_v15, %v1800_v43 }
 0xa83   :  { %2865 = vmatmul.msk.bf16.gmra.mxu1 %vm319_vm2, %v1803_v5 }
 0xa99   :  { %v1937_v59 = vpop.f32.mrf.mxu2 }
 0xa9c   :  { %v2051_v34 = vpop.f32.mrf.mxu3 }
 0xa9d   :  { %2195 = vrot.lane.b32.xlu1 %v2051_v34, %s3290_s24 }
 0xaa1   :  { %v1939_v11 = vpop.f32.mrf.mxu2 }
 0xaa4   :  { %v2053_v49 = vpop.f32.mrf.mxu3 }
 0xaa5   :  { %2181 = vrot.lane.b32.xlu1 %v1939_v11, %s3282_s14 }
 0xabf   :  { %v1942_v27 = vpop.f32.mrf.mxu2 }
 0xac0   :  { %2183 = vrot.lane.b32.xlu1 %v1942_v27, %s3282_s14 }
 0xac7   :  { %v1944_v13 = vpop.f32.mrf.mxu2 }
 0xac8   :  { %v2056_v7 = vpop.f32.mrf.mxu3 }
 0xacd   :  { %v2165_v32 = vpop.f32.mrf.mxu0 }
 0xace   :  { %2211 = vrot.lane.b32.xlu2 %v2165_v32, %s3283_s15 }
 0xad0   :  { %v2058_v6 = vpop.f32.mrf.mxu3 }
 0xad2   :  { %v1821_v62 = vpop.f32.mrf.mxu1 }
 0xad5   :  { %v2167_v63 = vpop.f32.mrf.mxu0 }
 0xad6   :  { %2179 = vrot.lane.b32.xlu2 %v1937_v59, %s3282_s14  ;;  %2213 = vrot.lane.b32.xlu0 %v2167_v63, %s3283_s15 }
 0xada   :  { %v1823_v58 = vpop.f32.mrf.mxu1 }
 0xadd   :  { %v2170_v31 = vpop.f32.mrf.mxu0 }
 0xade   :  { %2197 = vrot.lane.b32.xlu2 %v2053_v49, %s3290_s24  ;;  %2201 = vrot.lane.b32.xlu0 %v2058_v6, %s3290_s24 }
 0xadf   :  { %2215 = vrot.lane.b32.xlu1 %v2170_v31, %s3283_s15 }
 0xae5   :  { %v2172_v14 = vpop.f32.mrf.mxu0 }
 0xae6   :  { %2199 = vrot.lane.b32.xlu2 %v2056_v7, %s3290_s24  ;;  %s4510_s24 = sld [smem:[%s4545_s0 + %s3311_s20]]  }
 0xae7   :  { %2217 = vrot.lane.b32.xlu1 %v2172_v14, %s3283_s15 }
 0xaee   :  { %2185 = vrot.lane.b32.xlu2 %v1944_v13, %s3282_s14  ;;  %s3304_s14 = smov 19  }
 0xaef   :  { %s4409_s25 = sld [smem:[%s4545_s0 + %s3304_s14]]  }
 0xaf5   :  { %v2296_v34 = vld [vmem:[%s4409_s25 + $0x18] sm:$0xff]  ;;  %v2295_v11 = vld [vmem:[%s4409_s25 + $0x10] sm:$0xff]  ;;  %v2294_v63 = vld [vmem:[%s4409_s25 + $0x8] sm:$0xff] }
 0xaf6   :  { %2353 = vmatpush.msra.mxu0 %v2296_v34  ;;  %2917 = vmatpush.msrb.mxu2 %v2296_v34 }
 0xaf8   :  { %2354 = vmatpush.msra.mxu0 %v2295_v11  ;;  %2918 = vmatpush.msrb.mxu2 %v2295_v11 }
 0xafa   :  { %2355 = vmatpush.msra.mxu0 %v2294_v63  ;;  %2919 = vmatpush.msrb.mxu2 %v2294_v63 }
 0xb00   :  { %v1826_v5 = vpop.f32.mrf.mxu1 }
 0xb08   :  { %v1828_v28 = vpop.f32.mrf.mxu1 }
 0xb0f   :  { %v2196_v50 = vpop.permute.xlu1 %2195 }
 0xb17   :  { %v2182_v9 = vpop.permute.xlu1 %2181 }
 0xb18   :  { %v2224_v24 = vsel %vm319_vm2, %v1823_v58, %v2182_v9 }
 0xb28   :  { %v2212_v17 = vpop.permute.xlu2 %2211 }
 0xb30   :  { %v2180_v44 = vpop.permute.xlu2 %2179 }
 0xb31   :  { %v2223_v40 = vsel %vm319_vm2, %v1821_v62, %v2180_v44 }
 0xb32   :  { %v2227_v1 = vsel %vm789_vm0, %v2223_v40, %v2196_v50 }
 0xb33   :  { %v2231_v16 = vsel %vm794_vm4, %v2227_v1, %v2212_v17  ;;  %v2293_v1 = vld [vmem:[%s4409_s25] sm:$0xff] }
 0xb34   :  { %v2235_v37 = vadd.f32 %v2231_v16, %v4363_v20  ;;  %v2184_v20 = vpop.permute.xlu1 %2183  ;;  %2356 = vmatpush.msra.mxu0 %v2293_v1  ;;  %2920 = vmatpush.msrb.mxu2 %v2293_v1 }
 0xb35   :  { %v2225_v27 = vsel %vm319_vm2, %v1826_v5, %v2184_v20 }
 0xb36   :  { %v2242_v52 = vmul.f32 %v3009_v2, %v2235_v37 }
 0xb38   :  { %v2249_v29 = vadd.f32 %v3010_v60, %v2242_v52  ;;  %v2198_v46 = vpop.permute.xlu2 %2197 }
 0xb39   :  { %v2228_v47 = vsel %vm789_vm0, %v2224_v24, %v2198_v46 }
 0xb3a   :  { %v2257_v61 = vmin.f32 %v2249_v29, 0.0  ;;  %vm2253_vm6 = vcmp.gt.f32.partialorder %v2249_v29, 0.0 }
 0xb3c   :  { %v2261_v10 = vmul.f32 1.442695, %v2257_v61  ;;  %v2297_v61 = vld [vmem:[%s2822_s29] sm:$0x1] }
 0xb3e   :  { %3224 = vpow2.f32 %v2261_v10 }
 0xb40   :  { %v2200_v43 = vpop.permute.xlu2 %2199 }
 0xb41   :  { %v2229_v32 = vsel %vm789_vm0, %v2225_v27, %v2200_v43 }
 0xb44   :  { %v3225_v25 = vpop.eup %3224 }
 0xb45   :  { %v2872_v36 = vadd.f32 -1.0, %v3225_v25 }
 0xb47   :  { %v2273_v26 = vsel %vm2253_vm6, %v2249_v29, %v2872_v36 }
 0xb48   :  { %v2214_v4 = vpop.permute.xlu0 %2213  ;;  %2316 = vmatmul.f32.vlgmr.msra.gmra.mxu1 %v2273_v26  ;;  %v2186_v14 = vpop.permute.xlu2 %2185 }
 0xb49   :  { %v2232_v53 = vsel %vm794_vm4, %v2228_v47, %v2214_v4  ;;  %v2226_v8 = vsel %vm319_vm2, %v1828_v28, %v2186_v14 }
 0xb4a   :  { %v2236_v33 = vadd.f32 %v2232_v53, %v4367_v12 }
 0xb4c   :  { %v2243_v15 = vmul.f32 %v3009_v2, %v2236_v33 }
 0xb4e   :  { %v2250_v59 = vadd.f32 %v3010_v60, %v2243_v15 }
 0xb50   :  { %v2258_v49 = vmin.f32 %v2250_v59, 0.0  ;;  %v2202_v22 = vpop.permute.xlu0 %2201  ;;  %vm2254_vm7 = vcmp.gt.f32.partialorder %v2250_v59, 0.0 }
 0xb51   :  { %v2216_v7 = vpop.permute.xlu1 %2215  ;;  %v2230_v23 = vsel %vm789_vm0, %v2226_v8, %v2202_v22 }
 0xb52   :  { %v2233_v6 = vsel %vm794_vm4, %v2229_v32, %v2216_v7  ;;  %v2263_v31 = vmul.f32 1.442695, %v2258_v49 }
 0xb53   :  { %v2237_v12 = vadd.f32 %v2233_v6, %v4370_v45 }
 0xb54   :  { %3226 = vpow2.f32 %v2263_v31 }
 0xb55   :  { %v2244_v13 = vmul.f32 %v3009_v2, %v2237_v12 }
 0xb57   :  { %v2251_v38 = vadd.f32 %v3010_v60, %v2244_v13 }
 0xb59   :  { %v2218_v51 = vpop.permute.xlu1 %2217  ;;  %v2259_v42 = vmin.f32 %v2251_v38, 0.0  ;;  %vm2255_vm0 = vcmp.gt.f32.partialorder %v2251_v38, 0.0 }
 0xb5a   :  { %v3227_v21 = vpop.eup %3226  ;;  %v2234_v18 = vsel %vm794_vm4, %v2230_v23, %v2218_v51 }
 0xb5b   :  { %v2238_v48 = vadd.f32 %v2234_v18, %v4372_v56  ;;  %v2873_v45 = vadd.f32 -1.0, %v3227_v21  ;;  %v2265_v54 = vmul.f32 1.442695, %v2259_v42 }
 0xb5d   :  { %v2245_v19 = vmul.f32 %v3009_v2, %v2238_v48  ;;  %v2274_v0 = vsel %vm2254_vm7, %v2250_v59, %v2873_v45  ;;  %3228 = vpow2.f32 %v2265_v54 }
 0xb5e   :  { %2319 = vmatmul.f32.gmra.mxu1 %v2274_v0 }
 0xb5f   :  { %v2252_v41 = vadd.f32 %v3010_v60, %v2245_v19 }
 0xb61   :  { %v2260_v55 = vmin.f32 %v2252_v41, 0.0  ;;  %vm2256_vm4 = vcmp.gt.f32.partialorder %v2252_v41, 0.0 }
 0xb63   :  { %v3229_v3 = vpop.eup %3228  ;;  %v2267_v17 = vmul.f32 1.442695, %v2260_v55 }
 0xb64   :  { %v2874_v62 = vadd.f32 -1.0, %v3229_v3 }
 0xb65   :  { %3230 = vpow2.f32 %v2267_v17 }
 0xb66   :  { %v2275_v44 = vsel %vm2255_vm0, %v2251_v38, %v2874_v62 }
 0xb67   :  { %2322 = vmatmul.f32.gmra.mxu1 %v2275_v44 }
 0xb6b   :  { %v3231_v50 = vpop.eup %3230 }
 0xb6c   :  { %v2875_v40 = vadd.f32 -1.0, %v3231_v50 }
 0xb6e   :  { %v2276_v56 = vsel %vm2256_vm4, %v2252_v41, %v2875_v40 }
 0xb6f   :  { %2325 = vmatmul.f32.gmra.mxu1 %v2276_v56 }
 0xbc5   :  { %v4426_v2 = vpop.f32.mrf.mxu1 }
 0xbc6   :  { %2876 = vmatmul.msk.f32.vlgmr.msra.gmra.mxu0 %vm319_vm2, %v4426_v2 }
 0xbdb   :  { %v4430_v16 = vpop.f32.mrf.mxu1 }
 0xbdc   :  { %2877 = vmatmul.msk.f32.vlgmr.msrb.gmra.mxu2 %vm319_vm2, %v4430_v16  ;;  %v2480_v29 = vpack.c.bf16 %v4430_v16, %v4426_v2 }
 0xbe4   :  { %v4434_v37 = vpop.f32.mrf.mxu1 }
 0xbe5   :  { %2878 = vmatmul.msk.f32.gmra.mxu2 %vm319_vm2, %v4434_v37 }
 0xbec   :  { %v4438_v60 = vpop.f32.mrf.mxu1 }
 0xbed   :  { %v2481_v52 = vpack.c.bf16 %v4438_v60, %v4434_v37  ;;  %2879 = vmatmul.msk.f32.gmra.mxu2 %vm319_vm2, %v4438_v60  ;;  %2880 = vmatpush.xpose.msk.msra.mxu3 %vm319_vm2, %v4438_v60 }
 0xbef   :  { %2506 = vmatpush.bf16.msrb.mxu0 %v2481_v52 }
 0xbf1   :  { %2881 = vmatpush.xpose.msk.msra.mxu3 %vm319_vm2, %v4434_v37 }
 0xbf3   :  { %2507 = vmatpush.bf16.msrb.mxu0 %v2480_v29 }
 0xbf5   :  { %2882 = vmatpush.xpose.msk.msra.mxu3 %vm319_vm2, %v4430_v16 }
 0xbf9   :  { %2883 = vmatpush.xpose.msk.msra.mxu3 %vm319_vm2, %v4426_v2 }
 0xbfc   :  { %2884 = vmatmul.msk.f32.vlgmr.msra.gmra.mxu3 %vm319_vm2, %v2297_v61 }
 0xc43   :  { %v2358_v10 = vpop.f32.mrf.mxu0 }
 0xc44   :  { %2395 = vperm.xlu2 %3003, %v2358_v10  }
 0xc5f   :  { %v2361_v9 = vpop.f32.mrf.mxu2 }
 0xc60   :  { %2400 = vperm.xlu0 %3002, %v2361_v9  }
 0xc68   :  { %v2364_v46 = vpop.f32.mrf.mxu2 }
 0xc69   :  { %2405 = vperm.xlu1 %3004, %v2364_v46  }
 0xc70   :  { %v2367_v25 = vpop.f32.mrf.mxu2 }
 0xc71   :  { %2410 = vperm.xlu2 %3003, %v2367_v25  }
 0xc7f   :  { %v2390_v58 = vpop.f32.mrf.mxu3 }
 0xc80   :  { %v2413_v36 = vperm.slane %v2390_v58, 0  ;;  %v3011_v58 = vld [vmem:[%s4473_s3] ss:$0 sm:$0xff] }
 0xc9e   :  { %v2396_v24 = vpop.permute.xlu2 %2395 }
 0xc9f   :  { %v2414_v26 = vadd.f32 %v2413_v36, %v2396_v24 }
 0xca1   :  { %vm2418_vm8 = vcmp.gt.f32.partialorder %v2414_v26, 0.0  ;;  %v2422_v47 = vmul.f32 0.2, %v2414_v26 }
 0xca3   :  { %v2426_v4 = vsel %vm2418_vm8, %v2414_v26, %v2422_v47  ;;  %v3012_v47 = vld [vmem:[%s4480_s7] ss:$0 sm:$0xff] }
 0xca4   :  { %v2430_v20 = vadd.f32 %v4149_v30, %v2426_v4 }
 0xca6   :  { %v2434_v53 = vsel %vm319_vm2, %v2430_v20, -inf }
 0xca7   :  { %2435 = vmax.xlane.f32.xlu0 %v2434_v53 }
 0xccb   :  { %v2411_v34 = vpop.permute.xlu2 %2410 }
 0xccc   :  { %v2417_v49 = vadd.f32 %v2413_v36, %v2411_v34 }
 0xcce   :  { %v2425_v30 = vmul.f32 0.2, %v2417_v49  ;;  %vm2421_vm11 = vcmp.gt.f32.partialorder %v2417_v49, 0.0 }
 0xcd0   :  { %v2429_v12 = vsel %vm2421_vm11, %v2417_v49, %v2425_v30 }
 0xcd2   :  { %v2401_v33 = vpop.permute.xlu0 %2400 }
 0xcd3   :  { %v2415_v43 = vadd.f32 %v2413_v36, %v2401_v33 }
 0xcd5   :  { %vm2419_vm9 = vcmp.gt.f32.partialorder %v2415_v43, 0.0  ;;  %v2423_v15 = vmul.f32 0.2, %v2415_v43 }
 0xcd7   :  { %v2427_v5 = vsel %vm2419_vm9, %v2415_v43, %v2423_v15 }
 0xcd8   :  { %v2431_v59 = vadd.f32 %v4173_v57, %v2427_v5  ;;  %v2433_v57 = vadd.f32 %v4231_v39, %v2429_v12 }
 0xcda   :  { %v2437_v11 = vsel %vm319_vm2, %v2431_v59, -inf  ;;  %v2443_v14 = vsel %vm319_vm2, %v2433_v57, -inf }
 0xcdb   :  { %v2406_v27 = vpop.permute.xlu1 %2405  ;;  %2438 = vmax.xlane.f32.xlu1 %v2437_v11 }
 0xcdc   :  { %v2416_v32 = vadd.f32 %v2413_v36, %v2406_v27 }
 0xcde   :  { %vm2420_vm10 = vcmp.gt.f32.partialorder %v2416_v32, 0.0  ;;  %v2424_v7 = vmul.f32 0.2, %v2416_v32 }
 0xce0   :  { %v2428_v63 = vsel %vm2420_vm10, %v2416_v32, %v2424_v7 }
 0xce1   :  { %v2432_v6 = vadd.f32 %v4200_v35, %v2428_v63 }
 0xce3   :  { %v2440_v31 = vsel %vm319_vm2, %v2432_v6, -inf }
 0xce4   :  { %2441 = vmax.xlane.f32.xlu2 %v2440_v31 }
 0xcec   :  { %2444 = vmax.xlane.f32.xlu2 %v2443_v14 }
 0xd1a   :  { %v2436_v13 = vpop.xlane.xlu0 %2435 }
 0xd1b   :  { %v2446_v22 = vsub.f32 %v2430_v20, %v2436_v13 }
 0xd1d   :  { %v2450_v28 = vmul.f32 1.442695, %v2446_v22 }
 0xd1f   :  { %3232 = vpow2.f32 %v2450_v28 }
 0xd25   :  { %v3233_v38 = vpop.eup %3232 }
 0xd26   :  { %v2458_v8 = vsel %vm319_vm2, %v3233_v38, 0.0 }
 0xd27   :  { %2459 = vadd.xlane.f32.xlu0 %v2458_v8 }
 0xd4e   :  { %v2439_v23 = vpop.xlane.xlu1 %2438 }
 0xd4f   :  { %v2447_v51 = vsub.f32 %v2431_v59, %v2439_v23 }
 0xd51   :  { %v2452_v35 = vmul.f32 1.442695, %v2447_v51 }
 0xd53   :  { %3234 = vpow2.f32 %v2452_v35 }
 0xd57   :  { %v2442_v42 = vpop.xlane.xlu2 %2441 }
 0xd58   :  { %v2448_v21 = vsub.f32 %v2432_v6, %v2442_v42 }
 0xd59   :  { %v3235_v18 = vpop.eup %3234 }
 0xd5a   :  { %v2454_v48 = vmul.f32 1.442695, %v2448_v21  ;;  %v2461_v39 = vsel %vm319_vm2, %v3235_v18, 0.0 }
 0xd5b   :  { %2462 = vadd.xlane.f32.xlu1 %v2461_v39 }
 0xd5c   :  { %3236 = vpow2.f32 %v2454_v48 }
 0xd5f   :  { %v2445_v45 = vpop.xlane.xlu2 %2444 }
 0xd60   :  { %v2449_v54 = vsub.f32 %v2433_v57, %v2445_v45 }
 0xd62   :  { %v3237_v19 = vpop.eup %3236  ;;  %v2456_v0 = vmul.f32 1.442695, %v2449_v54 }
 0xd63   :  { %v2464_v41 = vsel %vm319_vm2, %v3237_v19, 0.0 }
 0xd64   :  { %3238 = vpow2.f32 %v2456_v0  ;;  %2465 = vadd.xlane.f32.xlu2 %v2464_v41 }
 0xd6a   :  { %v3239_v55 = vpop.eup %3238 }
 0xd6b   :  { %v2467_v3 = vsel %vm319_vm2, %v3239_v55, 0.0 }
 0xd6c   :  { %2468 = vadd.xlane.f32.xlu0 %v2467_v3 }
 0xd74   :  { %2482 = vrot.lane.b32.xlu1 %v4426_v2, %s3283_s15 }
 0xd7c   :  { %2484 = vrot.lane.b32.xlu2 %v4430_v16, %s3283_s15  ;;  %2488 = vrot.lane.b32.xlu1 %v4438_v60, %s3283_s15 }
 0xd80   :  { %2486 = vrot.lane.b32.xlu0 %v4434_v37, %s3283_s15  ;;  %s3308_s15 = smov 23  }
 0xd81   :  { %s2825_s9 = sld [smem:[%s4545_s0 + %s3308_s15]]  }
 0xd87   :  { %v2560_v10 = vld [vmem:[%s2825_s9 + $0x18] sm:$0xff]  ;;  %v2559_v9 = vld [vmem:[%s2825_s9 + $0x10] sm:$0xff]  ;;  %v2558_v46 = vld [vmem:[%s2825_s9 + $0x8] sm:$0xff] }
 0xd88   :  { %2586 = vmatpush.msrb.mxu3 %v2560_v10  ;;  %v2557_v25 = vld [vmem:[%s2825_s9] sm:$0xff] }
 0xd8a   :  { %2587 = vmatpush.msrb.mxu3 %v2559_v9  ;;  %v2647_v9 = vld [vmem:[%s2829_s1 + $0x10] sm:$0xff] }
 0xd8c   :  { %2588 = vmatpush.msrb.mxu3 %v2558_v46  ;;  %v2646_v46 = vld [vmem:[%s2829_s1 + $0x8] sm:$0xff] }
 0xd8e   :  { %2589 = vmatpush.msrb.mxu3 %v2557_v25  ;;  %v2645_v25 = vld [vmem:[%s2829_s1] sm:$0xff] }
 0xd9a   :  { %v2460_v17 = vpop.xlane.xlu0 %2459 }
 0xd9b   :  { %3240 = vrcp.f32 %v2460_v17 }
 0xda1   :  { %v3241_v44 = vpop.eup %3240 }
 0xda2   :  { %v2474_v40 = vmul.f32 %v3241_v44, %v3233_v38  ;;  %v2913_v44 = vld [vmem:[%s2804_s19] sm:$0xff] }
 0xdce   :  { %v2463_v62 = vpop.xlane.xlu1 %2462 }
 0xdcf   :  { %3242 = vrcp.f32 %v2463_v62 }
 0xdd5   :  { %v3243_v50 = vpop.eup %3242 }
 0xdd6   :  { %v2475_v56 = vmul.f32 %v3243_v50, %v3235_v18  ;;  %v2914_v50 = vld [vmem:[%s2804_s19 + $0x8] sm:$0xff] }
 0xdd7   :  { %v2466_v2 = vpop.xlane.xlu2 %2465 }
 0xdd8   :  { %v2478_v1 = vpack.c.bf16 %v2475_v56, %v2474_v40  ;;  %3244 = vrcp.f32 %v2466_v2  ;;  %v2643_v40 = vld [vmem:[%s2827_s27] sm:$0xff]  ;;  %v2648_v56 = vld [vmem:[%s2829_s1 + $0x18] sm:$0xff] }
 0xdd9   :  { %2681 = vmatpush.msra.mxu2 %v2643_v40  ;;  %2726 = vmatpush.msra.mxu0 %v2648_v56 }
 0xdda   :  { %2885 = vmatmul.msk.bf16.vlgmr.msrb.gmra.mxu0 %vm319_vm2, %v2478_v1  ;;  %v3013_v1 = vld [vmem:[%s2826_s13] ss:$0 sm:$0xff] }
 0xddb   :  { %2727 = vmatpush.msra.mxu0 %v2647_v9 }
 0xddd   :  { %2728 = vmatpush.msra.mxu0 %v2646_v46 }
 0xdde   :  { %v3245_v52 = vpop.eup %3244 }
 0xddf   :  { %v2469_v16 = vpop.xlane.xlu0 %2468  ;;  %v2476_v29 = vmul.f32 %v3245_v52, %v3237_v19  ;;  %v2485_v33 = vpop.permute.xlu2 %2484  ;;  %2729 = vmatpush.msra.mxu0 %v2645_v25 }
 0xde0   :  { %3246 = vrcp.f32 %v2469_v16 }
 0xde6   :  { %v3247_v60 = vpop.eup %3246  ;;  %v2483_v36 = vpop.permute.xlu1 %2482 }
 0xde7   :  { %v2477_v37 = vmul.f32 %v3247_v60, %v3239_v55 }
 0xde9   :  { %v2479_v61 = vpack.c.bf16 %v2477_v37, %v2476_v29 }
 0xdeb   :  { %2886 = vmatmul.msk.bf16.gmra.mxu0 %vm319_vm2, %v2479_v61 }
 0xdee   :  { %v2489_v13 = vpop.permute.xlu1 %2488 }
 0xdf2   :  { %v2487_v49 = vpop.permute.xlu0 %2486 }
 0xe57   :  { %v2509_v24 = vpop.f32.mrf.mxu0 }
 0xe58   :  { %v2510_v26 = vadd.f32 %v2509_v24, %v2483_v36 }
 0xe5a   :  { %v2522_v4 = vmul.f32 %v3011_v58, %v2510_v26 }
 0xe5c   :  { %v2529_v20 = vadd.f32 %v3012_v47, %v2522_v4 }
 0xe5e   :  { %v2537_v53 = vmin.f32 %v2529_v20, 0.0  ;;  %vm2533_vm12 = vcmp.gt.f32.partialorder %v2529_v20, 0.0 }
 0xe5f   :  { %v2511_v43 = vpop.f32.mrf.mxu0 }
 0xe60   :  { %v2541_v15 = vmul.f32 1.442695, %v2537_v53  ;;  %v2512_v5 = vadd.f32 %v2511_v43, %v2485_v33 }
 0xe62   :  { %3248 = vpow2.f32 %v2541_v15  ;;  %v2523_v59 = vmul.f32 %v3011_v58, %v2512_v5 }
 0xe64   :  { %v2530_v34 = vadd.f32 %v3012_v47, %v2523_v59 }
 0xe66   :  { %v2538_v11 = vmin.f32 %v2530_v34, 0.0  ;;  %vm2534_vm13 = vcmp.gt.f32.partialorder %v2530_v34, 0.0 }
 0xe68   :  { %v3249_v27 = vpop.eup %3248  ;;  %v2543_v32 = vmul.f32 1.442695, %v2538_v11  ;;  %v2514_v7 = vpop.f32.mrf.mxu0 }
 0xe69   :  { %v2887_v30 = vadd.f32 -1.0, %v3249_v27  ;;  %v2515_v63 = vadd.f32 %v2514_v7, %v2487_v49 }
 0xe6a   :  { %3250 = vpow2.f32 %v2543_v32 }
 0xe6b   :  { %v2524_v6 = vmul.f32 %v3011_v58, %v2515_v63  ;;  %v2553_v31 = vsel %vm2533_vm12, %v2529_v20, %v2887_v30 }
 0xe6c   :  { %2891 = vmatmul.msk.f32.vlgmr.msrb.gmra.mxu3 %vm319_vm2, %v2553_v31 }
 0xe6d   :  { %v2531_v12 = vadd.f32 %v3012_v47, %v2524_v6 }
 0xe6f   :  { %v2539_v57 = vmin.f32 %v2531_v12, 0.0  ;;  %vm2535_vm14 = vcmp.gt.f32.partialorder %v2531_v12, 0.0 }
 0xe70   :  { %v3251_v14 = vpop.eup %3250  ;;  %v2516_v22 = vpop.f32.mrf.mxu0 }
 0xe71   :  { %v2545_v28 = vmul.f32 1.442695, %v2539_v57  ;;  %v2517_v38 = vadd.f32 %v2516_v22, %v2489_v13  ;;  %v2888_v8 = vadd.f32 -1.0, %v3251_v14 }
 0xe73   :  { %v2525_v23 = vmul.f32 %v3011_v58, %v2517_v38  ;;  %v2554_v51 = vsel %vm2534_vm13, %v2530_v34, %v2888_v8  ;;  %3252 = vpow2.f32 %v2545_v28  ;;  %v3014_v58 = vld [vmem:[%s4510_s24] ss:$0 sm:$0xff] }
 0xe74   :  { %2892 = vmatmul.msk.f32.gmra.mxu3 %vm319_vm2, %v2554_v51  ;;  %v3015_v34 = vld [vmem:[%s2830_s5] ss:$0 sm:$0xff] }
 0xe75   :  { %v2532_v35 = vadd.f32 %v3012_v47, %v2525_v23 }
 0xe77   :  { %v2540_v42 = vmin.f32 %v2532_v35, 0.0  ;;  %vm2536_vm15 = vcmp.gt.f32.partialorder %v2532_v35, 0.0 }
 0xe79   :  { %v3253_v21 = vpop.eup %3252  ;;  %v2547_v18 = vmul.f32 1.442695, %v2540_v42 }
 0xe7a   :  { %v2889_v48 = vadd.f32 -1.0, %v3253_v21 }
 0xe7b   :  { %3254 = vpow2.f32 %v2547_v18 }
 0xe7c   :  { %v2555_v39 = vsel %vm2535_vm14, %v2531_v12, %v2889_v48 }
 0xe7d   :  { %2893 = vmatmul.msk.f32.gmra.mxu3 %vm319_vm2, %v2555_v39 }
 0xe81   :  { %v3255_v45 = vpop.eup %3254 }
 0xe82   :  { %v2890_v54 = vadd.f32 -1.0, %v3255_v45 }
 0xe84   :  { %v2556_v19 = vsel %vm2536_vm15, %v2532_v35, %v2890_v54 }
 0xe85   :  { %2894 = vmatmul.msk.f32.gmra.mxu3 %vm319_vm2, %v2556_v19 }
 0xeef   :  { %v2591_v0 = vpop.f32.mrf.mxu3 }
 0xef7   :  { %v2594_v41 = vpop.f32.mrf.mxu3 }
 0xef8   :  { %v2603_v62 = vpack.c.bf16 %v2594_v41, %v2591_v0 }
 0xf00   :  { %v2597_v55 = vpop.f32.mrf.mxu3 }
 0xf08   :  { %v2600_v3 = vpop.f32.mrf.mxu3 }
 0xf09   :  { %v2604_v17 = vpack.c.bf16 %v2600_v3, %v2597_v55 }
 0xf0b   :  { %2630 = vmatpush.bf16.msrb.mxu1 %v2604_v17 }
 0xf0f   :  { %2631 = vmatpush.bf16.msrb.mxu1 %v2603_v62 }
 0xf12   :  { %2903 = vmatmul.msk.bf16.vlgmr.msrb.gmra.mxu1 %vm319_vm2, %v2913_v44 }
 0xf22   :  { %2904 = vmatmul.msk.bf16.gmra.mxu1 %vm319_vm2, %v2914_v50 }
 0xf8f   :  { %v2633_v2 = vpop.f32.mrf.mxu1 }
 0xf90   :  { %v2634_v16 = vadd.f32 %v3013_v1, %v2633_v2 }
 0xf92   :  { %2905 = vmatmul.msk.f32.vlgmr.msra.gmra.mxu2 %vm2653_vm1, %v2634_v16 }
 0xf97   :  { %v2635_v52 = vpop.f32.mrf.mxu1 }
 0xf98   :  { %v2636_v60 = vadd.f32 %v3013_v1, %v2635_v52 }
 0xf9a   :  { %2906 = vmatmul.msk.f32.gmra.mxu2 %vm2653_vm1, %v2636_v60 }
 0xf9f   :  { %v2638_v29 = vpop.f32.mrf.mxu1 }
 0xfa0   :  { %v2639_v37 = vadd.f32 %v3013_v1, %v2638_v29 }
 0xfa2   :  { %2907 = vmatmul.msk.f32.gmra.mxu2 %vm2653_vm1, %v2639_v37 }
 0xfa7   :  { %v2640_v61 = vpop.f32.mrf.mxu1 }
 0xfa8   :  { %v2641_v10 = vadd.f32 %v3013_v1, %v2640_v61 }
 0xfaa   :  { %2908 = vmatmul.msk.f32.gmra.mxu2 %vm2653_vm1, %v2641_v10 }
0x1015   :  { %v2683_v36 = vpop.f32.mrf.mxu2 }
0x1016   :  { %v2684_v24 = vadd.f32 %v3014_v58, %v2683_v36 }
0x1018   :  { %v2695_v26 = vmax.f32 %v2684_v24, 0.0 }
0x101a   :  { %2909 = vmatmul.msk.f32.vlgmr.msra.gmra.mxu0 %vm319_vm2, %v2695_v26 }
0x101d   :  { %v2686_v47 = vpop.f32.mrf.mxu2 }
0x101e   :  { %v2687_v4 = vadd.f32 %v3014_v58, %v2686_v47 }
0x1020   :  { %v2696_v20 = vmax.f32 %v2687_v4, 0.0 }
0x1022   :  { %2910 = vmatmul.msk.f32.gmra.mxu0 %vm319_vm2, %v2696_v20 }
0x1025   :  { %v2689_v53 = vpop.f32.mrf.mxu2 }
0x1026   :  { %v2690_v33 = vadd.f32 %v3014_v58, %v2689_v53 }
0x1028   :  { %v2697_v43 = vmax.f32 %v2690_v33, 0.0 }
0x102a   :  { %2911 = vmatmul.msk.f32.gmra.mxu0 %vm319_vm2, %v2697_v43 }
0x102d   :  { %v2692_v15 = vpop.f32.mrf.mxu2 }
0x102e   :  { %v2693_v5 = vadd.f32 %v3014_v58, %v2692_v15 }
0x1030   :  { %v2698_v59 = vmax.f32 %v2693_v5, 0.0 }
0x1032   :  { %2912 = vmatmul.msk.f32.gmra.mxu0 %vm319_vm2, %v2698_v59 }
0x1097   :  { %v2731_v11 = vpop.f32.mrf.mxu0 }
0x1098   :  { %v2732_v27 = vadd.f32 %v3015_v34, %v2731_v11 }
0x109a   :  { %v2743_v49 = vsel %vm2653_vm1, %v2732_v27, -inf }
0x109b   :  { %2744 = vmax.xlane.f32.xlu0 %v2743_v49 }
0x109f   :  { %v2734_v32 = vpop.f32.mrf.mxu0 }
0x10a0   :  { %v2735_v7 = vadd.f32 %v3015_v34, %v2734_v32 }
0x10a2   :  { %v2746_v30 = vsel %vm2653_vm1, %v2735_v7, -inf }
0x10a3   :  { %2747 = vmax.xlane.f32.xlu2 %v2746_v30 }
0x10a7   :  { %v2737_v63 = vpop.f32.mrf.mxu0 }
0x10a8   :  { %v2738_v6 = vadd.f32 %v3015_v34, %v2737_v63 }
0x10aa   :  { %v2749_v31 = vsel %vm2653_vm1, %v2738_v6, -inf }
0x10ab   :  { %2750 = vmax.xlane.f32.xlu1 %v2749_v31 }
0x10af   :  { %v2740_v12 = vpop.f32.mrf.mxu0 }
0x10b0   :  { %v2741_v57 = vadd.f32 %v3015_v34, %v2740_v12 }
0x10b2   :  { %v2752_v14 = vsel %vm2653_vm1, %v2741_v57, -inf }
0x10b3   :  { %2753 = vmax.xlane.f32.xlu0 %v2752_v14 }
0x110e   :  { %v2745_v13 = vpop.xlane.xlu0 %2744 }
0x110f   :  { %v2755_v22 = vsub.f32 %v2732_v27, %v2745_v13 }
0x1111   :  { %v2759_v28 = vmul.f32 1.442695, %v2755_v22 }
0x1113   :  { %3256 = vpow2.f32 %v2759_v28 }
0x1116   :  { %v2748_v38 = vpop.xlane.xlu2 %2747 }
0x1117   :  { %v2756_v8 = vsub.f32 %v2735_v7, %v2748_v38 }
0x1119   :  { %v3257_v23 = vpop.eup %3256  ;;  %v2761_v51 = vmul.f32 1.442695, %v2756_v8 }
0x111a   :  { %v2767_v35 = vsel %vm2653_vm1, %v3257_v23, 0.0 }
0x111b   :  { %3258 = vpow2.f32 %v2761_v51  ;;  %2768 = vadd.xlane.f32.xlu2 %v2767_v35 }
0x111e   :  { %v2751_v42 = vpop.xlane.xlu1 %2750 }
0x111f   :  { %v2757_v21 = vsub.f32 %v2738_v6, %v2751_v42 }
0x1121   :  { %v3259_v18 = vpop.eup %3258  ;;  %v2763_v48 = vmul.f32 1.442695, %v2757_v21 }
0x1122   :  { %v2770_v39 = vsel %vm2653_vm1, %v3259_v18, 0.0 }
0x1123   :  { %3260 = vpow2.f32 %v2763_v48  ;;  %2771 = vadd.xlane.f32.xlu1 %v2770_v39 }
0x1126   :  { %v2754_v45 = vpop.xlane.xlu0 %2753 }
0x1127   :  { %v2758_v54 = vsub.f32 %v2741_v57, %v2754_v45 }
0x1129   :  { %v3261_v19 = vpop.eup %3260  ;;  %v2765_v0 = vmul.f32 1.442695, %v2758_v54 }
0x112a   :  { %v2773_v41 = vsel %vm2653_vm1, %v3261_v19, 0.0 }
0x112b   :  { %3262 = vpow2.f32 %v2765_v0  ;;  %2774 = vadd.xlane.f32.xlu0 %v2773_v41 }
0x1131   :  { %v3263_v55 = vpop.eup %3262 }
0x1132   :  { %v2776_v3 = vsel %vm2653_vm1, %v3263_v55, 0.0 }
0x1133   :  { %2777 = vadd.xlane.f32.xlu2 %v2776_v3 }
0x118e   :  { %v2769_v17 = vpop.xlane.xlu2 %2768 }
0x118f   :  { %3264 = vlog2.f32 %v2769_v17 }
0x1195   :  { %v3265_v62 = vpop.eup %3264 }
0x1196   :  { %v2780_v44 = vmul.f32 0.6931472, %v3265_v62  ;;  %v2772_v50 = vpop.xlane.xlu1 %2771 }
0x1197   :  { %3266 = vlog2.f32 %v2772_v50 }
0x1198   :  { %v2787_v40 = vadd.f32 %v2780_v44, %v2745_v13 }
0x119a   :  { %v2791_v56 = vsub.f32 %v2732_v27, %v2787_v40 }
0x119c   :  { %2795 = vst.msk [vmem:[%s2831_s8] sm:$0xff] %vm2653_vm1, %v2791_v56 }
0x119d   :  { %v3267_v1 = vpop.eup %3266 }
0x119e   :  { %v2782_v2 = vmul.f32 0.6931472, %v3267_v1  ;;  %v2775_v16 = vpop.xlane.xlu0 %2774 }
0x119f   :  { %3268 = vlog2.f32 %v2775_v16 }
0x11a0   :  { %v2788_v52 = vadd.f32 %v2782_v2, %v2748_v38 }
0x11a2   :  { %v2792_v60 = vsub.f32 %v2735_v7, %v2788_v52 }
0x11a4   :  { %2796 = vst.msk [vmem:[%s2831_s8 + $0x8] sm:$0xff] %vm2653_vm1, %v2792_v60 }
0x11a5   :  { %v3269_v29 = vpop.eup %3268 }
0x11a6   :  { %v2784_v37 = vmul.f32 0.6931472, %v3269_v29  ;;  %v2778_v61 = vpop.xlane.xlu2 %2777 }
0x11a7   :  { %3270 = vlog2.f32 %v2778_v61 }
0x11a8   :  { %v2789_v10 = vadd.f32 %v2784_v37, %v2751_v42 }
0x11aa   :  { %v2793_v9 = vsub.f32 %v2738_v6, %v2789_v10 }
0x11ac   :  { %2797 = vst.msk [vmem:[%s2831_s8 + $0x10] sm:$0xff] %vm2653_vm1, %v2793_v9 }
0x11ad   :  { %v3271_v46 = vpop.eup %3270 }
0x11ae   :  { %v2786_v25 = vmul.f32 0.6931472, %v3271_v46 }
0x11b0   :  { %v2790_v58 = vadd.f32 %v2786_v25, %v2754_v45 }
0x11b2   :  { %v2794_v36 = vsub.f32 %v2741_v57, %v2790_v58 }
0x11b4   :  { %2798 = vst.msk [vmem:[%s2831_s8 + $0x18] sm:$0xff] %vm2653_vm1, %v2794_v36 }

</bundles_post_ra>
